<compile_context>
chip_gen: v7x
topology: tpu7x:2x2x1
jax: 0.10.0
libtpu: 0.0.40
codegen_flags: <defaults>
</compile_context>

<pallas_src>
import functools

import numpy as np
import jax
import jax.numpy as jnp
from jax.experimental import pallas as pl
from jax.experimental.pallas import tpu as pltpu


def _round_up(x, m):
    return ((x + m - 1) // m) * m


def _pad_gate_cols(w, D, D_pad):
    """(in, 4*D) -> (in, 4*D_pad): zero-pad each LSTM gate block to D_pad lanes."""
    if D_pad == D:
        return w
    parts = [jnp.pad(w[:, k * D:(k + 1) * D], ((0, 0), (0, D_pad - D))) for k in range(4)]
    return jnp.concatenate(parts, axis=1)


# ----------------------------------------------------------------------------
# Recurrent kernel: one grid step == one decode step for one batch tile.
# grid = (batch_tiles ["parallel"], T_pad ["arbitrary"]); h/c carried in VMEM
# scratch across the t axis.
# ----------------------------------------------------------------------------
def _recurrent_kernel(D_pad, A_pad, P,
                      hc0_ref, enc_ref, att1_ref, embp_ref,
                      w_hcat_ref, b_hcat_ref, w_fa_ref, b_fa_ref, w_xa_ref,
                      hs_ref, alphas_ref,
                      h_ref, c_ref):
    t = pl.program_id(1)
    G = 4 * D_pad

    @pl.when(t == 0)
    def _():
        h_ref[...] = hc0_ref[:, :D_pad]
        c_ref[...] = hc0_ref[:, D_pad:]

    h = h_ref[...]
    c = c_ref[...]
    cdt = w_hcat_ref.dtype  # matmul operand dtype (f32 or bf16)

    # fused h projection: [ LSTM W_hh | decoder-attention | f_beta ] (lane-aligned)
    hp = (jnp.dot(h.astype(cdt), w_hcat_ref[...], preferred_element_type=jnp.float32)
          + b_hcat_ref[...])                              # (TB, 4*D_pad + A_pad + E_pad)
    gates_h = hp[:, :G]
    att2 = hp[:, G:G + A_pad]
    gate = jax.nn.sigmoid(hp[:, G + A_pad:])              # (TB, E_pad)

    # attention scores + softmax over pixels
    att = jnp.maximum(att1_ref[...].astype(jnp.float32) + att2[:, None, :], 0.0)
    e = jnp.sum(att * w_fa_ref[...], axis=2) + b_fa_ref[...]        # (TB, P_pad)
    P_pad = e.shape[1]
    if P < P_pad:                                          # mask padded pixels
        pix = jax.lax.broadcasted_iota(jnp.int32, e.shape, 1)
        e = jnp.where(pix < P, e, jnp.float32(-1e30))
    e = e - jnp.max(e, axis=-1, keepdims=True)
    p = jnp.exp(e)
    alpha = p / jnp.sum(p, axis=-1, keepdims=True)         # exact divide (regularizer-safe)

    # attention-weighted encoding: MXU contraction, no (B,P,E) broadcast temporary
    enc = enc_ref[...]
    awe = jnp.einsum('bqp,bpe->bqe', alpha.astype(enc.dtype)[:, None, :], enc,
                     preferred_element_type=jnp.float32)[:, 0, :]    # (TB, E_pad)
    awe = gate * awe

    # LSTM cell: embedding half of the input projection was precomputed.
    gates = (embp_ref[0].astype(jnp.float32)
             + jnp.dot(awe.astype(w_xa_ref.dtype), w_xa_ref[...],
                       preferred_element_type=jnp.float32)
             + gates_h)                                    # (TB, 4*D_pad), gate slices lane-aligned
    i_g = jax.nn.sigmoid(gates[:, 0 * D_pad:1 * D_pad])
    f_g = jax.nn.sigmoid(gates[:, 1 * D_pad:2 * D_pad])
    g_g = jnp.tanh(gates[:, 2 * D_pad:3 * D_pad])
    o_g = jax.nn.sigmoid(gates[:, 3 * D_pad:4 * D_pad])
    c_new = f_g * c + i_g * g_g
    h_new = o_g * jnp.tanh(c_new)

    h_ref[...] = h_new
    c_ref[...] = c_new
    hs_ref[0] = h_new                                      # streamed to HBM per step
    alphas_ref[0] = alpha                                  # lane-dense (P_pad % 128 == 0)


# ----------------------------------------------------------------------------
# Post-loop FC: one big tiled matmul over all (t, b) rows at once.
# ----------------------------------------------------------------------------
def _fc_kernel(h_ref, w_ref, b_ref, o_ref):
    o_ref[...] = (jnp.dot(h_ref[...], w_ref[...], preferred_element_type=jnp.float32)
                  + b_ref[...]).astype(o_ref.dtype)


# ----------------------------------------------------------------------------
# Wrapper: sorting, embedding lookup, weight fusion, lane-aligned padding.
# ----------------------------------------------------------------------------
def decoder_forward(params, encoder_out, encoded_captions, caption_lengths,
                    compute_dtype=jnp.float32):
    f32 = jnp.float32
    B = encoder_out.shape[0]
    E = encoder_out.shape[-1]
    enc = encoder_out.reshape(B, -1, E).astype(f32)        # (B, P, E)
    P = enc.shape[1]
    caps = encoded_captions.reshape(B, -1)                 # (B, T_cap)
    lens = caption_lengths.reshape(B)                      # squeeze(1)

    sort_ind = jnp.argsort(-lens)                          # descending sort
    lens_sorted = lens[sort_ind]
    enc = jnp.take(enc, sort_ind, axis=0)
    caps = jnp.take(caps, sort_ind, axis=0)

    # decode_lengths is returned as a Python list (mirrors `.tolist()`); this is
    # the only host sync, and the kernel recompiles per 8-step T bucket only.
    decode_lengths = [int(x) for x in np.asarray(lens_sorted) - 1]
    T_max = max(decode_lengths)
    T_pad = _round_up(max(T_max, 1), 8)

    Ed = params['embedding'].shape[1]
    D = params['w_hh'].shape[0]
    A = params['w_enc_att'].shape[1]
    V = params['w_fc'].shape[1]

    B_pad = _round_up(B, 8)
    P_pad = _round_up(P, 128)
    A_pad = _round_up(A, 128)
    E_pad = _round_up(E, 128)
    D_pad = _round_up(D, 128)
    V_pad = _round_up(V, 128)
    TB = 8 if B_pad > 8 else B_pad                         # batch tile (parallel axis)
    grid_b = B_pad // TB
    W_cat = 4 * D_pad + A_pad + E_pad

    # ---- hoisted / loop-invariant precompute (plain XLA) --------------------
    mean_enc = jnp.mean(enc, axis=1)                                       # (B, E)
    h0 = mean_enc @ params['w_init_h'] + params['b_init_h']                # (B, D)
    c0 = mean_enc @ params['w_init_c'] + params['b_init_c']
    hc0 = jnp.concatenate(
        [jnp.pad(h0, ((0, B_pad - B), (0, D_pad - D))),
         jnp.pad(c0, ((0, B_pad - B), (0, D_pad - D)))], axis=1)           # (B_pad, 2*D_pad)

    att1 = jnp.einsum('bpe,ea->bpa', enc, params['w_enc_att']) + params['b_enc_att']
    att1_p = jnp.pad(att1, ((0, B_pad - B), (0, P_pad - P), (0, A_pad - A))).astype(compute_dtype)
    enc_p = jnp.pad(enc, ((0, B_pad - B), (0, P_pad - P), (0, E_pad - E))).astype(compute_dtype)

    # embedding half of the LSTM input projection, hoisted out of the loop
    emb = params['embedding'][caps]                                        # (B, T_cap, Ed)
    T_cap = emb.shape[1]
    emb = emb[:, :T_pad] if T_cap >= T_pad else jnp.pad(emb, ((0, 0), (0, T_pad - T_cap), (0, 0)))
    emb = jnp.pad(emb, ((0, B_pad - B), (0, 0), (0, 0)))
    w_xe_p = _pad_gate_cols(params['w_xe'], D, D_pad)                      # (Ed, 4*D_pad)
    emb_proj = jnp.einsum('btd,dg->tbg', emb, w_xe_p).astype(compute_dtype)  # (T_pad, B_pad, 4*D_pad)

    # ---- fused, lane-aligned h-projection weight -----------------------------
    w_hh_p = jnp.pad(_pad_gate_cols(params['w_hh'], D, D_pad), ((0, D_pad - D), (0, 0)))
    w_da_p = jnp.pad(params['w_dec_att'], ((0, D_pad - D), (0, A_pad - A)))
    w_fb_p = jnp.pad(params['w_f_beta'], ((0, D_pad - D), (0, E_pad - E)))
    w_hcat = jnp.concatenate([w_hh_p, w_da_p, w_fb_p], axis=1).astype(compute_dtype)  # (D_pad, W_cat)
    b_hcat = jnp.concatenate(
        [_pad_gate_cols(params['b_lstm'], D, D_pad),
         jnp.pad(params['b_dec_att'], ((0, 0), (0, A_pad - A))),
         jnp.pad(params['b_f_beta'], ((0, 0), (0, E_pad - E)))], axis=1).astype(f32)  # (1, W_cat)

    w_fa = jnp.pad(params['w_full_att'], ((0, 0), (0, 0), (0, A_pad - A))).astype(f32)  # (1,1,A_pad)
    b_fa = params['b_full_att'].astype(f32)                                              # (1,1)
    w_xa = jnp.pad(_pad_gate_cols(params['w_xa'], D, D_pad),
                   ((0, E_pad - E), (0, 0))).astype(compute_dtype)                       # (E_pad, 4*D_pad)

    # ---- recurrent pallas_call ----------------------------------------------
    kernel = functools.partial(_recurrent_kernel, D_pad, A_pad, P)
    in_specs = [
        pl.BlockSpec((TB, 2 * D_pad), lambda b, t: (b, 0)),          # hc0
        pl.BlockSpec((TB, P_pad, E_pad), lambda b, t: (b, 0, 0)),    # enc (resident)
        pl.BlockSpec((TB, P_pad, A_pad), lambda b, t: (b, 0, 0)),    # att1 (resident)
        pl.BlockSpec((1, TB, 4 * D_pad), lambda b, t: (t, b, 0)),    # emb_proj (streamed on t)
        pl.BlockSpec((D_pad, W_cat), lambda b, t: (0, 0)),           # w_hcat
        pl.BlockSpec((1, W_cat), lambda b, t: (0, 0)),               # b_hcat
        pl.BlockSpec((1, 1, A_pad), lambda b, t: (0, 0, 0)),         # w_full_att
        pl.BlockSpec((1, 1), lambda b, t: (0, 0)),                   # b_full_att
        pl.BlockSpec((E_pad, 4 * D_pad), lambda b, t: (0, 0)),       # w_xa
    ]
    out_specs = (
        pl.BlockSpec((1, TB, D_pad), lambda b, t: (t, b, 0)),        # h_t (streamed on t)
        pl.BlockSpec((1, TB, P_pad), lambda b, t: (t, b, 0)),        # alpha_t (streamed on t)
    )

    # scoped VMEM budget from the actual resident footprint (+ headroom)
    nbytes = lambda *s: 4 * int(np.prod(s))
    resident = (nbytes(TB, 2 * D_pad) + nbytes(TB, P_pad, E_pad) + nbytes(TB, P_pad, A_pad)
                + nbytes(D_pad, W_cat) + nbytes(1, W_cat) + nbytes(A_pad)
                + nbytes(E_pad, 4 * D_pad))
    streamed = nbytes(TB, 4 * D_pad) + nbytes(TB, D_pad) + nbytes(TB, P_pad)
    est = 2 * (resident + streamed) + 2 * nbytes(TB, D_pad)
    vmem_limit = int(min(max(est + est // 2 + (4 << 20), 32 << 20), 64 << 20))

    hs, alphas_tm = pl.pallas_call(
        kernel,
        out_shape=(jax.ShapeDtypeStruct((T_pad, B_pad, D_pad), f32),
                   jax.ShapeDtypeStruct((T_pad, B_pad, P_pad), f32)),
        grid=(grid_b, T_pad),
        in_specs=in_specs,
        out_specs=out_specs,
        scratch_shapes=[pltpu.VMEM((TB, D_pad), f32),
                        pltpu.VMEM((TB, D_pad), f32)],
        compiler_params=pltpu.CompilerParams(
            dimension_semantics=("parallel", "arbitrary"),
            vmem_limit_bytes=vmem_limit),
    )(hc0, enc_p, att1_p, emb_proj, w_hcat, b_hcat, w_fa, b_fa, w_xa)

    # ---- hoisted vocab FC: one big tiled matmul over all (t, b) rows --------
    # TODO(synk): nn.Dropout(p=0.5) is identity in eval mode; training-mode
    # dropout would use pltpu.prng_seed / pltpu.prng_random_bits on h here.
    M = T_pad * B_pad
    w_fc_p = jnp.pad(params['w_fc'], ((0, D_pad - D), (0, V_pad - V))).astype(compute_dtype)
    b_fc_p = jnp.pad(params['b_fc'], ((0, 0), (0, V_pad - V))).astype(f32)
    h_flat = hs.reshape(M, D_pad).astype(compute_dtype)

    tm = next(t for t in (512, 256, 128, 64, 8) if M % t == 0)
    tn = next(t for t in (512, 256, 128) if V_pad % t == 0)
    fc_bytes = 4 * (tm * D_pad + D_pad * tn + tn + tm * tn)
    vmem_fc = int(min(max(3 * fc_bytes + (4 << 20), 32 << 20), 64 << 20))

    preds_flat = pl.pallas_call(
        _fc_kernel,
        out_shape=jax.ShapeDtypeStruct((M, V_pad), f32),
        grid=(M // tm, V_pad // tn),
        in_specs=[pl.BlockSpec((tm, D_pad), lambda i, j: (i, 0)),
                  pl.BlockSpec((D_pad, tn), lambda i, j: (0, j)),
                  pl.BlockSpec((1, tn), lambda i, j: (0, j))],
        out_specs=pl.BlockSpec((tm, tn), lambda i, j: (i, j)),
        compiler_params=pltpu.CompilerParams(
            dimension_semantics=("parallel", "parallel"),
            vmem_limit_bytes=vmem_fc),
    )(h_flat, w_fc_p, b_fc_p)

    # ---- layout back to (B, T, ·), slice padding, apply length mask ---------
    preds_tm = preds_flat.reshape(T_pad, B_pad, V_pad)
    predictions = jnp.transpose(preds_tm, (1, 0, 2))[:B, :T_max, :V]
    alphas = jnp.transpose(alphas_tm, (1, 0, 2))[:B, :T_max, :P]

    lens_dec = jnp.asarray(decode_lengths, jnp.int32)
    valid = (jnp.arange(T_max)[None, :] < lens_dec[:, None]).astype(f32)   # (B, T_max)
    predictions = predictions * valid[:, :, None]
    alphas = alphas * valid[:, :, None]
    return predictions, caps, decode_lengths, alphas, sort_ind


# ----------------------------------------------------------------------------
# Deterministic parameter init (shapes from Decoder.__init__; weights stored
# transposed as (in, out) so all matmuls are x @ W + b).
# ----------------------------------------------------------------------------
def init_params(key, attention_dim, embed_dim, decoder_dim, vocab_size, encoder_dim):
    A, Ed, D, V, E = attention_dim, embed_dim, decoder_dim, vocab_size, encoder_dim
    ks = jax.random.split(key, 20)
    u = lambda k, shape, s=0.1: jax.random.uniform(k, shape, jnp.float32, -s, s)
    return dict(
        embedding=u(ks[0], (V, Ed)),                      # uniform_(-0.1, 0.1)
        w_enc_att=u(ks[1], (E, A)),  b_enc_att=u(ks[2], (1, 1, A)),
        w_dec_att=u(ks[3], (D, A)),  b_dec_att=u(ks[4], (1, A)),
        w_full_att=u(ks[5], (1, 1, A)), b_full_att=u(ks[6], (1, 1)),
        w_init_h=u(ks[7], (E, D)),   b_init_h=u(ks[8], (1, D)),
        w_init_c=u(ks[9], (E, D)),   b_init_c=u(ks[10], (1, D)),
        w_f_beta=u(ks[11], (D, E)),  b_f_beta=u(ks[12], (1, E)),
        w_xe=u(ks[13], (Ed, 4 * D)),                      # LSTMCell W_ih (embed part)
        w_xa=u(ks[14], (E, 4 * D)),                       # LSTMCell W_ih (enc part)
        w_hh=u(ks[15], (D, 4 * D)),                       # LSTMCell W_hh
        b_lstm=u(ks[16], (1, 4 * D)),                     # b_ih + b_hh combined
        w_fc=u(ks[17], (D, V)),                           # uniform_(-0.1, 0.1)
        b_fc=jnp.zeros((1, V), jnp.float32),              # fill_(0)
    )


# ----------------------------------------------------------------------------
# Pure-numpy reference (mirrors the PyTorch forward semantics on sorted inputs)
# ----------------------------------------------------------------------------
def reference_forward(params, enc_s, emb_s, dec_lens):
    pr = {k: np.asarray(v) for k, v in params.items()}
    enc_s = np.asarray(enc_s, np.float32); emb_s = np.asarray(emb_s, np.float32)
    B, P, E = enc_s.shape
    D = pr['w_hh'].shape[0]
    V = pr['w_fc'].shape[1]
    Tm = max(dec_lens)
    sig = lambda x: 1.0 / (1.0 + np.exp(-x))

    mean_enc = enc_s.mean(axis=1)
    h = mean_enc @ pr['w_init_h'] + pr['b_init_h']
    c = mean_enc @ pr['w_init_c'] + pr['b_init_c']
    att1 = enc_s @ pr['w_enc_att'] + pr['b_enc_att']
    preds_all = np.zeros((B, Tm, V), np.float32)
    alphas_all = np.zeros((B, Tm, P), np.float32)
    lens_arr = np.asarray(dec_lens)

    for t in range(Tm):
        mask = (lens_arr > t)[:, None]
        att2 = h @ pr['w_dec_att'] + pr['b_dec_att']
        att = np.maximum(att1 + att2[:, None, :], 0.0)
        e = (att * pr['w_full_att']).sum(axis=2) + pr['b_full_att']
        e = e - e.max(axis=-1, keepdims=True)
        pexp = np.exp(e)
        alpha = pexp / pexp.sum(axis=-1, keepdims=True)
        awe = (enc_s * alpha[:, :, None]).sum(axis=1)
        gate = sig(h @ pr['w_f_beta'] + pr['b_f_beta'])
        awe = gate * awe
        gates = (emb_s[:, t, :] @ pr['w_xe'] + awe @ pr['w_xa']
                 + h @ pr['w_hh'] + pr['b_lstm'])
        i_g = sig(gates[:, 0 * D:1 * D]); f_g = sig(gates[:, 1 * D:2 * D])
        g_g = np.tanh(gates[:, 2 * D:3 * D]); o_g = sig(gates[:, 3 * D:4 * D])
        c = f_g * c + i_g * g_g
        h = o_g * np.tanh(c)
        preds = h @ pr['w_fc'] + pr['b_fc']
        preds_all[:, t, :] = np.where(mask, preds, 0.0)
        alphas_all[:, t, :] = np.where(mask, alpha, 0.0)
    return preds_all, alphas_all


# ----------------------------------------------------------------------------
if __name__ == "__main__":
    key = jax.random.PRNGKey(0)
    attention_dim, embed_dim, decoder_dim = 32, 32, 64
    vocab_size, encoder_dim = 80, 64
    B, Hs, Ws, T_cap = 4, 4, 4, 9

    k_enc, k_cap, k_par = jax.random.split(key, 3)
    params = init_params(k_par, attention_dim, embed_dim, decoder_dim,
                         vocab_size, encoder_dim)

    encoder_out = jax.random.normal(k_enc, (B, Hs, Ws, encoder_dim), jnp.float32)
    encoded_captions = jax.random.randint(k_cap, (B, T_cap), 0, vocab_size, jnp.int32)
    caption_lengths = jnp.array([[6], [9], [5], [8]], dtype=jnp.int32)

    predictions, caps_sorted, decode_lengths, alphas, sort_ind = decoder_forward(
        params, encoder_out, encoded_captions, caption_lengths)
    jax.block_until_ready((predictions, alphas, caps_sorted, sort_ind))

    # reference check on the same sorted inputs
    enc_s = jnp.take(encoder_out.reshape(B, -1, encoder_dim), sort_ind, axis=0)
    emb_s = params['embedding'][jnp.take(encoded_captions.reshape(B, -1), sort_ind, axis=0)]
    ref_p, ref_a = reference_forward(params, enc_s, emb_s, decode_lengths)
    assert predictions.shape == ref_p.shape and alphas.shape == ref_a.shape
    assert np.allclose(np.asarray(predictions), ref_p, atol=3e-3, rtol=3e-3)
    assert np.allclose(np.asarray(alphas), ref_a, atol=1e-3, rtol=1e-3)

    print("KERNEL_OK")
</pallas_src>

<mosaic_0001>
module attributes {stable_mosaic.version = 11 : i64} {
  func.func @_recurrent_kernel(%arg0: i32, %arg1: i32, %arg2: memref<8x256xf32, #tpu.memory_space<vmem>>, %arg3: memref<8x128x128xf32, #tpu.memory_space<vmem>>, %arg4: memref<8x128x128xf32, #tpu.memory_space<vmem>>, %arg5: memref<1x8x512xf32, #tpu.memory_space<vmem>>, %arg6: memref<128x768xf32, #tpu.memory_space<vmem>>, %arg7: memref<1x768xf32, #tpu.memory_space<vmem>>, %arg8: memref<1x1x128xf32, #tpu.memory_space<vmem>>, %arg9: memref<1x1xf32, #tpu.memory_space<vmem>>, %arg10: memref<128x512xf32, #tpu.memory_space<vmem>>, %arg11: memref<1x8x128xf32, #tpu.memory_space<vmem>>, %arg12: memref<1x8x128xf32, #tpu.memory_space<vmem>>, %arg13: memref<8x128xf32, #tpu.memory_space<vmem>>, %arg14: memref<8x128xf32, #tpu.memory_space<vmem>>) attributes {dimension_semantics = [#tpu.dimension_semantics<parallel>, #tpu.dimension_semantics<arbitrary>], iteration_bounds = array<i64: 1, 8>, scalar_prefetch = 0 : i64, scratch_operands = 2 : i64, tpu.core_type = #tpu.core_type<tc>, window_params = [{transform_indices = @transform_0, window_bounds = array<i64: 8, 256>}, {transform_indices = @transform_1, window_bounds = array<i64: 8, 128, 128>}, {transform_indices = @transform_2, window_bounds = array<i64: 8, 128, 128>}, {transform_indices = @transform_3, window_bounds = array<i64: 1, 8, 512>}, {pipeline_mode = #tpu.pipeline_mode<synchronous>, transform_indices = @transform_4, window_bounds = array<i64: 128, 768>}, {pipeline_mode = #tpu.pipeline_mode<synchronous>, transform_indices = @transform_5, window_bounds = array<i64: 1, 768>}, {pipeline_mode = #tpu.pipeline_mode<synchronous>, transform_indices = @transform_6, window_bounds = array<i64: 1, 1, 128>}, {pipeline_mode = #tpu.pipeline_mode<synchronous>, transform_indices = @transform_7, window_bounds = array<i64: 1, 1>}, {pipeline_mode = #tpu.pipeline_mode<synchronous>, transform_indices = @transform_8, window_bounds = array<i64: 128, 512>}, {transform_indices = @transform_9, window_bounds = array<i64: 1, 8, 128>}, {transform_indices = @transform_10, window_bounds = array<i64: 1, 8, 128>}]} {
    %c0_i32 = arith.constant 0 : i32
    %0 = arith.cmpi eq, %arg1, %c0_i32 : i32
    %1 = arith.extui %0 : i1 to i32
    %c0_i32_0 = arith.constant 0 : i32
    %2 = arith.cmpi ne, %1, %c0_i32_0 : i32
    scf.if %2 {
      %c0_45 = arith.constant 0 : index
      %c0_46 = arith.constant 0 : index
      %89 = vector.load %arg2[%c0_45, %c0_46] : memref<8x256xf32, #tpu.memory_space<vmem>>, vector<8x128xf32>
      %c0_47 = arith.constant 0 : index
      %c0_48 = arith.constant 0 : index
      %90 = vector.load %arg13[%c0_47, %c0_48] : memref<8x128xf32, #tpu.memory_space<vmem>>, vector<8x128xf32>
      tpu.vector_store %arg13[%c0_47, %c0_48], %89 {strides = array<i32>} : memref<8x128xf32, #tpu.memory_space<vmem>>, vector<8x128xf32>,
      %c0_49 = arith.constant 0 : index
      %c128 = arith.constant 128 : index
      %91 = vector.load %arg2[%c0_49, %c128] : memref<8x256xf32, #tpu.memory_space<vmem>>, vector<8x128xf32>
      %c0_50 = arith.constant 0 : index
      %c0_51 = arith.constant 0 : index
      %92 = vector.load %arg14[%c0_50, %c0_51] : memref<8x128xf32, #tpu.memory_space<vmem>>, vector<8x128xf32>
      tpu.vector_store %arg14[%c0_50, %c0_51], %91 {strides = array<i32>} : memref<8x128xf32, #tpu.memory_space<vmem>>, vector<8x128xf32>,
    } else {
    }
    %c0 = arith.constant 0 : index
    %c0_1 = arith.constant 0 : index
    %3 = vector.load %arg13[%c0, %c0_1] : memref<8x128xf32, #tpu.memory_space<vmem>>, vector<8x128xf32>
    %c0_2 = arith.constant 0 : index
    %c0_3 = arith.constant 0 : index
    %4 = vector.load %arg14[%c0_2, %c0_3] : memref<8x128xf32, #tpu.memory_space<vmem>>, vector<8x128xf32>
    %c0_4 = arith.constant 0 : index
    %c0_5 = arith.constant 0 : index
    %5 = vector.load %arg6[%c0_4, %c0_5] : memref<128x768xf32, #tpu.memory_space<vmem>>, vector<128x768xf32>
    %cst = arith.constant dense<0.000000e+00> : vector<8x768xf32>
    %6 = tpu.matmul %3, %5, %cst {dimension_numbers = #tpu.dot_dimension_numbers<[1], [0], [0], [1], [0, 0, 1, 1], [], []>} : vector<8x128xf32>, vector<128x768xf32>, vector<8x768xf32> -> vector<8x768xf32>
    %c0_6 = arith.constant 0 : index
    %c0_7 = arith.constant 0 : index
    %7 = vector.load %arg7[%c0_6, %c0_7] : memref<1x768xf32, #tpu.memory_space<vmem>>, vector<1x768xf32>
    %8 = vector.broadcast %7 : vector<1x768xf32> to vector<8x768xf32>
    %9 = arith.addf %6, %8 : vector<8x768xf32>
    %10 = vector.extract_strided_slice %9 {offsets = [0, 0], sizes = [8, 512], strides = [1, 1]} : vector<8x768xf32> to vector<8x512xf32>
    %11 = vector.extract_strided_slice %9 {offsets = [0, 512], sizes = [8, 128], strides = [1, 1]} : vector<8x768xf32> to vector<8x128xf32>
    %12 = vector.extract_strided_slice %9 {offsets = [0, 640], sizes = [8, 128], strides = [1, 1]} : vector<8x768xf32> to vector<8x128xf32>
    %13 = arith.negf %12 : vector<8x128xf32>
    %14 = math.exp %13 : vector<8x128xf32>
    %cst_8 = arith.constant 1.000000e+00 : f32
    %15 = vector.broadcast %cst_8 : f32 to vector<8x128xf32>
    %16 = arith.addf %15, %14 : vector<8x128xf32>
    %17 = arith.divf %15, %16 : vector<8x128xf32>
    %c0_9 = arith.constant 0 : index
    %c0_10 = arith.constant 0 : index
    %c0_11 = arith.constant 0 : index
    %18 = vector.load %arg4[%c0_9, %c0_10, %c0_11] : memref<8x128x128xf32, #tpu.memory_space<vmem>>, vector<8x128x128xf32>
    %19 = vector.shape_cast %11 : vector<8x128xf32> to vector<8x1x128xf32>
    %20 = vector.broadcast %19 : vector<8x1x128xf32> to vector<8x128x128xf32>
    %21 = arith.addf %18, %20 : vector<8x128x128xf32>
    %cst_12 = arith.constant 0.000000e+00 : f32
    %22 = vector.broadcast %cst_12 : f32 to vector<8x128x128xf32>
    %23 = arith.maximumf %21, %22 : vector<8x128x128xf32>
    %c0_13 = arith.constant 0 : index
    %c0_14 = arith.constant 0 : index
    %c0_15 = arith.constant 0 : index
    %24 = vector.load %arg8[%c0_13, %c0_14, %c0_15] : memref<1x1x128xf32, #tpu.memory_space<vmem>>, vector<1x1x128xf32>
    %25 = vector.broadcast %24 : vector<1x1x128xf32> to vector<8x128x128xf32>
    %26 = arith.mulf %23, %25 : vector<8x128x128xf32>
    %cst_16 = arith.constant dense<0.000000e+00> : vector<8x128xf32>
    %27 = vector.multi_reduction <add>, %26, %cst_16 [2] : vector<8x128x128xf32> to vector<8x128xf32>
    %c0_17 = arith.constant 0 : index
    %c0_18 = arith.constant 0 : index
    %28 = vector.load %arg9[%c0_17, %c0_18] : memref<1x1xf32, #tpu.memory_space<vmem>>, vector<1x1xf32>
    %29 = vector.broadcast %28 : vector<1x1xf32> to vector<8x128xf32>
    %30 = arith.addf %27, %29 : vector<8x128xf32>
    %31 = tpu.iota {dimensions = array<i32: 1>} : vector<8x128xi32>
    %c16_i32 = arith.constant 16 : i32
    %32 = vector.broadcast %c16_i32 : i32 to vector<8x128xi32>
    %33 = arith.cmpi slt, %31, %32 : vector<8x128xi32>
    %cst_19 = arith.constant -1.000000e+30 : f32
    %34 = vector.broadcast %cst_19 : f32 to vector<8x128xf32>
    %35 = arith.select %33, %30, %34 : vector<8x128xi1>, vector<8x128xf32>
    %cst_20 = arith.constant dense<0xFF800000> : vector<8xf32>
    %36 = vector.multi_reduction <maximumf>, %35, %cst_20 [1] : vector<8x128xf32> to vector<8xf32>
    %37 = vector.shape_cast %36 : vector<8xf32> to vector<8x1xf32>
    %38 = vector.broadcast %37 : vector<8x1xf32> to vector<8x128xf32>
    %39 = arith.subf %35, %38 : vector<8x128xf32>
    %40 = math.exp %39 : vector<8x128xf32>
    %cst_21 = arith.constant dense<0.000000e+00> : vector<8xf32>
    %41 = vector.multi_reduction <add>, %40, %cst_21 [1] : vector<8x128xf32> to vector<8xf32>
    %42 = vector.shape_cast %41 : vector<8xf32> to vector<8x1xf32>
    %43 = vector.broadcast %42 : vector<8x1xf32> to vector<8x128xf32>
    %44 = arith.divf %40, %43 : vector<8x128xf32>
    %c0_22 = arith.constant 0 : index
    %c0_23 = arith.constant 0 : index
    %c0_24 = arith.constant 0 : index
    %45 = vector.load %arg3[%c0_22, %c0_23, %c0_24] : memref<8x128x128xf32, #tpu.memory_space<vmem>>, vector<8x128x128xf32>
    %46 = vector.shape_cast %44 : vector<8x128xf32> to vector<8x1x128xf32>
    "tpu.trace_start"() <{level = 10 : i32, message = "bqp,bpe->bqe"}> : () -> ()
    %cst_25 = arith.constant dense<0.000000e+00> : vector<8x1x128xf32>
    %47 = tpu.matmul %46, %45, %cst_25 {dimension_numbers = #tpu.dot_dimension_numbers<[2], [1], [1], [2], [0, 0, 0, 1, 1, 2], [0], [0]>} : vector<8x1x128xf32>, vector<8x128x128xf32>, vector<8x1x128xf32> -> vector<8x1x128xf32>
    "tpu.trace_stop"() : () -> ()
    %48 = vector.shape_cast %47 : vector<8x1x128xf32> to vector<8x128xf32>
    %49 = arith.mulf %17, %48 : vector<8x128xf32>
    %c0_26 = arith.constant 0 : index
    %c0_27 = arith.constant 0 : index
    %c0_28 = arith.constant 0 : index
    %50 = vector.load %arg5[%c0_26, %c0_27, %c0_28] : memref<1x8x512xf32, #tpu.memory_space<vmem>>, vector<1x8x512xf32>
    %51 = vector.shape_cast %50 : vector<1x8x512xf32> to vector<8x512xf32>
    %c0_29 = arith.constant 0 : index
    %c0_30 = arith.constant 0 : index
    %52 = vector.load %arg10[%c0_29, %c0_30] : memref<128x512xf32, #tpu.memory_space<vmem>>, vector<128x512xf32>
    %cst_31 = arith.constant dense<0.000000e+00> : vector<8x512xf32>
    %53 = tpu.matmul %49, %52, %cst_31 {dimension_numbers = #tpu.dot_dimension_numbers<[1], [0], [0], [1], [0, 0, 1, 1], [], []>} : vector<8x128xf32>, vector<128x512xf32>, vector<8x512xf32> -> vector<8x512xf32>
    %54 = arith.addf %51, %53 : vector<8x512xf32>
    %55 = arith.addf %54, %10 : vector<8x512xf32>
    %56 = vector.extract_strided_slice %55 {offsets = [0, 0], sizes = [8, 128], strides = [1, 1]} : vector<8x512xf32> to vector<8x128xf32>
    %57 = arith.negf %56 : vector<8x128xf32>
    %58 = math.exp %57 : vector<8x128xf32>
    %cst_32 = arith.constant 1.000000e+00 : f32
    %59 = vector.broadcast %cst_32 : f32 to vector<8x128xf32>
    %60 = arith.addf %59, %58 : vector<8x128xf32>
    %61 = arith.divf %59, %60 : vector<8x128xf32>
    %62 = vector.extract_strided_slice %55 {offsets = [0, 128], sizes = [8, 128], strides = [1, 1]} : vector<8x512xf32> to vector<8x128xf32>
    %63 = arith.negf %62 : vector<8x128xf32>
    %64 = math.exp %63 : vector<8x128xf32>
    %cst_33 = arith.constant 1.000000e+00 : f32
    %65 = vector.broadcast %cst_33 : f32 to vector<8x128xf32>
    %66 = arith.addf %65, %64 : vector<8x128xf32>
    %67 = arith.divf %65, %66 : vector<8x128xf32>
    %68 = vector.extract_strided_slice %55 {offsets = [0, 256], sizes = [8, 128], strides = [1, 1]} : vector<8x512xf32> to vector<8x128xf32>
    %69 = math.tanh %68 : vector<8x128xf32>
    %70 = vector.extract_strided_slice %55 {offsets = [0, 384], sizes = [8, 128], strides = [1, 1]} : vector<8x512xf32> to vector<8x128xf32>
    %71 = arith.negf %70 : vector<8x128xf32>
    %72 = math.exp %71 : vector<8x128xf32>
    %cst_34 = arith.constant 1.000000e+00 : f32
    %73 = vector.broadcast %cst_34 : f32 to vector<8x128xf32>
    %74 = arith.addf %73, %72 : vector<8x128xf32>
    %75 = arith.divf %73, %74 : vector<8x128xf32>
    %76 = arith.mulf %67, %4 : vector<8x128xf32>
    %77 = arith.mulf %61, %69 : vector<8x128xf32>
    %78 = arith.addf %76, %77 : vector<8x128xf32>
    %79 = math.tanh %78 : vector<8x128xf32>
    %80 = arith.mulf %75, %79 : vector<8x128xf32>
    %c0_35 = arith.constant 0 : index
    %c0_36 = arith.constant 0 : index
    %81 = vector.load %arg13[%c0_35, %c0_36] : memref<8x128xf32, #tpu.memory_space<vmem>>, vector<8x128xf32>
    tpu.vector_store %arg13[%c0_35, %c0_36], %80 {strides = array<i32>} : memref<8x128xf32, #tpu.memory_space<vmem>>, vector<8x128xf32>,
    %c0_37 = arith.constant 0 : index
    %c0_38 = arith.constant 0 : index
    %82 = vector.load %arg14[%c0_37, %c0_38] : memref<8x128xf32, #tpu.memory_space<vmem>>, vector<8x128xf32>
    tpu.vector_store %arg14[%c0_37, %c0_38], %78 {strides = array<i32>} : memref<8x128xf32, #tpu.memory_space<vmem>>, vector<8x128xf32>,
    %c0_39 = arith.constant 0 : index
    %c0_40 = arith.constant 0 : index
    %c0_41 = arith.constant 0 : index
    %83 = vector.load %arg11[%c0_39, %c0_40, %c0_41] : memref<1x8x128xf32, #tpu.memory_space<vmem>>, vector<1x8x128xf32>
    %84 = vector.shape_cast %83 : vector<1x8x128xf32> to vector<8x128xf32>
    %85 = vector.shape_cast %80 : vector<8x128xf32> to vector<1x8x128xf32>
    tpu.vector_store %arg11[%c0_39, %c0_40, %c0_41], %85 {strides = array<i32>} : memref<1x8x128xf32, #tpu.memory_space<vmem>>, vector<1x8x128xf32>,
    %c0_42 = arith.constant 0 : index
    %c0_43 = arith.constant 0 : index
    %c0_44 = arith.constant 0 : index
    %86 = vector.load %arg12[%c0_42, %c0_43, %c0_44] : memref<1x8x128xf32, #tpu.memory_space<vmem>>, vector<1x8x128xf32>
    %87 = vector.shape_cast %86 : vector<1x8x128xf32> to vector<8x128xf32>
    %88 = vector.shape_cast %44 : vector<8x128xf32> to vector<1x8x128xf32>
    tpu.vector_store %arg12[%c0_42, %c0_43, %c0_44], %88 {strides = array<i32>} : memref<1x8x128xf32, #tpu.memory_space<vmem>>, vector<1x8x128xf32>,
    return
  }
  func.func @transform_0(%arg0: i32, %arg1: i32) -> (i32, i32) {
    %c0_i32 = arith.constant 0 : i32
    %c0_i32_0 = arith.constant 0 : i32
    return %arg0, %c0_i32 : i32, i32
  }
  func.func @transform_1(%arg0: i32, %arg1: i32) -> (i32, i32, i32) {
    %c0_i32 = arith.constant 0 : i32
    %c0_i32_0 = arith.constant 0 : i32
    %c0_i32_1 = arith.constant 0 : i32
    return %arg0, %c0_i32, %c0_i32_0 : i32, i32, i32
  }
  func.func @transform_2(%arg0: i32, %arg1: i32) -> (i32, i32, i32) {
    %c0_i32 = arith.constant 0 : i32
    %c0_i32_0 = arith.constant 0 : i32
    %c0_i32_1 = arith.constant 0 : i32
    return %arg0, %c0_i32, %c0_i32_0 : i32, i32, i32
  }
  func.func @transform_3(%arg0: i32, %arg1: i32) -> (i32, i32, i32) {
    %c0_i32 = arith.constant 0 : i32
    %c0_i32_0 = arith.constant 0 : i32
    return %arg1, %arg0, %c0_i32 : i32, i32, i32
  }
  func.func @transform_4(%arg0: i32, %arg1: i32) -> (i32, i32) {
    %c0_i32 = arith.constant 0 : i32
    %c0_i32_0 = arith.constant 0 : i32
    %c0_i32_1 = arith.constant 0 : i32
    return %c0_i32, %c0_i32_0 : i32, i32
  }
  func.func @transform_5(%arg0: i32, %arg1: i32) -> (i32, i32) {
    %c0_i32 = arith.constant 0 : i32
    %c0_i32_0 = arith.constant 0 : i32
    %c0_i32_1 = arith.constant 0 : i32
    return %c0_i32, %c0_i32_0 : i32, i32
  }
  func.func @transform_6(%arg0: i32, %arg1: i32) -> (i32, i32, i32) {
    %c0_i32 = arith.constant 0 : i32
    %c0_i32_0 = arith.constant 0 : i32
    %c0_i32_1 = arith.constant 0 : i32
    %c0_i32_2 = arith.constant 0 : i32
    return %c0_i32, %c0_i32_0, %c0_i32_1 : i32, i32, i32
  }
  func.func @transform_7(%arg0: i32, %arg1: i32) -> (i32, i32) {
    %c0_i32 = arith.constant 0 : i32
    %c0_i32_0 = arith.constant 0 : i32
    %c0_i32_1 = arith.constant 0 : i32
    return %c0_i32, %c0_i32_0 : i32, i32
  }
  func.func @transform_8(%arg0: i32, %arg1: i32) -> (i32, i32) {
    %c0_i32 = arith.constant 0 : i32
    %c0_i32_0 = arith.constant 0 : i32
    %c0_i32_1 = arith.constant 0 : i32
    return %c0_i32, %c0_i32_0 : i32, i32
  }
  func.func @transform_9(%arg0: i32, %arg1: i32) -> (i32, i32, i32) {
    %c0_i32 = arith.constant 0 : i32
    %c0_i32_0 = arith.constant 0 : i32
    return %arg1, %arg0, %c0_i32 : i32, i32, i32
  }
  func.func @transform_10(%arg0: i32, %arg1: i32) -> (i32, i32, i32) {
    %c0_i32 = arith.constant 0 : i32
    %c0_i32_0 = arith.constant 0 : i32
    return %arg1, %arg0, %c0_i32 : i32, i32, i32
  }
}

</mosaic_0001>

<bundles_post_ra>
// kernel: tpu_custom_call.1
= control target key start
LH: loop header
LB: loop body
LE: loop exit
PB: predicated region body
PF: predicated region fallthrough
CT: control target
= control target key end

     0   :  { %s6599_s0 = inlined_call_operand.hbm [shape: f32[8,256], index: 0, kind: input, shape index: {}]   ;;  %s6600_s1 = inlined_call_operand.hbm [shape: f32[8,128,128], index: 1, kind: input, shape index: {}]   ;;  %s6601_s2 = inlined_call_operand.hbm [shape: f32[8,128,128], index: 2, kind: input, shape index: {}]   ;;  %s6602_s3 = inlined_call_operand.hbm [shape: f32[8,8,512], index: 3, kind: input, shape index: {}]   ;;  %s6603_s4 = inlined_call_operand.hbm [shape: f32[128,768], index: 4, kind: input, shape index: {}]   ;;  %s6604_s5 = inlined_call_operand.vmem [shape: f32[1,768], index: 5, kind: input, shape index: {}]   ;;  %s6605_s6 = inlined_call_operand.vmem [shape: f32[1,1,128], index: 6, kind: input, shape index: {}]   ;;  %s6606_s7 = inlined_call_operand.<no memory space> [shape: f32[1,1], index: 7, kind: input, shape index: {}]   ;;  %s6607_s8 = inlined_call_operand.hbm [shape: f32[128,512], index: 8, kind: input, shape index: {}]   ;;  %s6608_s9 = inlined_call_operand.hbm [shape: f32[8,8,128], index: 9, kind: output, shape index: {0}]   ;;  %s6609_s10 = inlined_call_operand.hbm [shape: f32[8,8,128], index: 10, kind: output, shape index: {1}]  }
   0x1   :  { %6624 = sst [smem:[#allocation26_spill]] %s6599_s0  ;;  %v16_v0 = vstv %s6606_s7 }
   0x2   :  { %6625 = sst [smem:[#allocation27_spill]] %s6600_s1  ;;  %17 = vst [vmem:[#allocation4] sm:$0x1] %v16_v0 }
   0x3   :  { %6626 = sst [smem:[#allocation28_spill]] %s6608_s9 }
   0x4   :  { %6627 = sst [smem:[#allocation29_spill]] %s6609_s10 }
   0x5   :  { %18 = vsyncpa [#allocation6], 0 }
   0x6   :  { %19 = vsyncpa [#allocation9], 0 }
   0x7   :  { %20 = vsyncpa [#allocation12], 0 }
   0x8   :  { %22 = vsyncpa [#allocation12 + $0x1], 0 }
   0x9   :  { %23 = vsyncpa [#allocation15], 0 }
   0xa   :  { %24 = vsyncpa [#allocation7], 0 }
   0xb   :  { %26 = vsyncpa [#allocation7 + $0x1], 0 }
   0xc   :  { %27 = vsyncpa [#allocation18], 0 }
   0xd   :  { %29 = vsyncpa [#allocation18 + $0x1], 0  ;;  %s5259_s15 = smov 0   ;;  %s5261_s16 = smov 0  }
   0xe   :  { %s5263_s17 = smov 0   ;;  %s5265_s18 = smov 0  }
   0xf   :  { %s5267_s19 = smov 0   ;;  %s5269_s7 = smov 0  }
  0x10 LB: > { %s5182_s20 = smov [#allocation8]   ;;  %s5290_s22 = sadd.s32 4294967295, %s5180_s7   ;;  %s5180_s7 = sphi %s5269_s7, %s35_s7   ;;  %s5176_s19 = sphi %s5267_s19, %s6665_s19   ;;  %s5172_s18 = sphi %s5265_s18, %s6664_s18   ;;  %s5168_s17 = sphi %s5263_s17, %s6663_s17   ;;  %s5164_s16 = sphi %s5261_s16, %s6662_s16   ;;  %s5160_s15 = sphi %s5259_s15, %s6661_s15  }
  0x11   : > { %s349_s21 = sshll.u32 %s5182_s20, 4  ;;  %p3909_p0 = scmp.ge.s32.totalorder %s5180_s7, 1  ;;  %s5295_s21 = int_to_ptr.vmem [resolvable:$true] %s349_s21 }
  0x12   : > { %p6614_p1 = scmp.eq.s32.totalorder %s5290_s22, 0  ;;  %p319_p2 = scmp.lt.s32.totalorder %s5180_s7, 9 }
  0x13   : > { %s5183_s24 = smov [#allocation13]   ;;  %s6630_s1 = sld [smem:[#allocation27_spill]] }
  0x14   : > { %p5297_p3 = pnand %p3909_p0, %p319_p2  ;;  %s379_s25 = sshll.u32 %s5183_s24, 4  ;;  %s5309_s25 = int_to_ptr.vmem [resolvable:$true] %s379_s25 }
  0x16   : > { %s6628_s23 = scalar_select %p5297_p3, 1, 0 }
  0x17   : > { %p4748_p4 = pneg %p5297_p3 }
  0x19   : > { %p5305_p5 = pnand %p4748_p4, %p6614_p1  ;;  %s4880_s29 = scalar_lea.hbm %s6630_s1, 16384 }
  0x1a   : > { %p4881_p6 = scmp.ne.s32.totalorder %s6630_s1, %s4880_s29  ;;  %p4887_p10 = scmp.lt.u32.totalorder %s4880_s29, %s6630_s1 }
  0x1b   : > { %p5319_p7 = pneg %p5305_p5 }
  0x1d   : > { %p4883_p8 = pnand %p5319_p7, %p4881_p6 }
  0x1f   : > { %p4884_p9 = pneg %p4883_p8 }
  0x21   : > { %p4889_p11 = pnand %p4887_p10, %p4884_p9 }
  0x23   : > { %4892 = shalt.err (!%p4889_p11)
}
  0x24   : > { %s4893_s20 = scalar_lea.vmem %s5295_s21, 16384  ;;  %p4901_p2 = scmp.lt.s32.totalorder %s5295_s21, %s5295_s21 }
  0x25   : > { %p4894_p12 = scmp.ne.s32.totalorder %s5295_s21, %s4893_s20  ;;  %p4902_p4 = scmp.lt.s32.totalorder %s4893_s20, %s4893_s20 }
  0x27   : > { %p4896_p13 = pnand %p4894_p12, %p5319_p7  ;;  %p4903_p6 = por %p4902_p4, %p4901_p2 }
  0x29   : > { %p4897_p0 = pneg %p4896_p13 }
  0x2b   : > { %p4904_p8 = pnand %p4903_p6, %p4897_p0 }
  0x2d   : > { %4907 = shalt.err (!%p4904_p8)
}
  0x2e   : > { %s6612_s24 = smov 128   ;;  %s6613_s27 = smov 8  }
  0x2f   : > { %4754 = dma.hbm_to_vmem [thread:$0]  (!%p5305_p5), %s6630_s1, 16384, %s5295_s21, [#allocation9], %s6612_s24, %s6612_s24, %s6613_s27  }
  0x30   : > { %s4908_s13 = scalar_lea.hbm %s6603_s4, 12288 }
  0x31   : > { %p4909_p9 = scmp.ne.s32.totalorder %s6603_s4, %s4908_s13  ;;  %p4915_p12 = scmp.lt.u32.totalorder %s4908_s13, %s6603_s4 }
  0x33   : > { %p4911_p10 = pnand %p4909_p9, %p5319_p7 }
  0x35   : > { %p4912_p11 = pneg %p4911_p10 }
  0x37   : > { %p4917_p13 = pnand %p4915_p12, %p4912_p11 }
  0x39   : > { %4920 = shalt.err (!%p4917_p13)
}
  0x3a   : > { %s4921_s21 = scalar_lea.vmem %s5309_s25, 12288  ;;  %p4929_p6 = scmp.lt.s32.totalorder %s5309_s25, %s5309_s25 }
  0x3b   : > { %p4922_p0 = scmp.ne.s32.totalorder %s5309_s25, %s4921_s21  ;;  %p4930_p8 = scmp.lt.s32.totalorder %s4921_s21, %s4921_s21 }
  0x3d   : > { %p4924_p2 = pnand %p4922_p0, %p5319_p7  ;;  %p4931_p9 = por %p4930_p8, %p4929_p6 }
  0x3f   : > { %p4925_p4 = pneg %p4924_p2 }
  0x41   : > { %p4932_p10 = pnand %p4931_p9, %p4925_p4 }
  0x43   : > { %4935 = shalt.err (!%p4932_p10)
}
  0x44   : > { %s5186_s28 = smov 768   ;;  %s5187_s9 = smov 48  }
  0x45   : > { %4760 = dma.hbm_to_vmem [thread:$0]  (!%p5305_p5), %s6603_s4, 12288, %s5309_s25, [#allocation12], %s5186_s28, %s5186_s28, %s5187_s9  }
  0x46   : > { %s5188_s30 = smov [#allocation5]   ;;  %s5189_s13 = smov [#allocation10]  }
  0x47   : > { %s335_s11 = sshll.u32 %s5188_s30, 4  ;;  %s366_s14 = sshll.u32 %s5189_s13, 4  ;;  %s336_s11 = int_to_ptr.vmem [resolvable:$true] %s335_s11  ;;  %s5366_s14 = int_to_ptr.vmem [resolvable:$true] %s366_s14 }
  0x48   : > { %s6632_s0 = sld [smem:[#allocation26_spill]] }
  0x4e   : > { %s4936_s24 = scalar_lea.hbm %s6632_s0, 256 }
  0x4f   : > { %p4937_p11 = scmp.ne.s32.totalorder %s6632_s0, %s4936_s24  ;;  %p4943_p0 = scmp.lt.u32.totalorder %s4936_s24, %s6632_s0 }
  0x51   : > { %p4939_p12 = pnand %p4937_p11, %p5319_p7 }
  0x53   : > { %p4940_p13 = pneg %p4939_p12 }
  0x55   : > { %p4945_p2 = pnand %p4943_p0, %p4940_p13 }
  0x57   : > { %4948 = shalt.err (!%p4945_p2)
}
  0x58   : > { %s4949_s28 = scalar_lea.vmem %s336_s11, 256  ;;  %p4957_p9 = scmp.lt.s32.totalorder %s336_s11, %s336_s11 }
  0x59   : > { %p4950_p4 = scmp.ne.s32.totalorder %s336_s11, %s4949_s28  ;;  %p4958_p10 = scmp.lt.s32.totalorder %s4949_s28, %s4949_s28 }
  0x5b   : > { %p4952_p6 = pnand %p4950_p4, %p5319_p7  ;;  %p4959_p1 = por %p4958_p10, %p4957_p9 }
  0x5d   : > { %p4953_p8 = pneg %p4952_p6 }
  0x5f   : > { %p4960_p3 = pnand %p4959_p1, %p4953_p8 }
  0x61   : > { %4963 = shalt.err (!%p4960_p3)
}
  0x62   : > { %4751 = dma.hbm_to_vmem [thread:$0]  (!%p5305_p5), %s6632_s0, 256, %s336_s11, [#allocation6]  }
  0x63   : > { %s4964_s29 = scalar_lea.hbm %s6601_s2, 16384 }
  0x64   : > { %p4965_p11 = scmp.ne.s32.totalorder %s6601_s2, %s4964_s29  ;;  %p4971_p1 = scmp.lt.u32.totalorder %s4964_s29, %s6601_s2 }
  0x66   : > { %p4967_p12 = pnand %p4965_p11, %p5319_p7 }
  0x68   : > { %p4968_p13 = pneg %p4967_p12 }
  0x6a   : > { %p4973_p3 = pnand %p4971_p1, %p4968_p13 }
  0x6c   : > { %4976 = shalt.err (!%p4973_p3)
}
  0x6d   : > { %s4977_s11 = scalar_lea.vmem %s5366_s14, 16384  ;;  %p4985_p6 = scmp.lt.s32.totalorder %s5366_s14, %s5366_s14 }
  0x6e   : > { %p4978_p0 = scmp.ne.s32.totalorder %s5366_s14, %s4977_s11  ;;  %p4986_p8 = scmp.lt.s32.totalorder %s4977_s11, %s4977_s11 }
  0x70   : > { %p4980_p2 = pnand %p4978_p0, %p5319_p7  ;;  %p4987_p9 = por %p4986_p8, %p4985_p6 }
  0x72   : > { %p4981_p4 = pneg %p4980_p2 }
  0x74   : > { %p4988_p10 = pnand %p4987_p9, %p4981_p4 }
  0x76   : > { %4991 = shalt.err (!%p4988_p10)
}
  0x77   : > { %s6633_s10 = smov 8   ;;  %s6634_s25 = smov 128  }
  0x78   : > { %4757 = dma.hbm_to_vmem [thread:$0]  (!%p5305_p5), %s6601_s2, 16384, %s5366_s14, [#allocation9], %s6634_s25, %s6634_s25, %s6633_s10  }
  0x79   : > { %s5190_s27 = smov [#allocation14]   ;;  %s4992_s30 = scalar_lea.hbm %s6607_s8, 8192 }
  0x7a   : > { %s401_s24 = sshll.u32 %s5190_s27, 4  ;;  %p4993_p11 = scmp.ne.s32.totalorder %s6607_s8, %s4992_s30  ;;  %s402_s24 = int_to_ptr.vmem [resolvable:$true] %s401_s24 }
  0x7b   : > { %p4999_p1 = scmp.lt.u32.totalorder %s4992_s30, %s6607_s8 }
  0x7c   : > { %p4995_p12 = pnand %p4993_p11, %p5319_p7 }
  0x7e   : > { %p4996_p13 = pneg %p4995_p12 }
  0x80   : > { %p5001_p3 = pnand %p4999_p1, %p4996_p13 }
  0x82   : > { %5004 = shalt.err (!%p5001_p3)
}
  0x83   : > { %s5005_s14 = scalar_lea.vmem %s402_s24, 8192  ;;  %p5013_p6 = scmp.lt.s32.totalorder %s402_s24, %s402_s24 }
  0x84   : > { %p5006_p0 = scmp.ne.s32.totalorder %s402_s24, %s5005_s14  ;;  %p5014_p8 = scmp.lt.s32.totalorder %s5005_s14, %s5005_s14 }
  0x86   : > { %p5008_p2 = pnand %p5006_p0, %p5319_p7  ;;  %p5015_p9 = por %p5014_p8, %p5013_p6 }
  0x88   : > { %p5009_p4 = pneg %p5008_p2 }
  0x8a   : > { %p5016_p10 = pnand %p5015_p9, %p5009_p4 }
  0x8c   : > { %5019 = shalt.err (!%p5016_p10)
}
  0x8d   : > { %s5191_s10 = smov 512   ;;  %s5192_s12 = smov 32  }
  0x8e   : > { %4763 = dma.hbm_to_vmem [thread:$0]  (!%p5305_p5), %s6607_s8, 8192, %s402_s24, [#allocation15], %s5191_s10, %s5191_s10, %s5192_s12  }
  0x8f   : > { %s3908_s1 = sadd.s32 4294967294, %s5180_s7   ;;  %s44_s27 = sadd.s32 1, %s5176_s19 }
  0x90   : > { %s134_s9 = sadd.s32 1, %s5168_s17  ;;  %p45_p7 = scmp.ge.s32.totalorder %s44_s27, 8 }
  0x91   : > { %p141_p11 = scmp.ne.s32.totalorder %s5168_s17, %s5164_s16  ;;  %p142_p12 = scmp.eq.s32.totalorder %s5180_s7, 0 }
  0x92   : > { %p147_p13 = scmp.ne.s32.totalorder %s5164_s16, %s5160_s15  ;;  %s6667_s27 = smov (%p45_p7, %s44_s27), 0 }
  0x93   : > { %p5440_p1 = por %p142_p12, %p141_p11  ;;  %p6636_p5 = scmp.eq.s32.totalorder %s5290_s22, 0 }
  0x94   : > { %s129_s29 = ssub.s32 %s5176_s19, %s6667_s27  ;;  %p278_p0 = scmp.eq.s32.totalorder %s5290_s22, 7 }
  0x95   : > { %p5446_p3 = por %p6636_p5, %p147_p13  ;;  %p132_p2 = scmp.eq.s32.totalorder %s129_s29, 0 }
  0x96   : > { %p284_p4 = scmp.eq.s32.totalorder %s3908_s1, 7  ;;  %p5453_p6 = por %p278_p0, %p141_p11 }
  0x97   : > { %p4780_p8 = scmp.lt.s32.totalorder %s5180_s7, 8  ;;  %s415_s21 = sand.u32 1, %s5180_s7  }
  0x98   : > { %s6638_s30 = scalar_select %p5453_p6, 1, 0 }
  0x99   : > { %s5459_s13 = scalar_select %p132_p2, %s5168_s17, %s134_s9  }
  0x9a   : > { %p5461_p9 = por %p284_p4, %p147_p13  ;;  %s417_s11 = sand.u32 1, %s5168_s17  }
  0x9b   : > { %s3916_s14 = sshll.u32 %s417_s11, 5  ;;  %s3941_s10 = sshll.u32 %s5176_s19, 9 }
  0x9c   : > { %s6639_s20 = scalar_select %p5461_p9, 1, 0 }
  0x9d   : > { %s5471_s28 = scalar_lea.hbm %s6602_s3, %s3941_s10  ;;  %s419_s1 = scalar_lea.vmem [#allocation11], %s3916_s14 }
  0x9e   : > { %s429_s9 = sshll.u32 %s419_s1, 4  ;;  %p5475_p10 = pnand %p4780_p8, %p5440_p1  ;;  %s5479_s9 = int_to_ptr.vmem [resolvable:$true] %s429_s9 }
  0x9f   : > { %s416_s11 = scalar_lea.sflag [#allocation12], %s415_s21  ;;  %s5020_s0 = scalar_lea.hbm %s5471_s28, 512 }
  0xa0   : > { %p5021_p7 = scmp.ne.s32.totalorder %s5471_s28, %s5020_s0  ;;  %p5022_p11 = pneg %p5475_p10 }
  0xa1   : > { %s5025_s26 = scalar_lea.hbm %s6602_s3, 4096  ;;  %p5026_p1 = scmp.lt.u32.totalorder %s5471_s28, %s6602_s3 }
  0xa2   : > { %p5023_p12 = pnand %p5022_p11, %p5021_p7  ;;  %p5027_p5 = scmp.lt.u32.totalorder %s5025_s26, %s5020_s0 }
  0xa3   : > { %p5029_p2 = scmp.lt.u32.totalorder %s5020_s0, %s5471_s28 }
  0xa4   : > { %p5024_p13 = pneg %p5023_p12  ;;  %p5028_p0 = por %p5027_p5, %p5026_p1 }
  0xa6   : > { %p5030_p4 = por %p5029_p2, %p5028_p0 }
  0xa8   : > { %p5031_p8 = pnand %p5030_p4, %p5024_p13 }
  0xaa   : > { %5034 = shalt.err (!%p5031_p8)
}
  0xab   : > { %s5035_s21 = scalar_lea.vmem %s5479_s9, 512  ;;  %s5193_s1 = smov [#allocation11]  }
  0xac   : > { %p5036_p7 = scmp.ne.s32.totalorder %s5479_s9, %s5035_s21  ;;  %s5040_s14 = sshll.u32 %s5193_s1, 4  ;;  %s5041_s14 = int_to_ptr.vmem [resolvable:$false] %s5040_s14 }
  0xad   : > { %s5042_s10 = scalar_lea.vmem %s5041_s14, 1024  ;;  %p5043_p6 = scmp.lt.s32.totalorder %s5479_s9, %s5041_s14 }
  0xae   : > { %p5038_p12 = pnand %p5036_p7, %p5022_p11  ;;  %p5044_p1 = scmp.lt.s32.totalorder %s5042_s10, %s5035_s21 }
  0xb0   : > { %p5039_p9 = pneg %p5038_p12  ;;  %p5045_p5 = por %p5044_p1, %p5043_p6 }
  0xb2   : > { %p5046_p0 = pnand %p5045_p5, %p5039_p9 }
  0xb4   : > { %5049 = shalt.err (!%p5046_p0)
}
  0xb5   : > { %4767 = dma.hbm_to_vmem [thread:$0]  (!%p5475_p10), %s5471_s28, 512, %s5479_s9, %s416_s11  }
  0xb6   : > { %p6641_p13 = scmp.ne.s32.totalorder %s6628_s23, 0 }
  0xb7   : > { %p6642_p11 = scmp.eq.s32.totalorder (!%p6641_p13), %s5290_s22, 0 }
  0xb8   : > { %438 = sbr.rel (%p6641_p13) target bundleno = 1837 (0x72d), region = 56 }
  0xbf   : > { %5131 = dma.done.wait (%p6642_p11), [#allocation6], 256   ;;  %p6643_p2 = pmov %p6642_p11 }
  0xc1   : > { %5133 = vsyncadd (%p6643_p2), [#allocation6], 4294967040  ;;  %p6644_p4 = pmov %p6643_p2 }
  0xc2   : > { %p6645_p6 = pmov %p6643_p2 }
  0xc3   : > { %5135 = dma.done.wait (%p6644_p4), [#allocation9], 32768  }
  0xc4   : > { %5137 = vsyncadd (%p6645_p6), [#allocation9], 4294934528  ;;  %s452_s0 = sand.u32 1, %s5290_s22   ;;  %s5518_s28 = sand.u32 1, %s5164_s16  }
  0xc5   : > { %s3923_s23 = sshll.u32 %s5518_s28, 5  ;;  %s453_s9 = scalar_lea.sflag [#allocation12], %s452_s0 }
  0xc6   : > { %s5521_s29 = scalar_lea.vmem [#allocation11], %s3923_s23 }
  0xc7   : > { %5139 = dma.done.wait (%p5446_p3), %s453_s9, 512  }
  0xc8   : > { %5141 = vsyncadd (%p5446_p3), %s453_s9, 4294966784  ;;  %p6646_p9 = pmov %p6643_p2 }
  0xc9   : > { %p6647_p10 = pmov %p6643_p2 }
  0xca   : > { %5143 = dma.done.wait (%p6646_p9), [#allocation12], 12288  }
  0xcb   : > { %5145 = vsyncadd (%p6647_p10), [#allocation12], 4294955008  ;;  %p6648_p8 = pmov %p6643_p2 }
  0xcc   : > { %p6649_p7 = pmov %p6643_p2 }
  0xcd   : > { %5147 = dma.done.wait (%p6648_p8), [#allocation15], 8192  }
  0xce   : > { %5149 = vsyncadd (%p6649_p7), [#allocation15], 4294959104  ;;  %s3926_s11 = sshll.u32 %s5518_s28, 3  ;;  %p3928_p3 = scmp.ne.s32.totalorder %s5172_s18, 0 }
  0xcf   : > { %s5536_s26 = scalar_lea.vmem [#allocation16], %s3926_s11  ;;  %s5538_s12 = scalar_lea.vmem [#allocation17], %s3926_s11  ;;  %v512_v1 = vld [vmem:[#allocation5] sm:$0xff] (!%p3928_p3)  ;;  %v514_v2 = vld [vmem:[#allocation5 + $0x8] sm:$0xff] (!%p3928_p3) }
  0xd0   : > { %511 = sbr.rel (%p3928_p3) target bundleno = 215 (0xd7), region = 84  ;;  %513 = vst [vmem:[#allocation2] sm:$0xff] (!%p3928_p3), %v512_v1  ;;  %515 = vst [vmem:[#allocation3] sm:$0xff] (!%p3928_p3), %v514_v2 }
  0xd7 PF: > { %v519_v3 = vld [vmem:[#allocation13 + $0x8] sm:$0xff]  ;;  %v525_v4 = vld [vmem:[#allocation13 + $0x38] sm:$0xff]  ;;  %v518_v5 = vld [vmem:[#allocation13] sm:$0xff]  ;;  %v5194_v10 = vmov 0.0   ;;  %v5195_v11 = vmov 0   ;;  %vm2008_vm0 = vcmask 130112  }
  0xd8   : > { %v4358_v6 = vpack.c.bf16 %v525_v4, %v519_v3  ;;  %v524_v7 = vld [vmem:[#allocation13 + $0x30] sm:$0xff]  ;;  %v531_v8 = vld [vmem:[#allocation13 + $0x68] sm:$0xff]  ;;  %v537_v9 = vld [vmem:[#allocation13 + $0x98] sm:$0xff]  ;;  %710 = vmatprep.mubr.f32.mxu0 %v5194_v10  ;;  %4851 = vset.pattern.permute.xlu1 %v5195_v11  ;;  %vm2015_vm1 = vcmask 195712   ;;  %vm2022_vm2 = vcmask 261312   ;;  %vm6619_vm3 = vcmask 326912  }
  0xd9   : > { %v4360_v12 = vpack.c.bf16 %v524_v7, %v518_v5  ;;  %v4362_v13 = vpack.c.bf16 %v537_v9, %v531_v8  ;;  %v530_v14 = vld [vmem:[#allocation13 + $0x60] sm:$0xff]  ;;  %v536_v15 = vld [vmem:[#allocation13 + $0x90] sm:$0xff]  ;;  %v543_v16 = vld [vmem:[#allocation13 + $0xc8] sm:$0xff]  ;;  %781 = vmatprep.mubr.f32.mxu1 %v5194_v10  ;;  %4852 = vset.pattern.permute.xlu0 %v5195_v11  ;;  %vm2036_vm4 = vcmask 392512   ;;  %vm2043_vm5 = vcmask 458112   ;;  %s6623_s23 = sshll.u32 %s5172_s18, 7 }
  0xda   : > { %4359 = vmatprep.subr.bf16.mxu0 %v4358_v6  ;;  %v549_v17 = vld [vmem:[#allocation13 + $0xf8] sm:$0xff]  ;;  %v4364_v18 = vpack.c.bf16 %v536_v15, %v530_v14  ;;  %v542_v20 = vld [vmem:[#allocation13 + $0xc0] sm:$0xff]  ;;  %v548_v21 = vld [vmem:[#allocation13 + $0xf0] sm:$0xff]  ;;  %vm2050_vm6 = vcmask 523712   ;;  %vm2057_vm7 = vcmask 589312   ;;  %vm2064_vm8 = vcmask 654912  }
  0xdb   : > { %4361 = vmatpush1.bf16.msra.mxu0 %v4360_v12  ;;  %v4366_v19 = vpack.c.bf16 %v549_v17, %v543_v16  ;;  %v555_v22 = vld [vmem:[#allocation13 + $0x128] sm:$0xff]  ;;  %v561_v23 = vld [vmem:[#allocation13 + $0x158] sm:$0xff]  ;;  %v4368_v24 = vpack.c.bf16 %v548_v21, %v542_v20  ;;  %v554_v26 = vld [vmem:[#allocation13 + $0x120] sm:$0xff]  ;;  %vm2071_vm9 = vcmask 720512   ;;  %vm2078_vm10 = vcmask 786112   ;;  %s6656_s22 = sld [smem:[#allocation29_spill]] }
  0xdc   : > { %4363 = vmatprep.subr.bf16.mxu0 %v4362_v13  ;;  %v4370_v25 = vpack.c.bf16 %v561_v23, %v555_v22  ;;  %v560_v27 = vld [vmem:[#allocation13 + $0x150] sm:$0xff]  ;;  %v567_v28 = vld [vmem:[#allocation13 + $0x188] sm:$0xff]  ;;  %v573_v29 = vld [vmem:[#allocation13 + $0x1b8] sm:$0xff]  ;;  %vm2085_vm11 = vcmask 851712   ;;  %vm2092_vm12 = vcmask 917312   ;;  %vm2099_vm13 = vcmask 982912  }
  0xdd   : > { %v4372_v30 = vpack.c.bf16 %v560_v27, %v554_v26  ;;  %v4374_v31 = vpack.c.bf16 %v573_v29, %v567_v28  ;;  %v566_v32 = vld [vmem:[#allocation13 + $0x180] sm:$0xff]  ;;  %v572_v33 = vld [vmem:[#allocation13 + $0x1b0] sm:$0xff]  ;;  %v579_v34 = vld [vmem:[#allocation13 + $0x1e8] sm:$0xff]  ;;  %vm2106_vm14 = vcmask 1048512   ;;  %vm6617_vm15 = vcmask 1041409   ;;  %s3736_s25 = sshll.u32 %s5538_s12, 4  ;;  %s3737_s25 = int_to_ptr.vmem [resolvable:$true] %s3736_s25 }
  0xde   : > { %v585_v35 = vld [vmem:[#allocation13 + $0x218] sm:$0xff]  ;;  %v4376_v36 = vpack.c.bf16 %v572_v33, %v566_v32  ;;  %v578_v38 = vld [vmem:[#allocation13 + $0x1e0] sm:$0xff]  ;;  %v584_v39 = vld [vmem:[#allocation13 + $0x210] sm:$0xff]  ;;  %s3708_s21 = scalar_lea.sflag [#allocation18], %s5518_s28  ;;  %s5050_s1 = scalar_lea.vmem %s3737_s25, 128 }
  0xdf   : > { %4365 = vmatpush1.bf16.msra.mxu0 %v4364_v18  ;;  %v4378_v37 = vpack.c.bf16 %v585_v35, %v579_v34  ;;  %v591_v40 = vld [vmem:[#allocation13 + $0x248] sm:$0xff]  ;;  %v597_v41 = vld [vmem:[#allocation13 + $0x278] sm:$0xff]  ;;  %v4380_v42 = vpack.c.bf16 %v584_v39, %v578_v38  ;;  %v590_v44 = vld [vmem:[#allocation13 + $0x240] sm:$0xff]  ;;  %p5051_p12 = scmp.ne.s32.totalorder %s3737_s25, %s5050_s1  ;;  %p6657_p1 = scmp.ne.s32.totalorder %s6638_s30, 0 }
  0xe0   : > { %4367 = vmatprep.subr.bf16.mxu0 %v4366_v19  ;;  %v4382_v43 = vpack.c.bf16 %v597_v41, %v591_v40  ;;  %v596_v45 = vld [vmem:[#allocation13 + $0x270] sm:$0xff]  ;;  %v3931_v46 = vld [vmem:[#allocation4] ss:$0 sm:$0xff]  ;;  %v609_v48 = vld [vmem:[#allocation13 + $0x2d8] sm:$0xff]  ;;  %v616_v40 = vlaneseq  ;;  %s5199_s14 = smov [#allocation17]  }
  0xe1   : > { %v603_v47 = vld [vmem:[#allocation13 + $0x2a8] sm:$0xff]  ;;  %1737 = vperm.xlu1 %4851, %v3931_v46   ;;  %v4384_v49 = vpack.c.bf16 %v596_v45, %v590_v44  ;;  %v602_v51 = vld [vmem:[#allocation13 + $0x2a0] sm:$0xff]  ;;  %v608_v52 = vld [vmem:[#allocation13 + $0x2d0] sm:$0xff]  ;;  %s6511_s24 = scalar_lea.hbm %s6656_s22, %s6623_s23  ;;  %p5052_p5 = pnand %p5051_p12, %p6657_p1 }
  0xe2   : > { %v4386_v50 = vpack.c.bf16 %v609_v48, %v603_v47  ;;  %v523_v53 = vld [vmem:[#allocation13 + $0x28] sm:$0xff]  ;;  %v529_v54 = vld [vmem:[#allocation13 + $0x58] sm:$0xff]  ;;  %v4388_v55 = vpack.c.bf16 %v608_v52, %v602_v51  ;;  %v522_v57 = vld [vmem:[#allocation13 + $0x20] sm:$0xff]  ;;  %v5545_v41 = vshrl.u32 %v616_v40, 7  ;;  %s5054_s10 = sshll.u32 %s5199_s14, 4  ;;  %s5055_s10 = int_to_ptr.vmem [resolvable:$false] %s5054_s10 }
  0xe3   : > { %4369 = vmatpush1.bf16.msra.mxu0 %v4368_v24  ;;  %v4422_v56 = vpack.c.bf16 %v529_v54, %v523_v53  ;;  %v528_v58 = vld [vmem:[#allocation13 + $0x50] sm:$0xff]  ;;  %v535_v59 = vld [vmem:[#allocation13 + $0x88] sm:$0xff]  ;;  %v541_v60 = vld [vmem:[#allocation13 + $0xb8] sm:$0xff]  ;;  %p5053_p0 = pneg %p5052_p5  ;;  %s5056_s0 = scalar_lea.vmem %s5055_s10, 256 }
  0xe4   : > { %4371 = vmatprep.subr.bf16.mxu0 %v4370_v25  ;;  %v516_v61 = vld [vmem:[#allocation2] sm:$0xff]  ;;  %v4424_v62 = vpack.c.bf16 %v528_v58, %v522_v57  ;;  %v4426_v63 = vpack.c.bf16 %v541_v60, %v535_v59  ;;  %v540_v1 = vld [vmem:[#allocation13 + $0xb0] sm:$0xff]  ;;  %v547_v2 = vld [vmem:[#allocation13 + $0xe8] sm:$0xff]  ;;  %v634_v44 = vsub.s32 4, %v5545_v41  ;;  %v5561_v53 = vsub.s32 0, %v5545_v41  ;;  %p5057_p13 = scmp.lt.s32.totalorder %s3737_s25, %s5055_s10  ;;  %p5058_p11 = scmp.lt.s32.totalorder %s5056_s0, %s5050_s1 }
  0xe5   : > { %v534_v0 = vld [vmem:[#allocation13 + $0x80] sm:$0xff]  ;;  %v553_v3 = vld [vmem:[#allocation13 + $0x118] sm:$0xff]  ;;  %v552_v7 = vld [vmem:[#allocation13 + $0x110] sm:$0xff] }
  0xe6   : > { %v4428_v4 = vpack.c.bf16 %v540_v1, %v534_v0  ;;  %v4430_v5 = vpack.c.bf16 %v553_v3, %v547_v2  ;;  %v546_v6 = vld [vmem:[#allocation13 + $0xe0] sm:$0xff]  ;;  %v559_v8 = vld [vmem:[#allocation13 + $0x148] sm:$0xff]  ;;  %v565_v9 = vld [vmem:[#allocation13 + $0x178] sm:$0xff]  ;;  %p5059_p2 = por %p5058_p11, %p5057_p13 }
  0xe7   : > { %4373 = vmatpush1.bf16.msra.mxu0 %v4372_v30  ;;  %v4432_v11 = vpack.c.bf16 %v552_v7, %v546_v6  ;;  %v4434_v12 = vpack.c.bf16 %v565_v9, %v559_v8  ;;  %v558_v13 = vld [vmem:[#allocation13 + $0x140] sm:$0xff]  ;;  %v564_v14 = vld [vmem:[#allocation13 + $0x170] sm:$0xff]  ;;  %v571_v15 = vld [vmem:[#allocation13 + $0x1a8] sm:$0xff] }
  0xe8   : > { %4375 = vmatprep.subr.bf16.mxu0 %v4374_v31  ;;  %v577_v16 = vld [vmem:[#allocation13 + $0x1d8] sm:$0xff]  ;;  %v4436_v17 = vpack.c.bf16 %v564_v14, %v558_v13  ;;  %v570_v19 = vld [vmem:[#allocation13 + $0x1a0] sm:$0xff]  ;;  %v576_v20 = vld [vmem:[#allocation13 + $0x1d0] sm:$0xff]  ;;  %p5060_p4 = pnand %p5059_p2, %p5053_p0 }
  0xe9   : > { %v4438_v18 = vpack.c.bf16 %v577_v16, %v571_v15  ;;  %v583_v21 = vld [vmem:[#allocation13 + $0x208] sm:$0xff]  ;;  %v589_v22 = vld [vmem:[#allocation13 + $0x238] sm:$0xff]  ;;  %v4440_v23 = vpack.c.bf16 %v576_v20, %v570_v19  ;;  %v582_v25 = vld [vmem:[#allocation13 + $0x200] sm:$0xff] }
  0xea   : > { %v4442_v24 = vpack.c.bf16 %v589_v22, %v583_v21  ;;  %v588_v26 = vld [vmem:[#allocation13 + $0x230] sm:$0xff]  ;;  %v595_v27 = vld [vmem:[#allocation13 + $0x268] sm:$0xff]  ;;  %v601_v28 = vld [vmem:[#allocation13 + $0x298] sm:$0xff] }
  0xeb   : > { %4377 = vmatpush1.bf16.msra.mxu0 %v4376_v36  ;;  %v4444_v29 = vpack.c.bf16 %v588_v26, %v582_v25  ;;  %v4446_v30 = vpack.c.bf16 %v601_v28, %v595_v27  ;;  %v594_v31 = vld [vmem:[#allocation13 + $0x260] sm:$0xff]  ;;  %v600_v32 = vld [vmem:[#allocation13 + $0x290] sm:$0xff]  ;;  %v607_v33 = vld [vmem:[#allocation13 + $0x2c8] sm:$0xff] }
  0xec   : > { %4379 = vmatprep.subr.bf16.mxu0 %v4378_v37  ;;  %v613_v34 = vld [vmem:[#allocation13 + $0x2f8] sm:$0xff]  ;;  %v4448_v35 = vpack.c.bf16 %v600_v32, %v594_v31  ;;  %v606_v37 = vld [vmem:[#allocation13 + $0x2c0] sm:$0xff]  ;;  %v612_v38 = vld [vmem:[#allocation13 + $0x2f0] sm:$0xff] }
  0xed   : > { %v4450_v36 = vpack.c.bf16 %v613_v34, %v607_v33  ;;  %v4452_v39 = vpack.c.bf16 %v612_v38, %v606_v37  ;;  %v614_v45 = vld [vmem:[%s6604_s5] sm:$0x3f]  ;;  %v870_v58 = vld [vmem:[#allocation10 + $0x28] sm:$0xff]  ;;  %v871_v21 = vld [vmem:[#allocation10 + $0x30] sm:$0xff] }
  0xee   : > { %v635_v47 = vrot.slane %v614_v45, %v634_v44  ;;  %v866_v59 = vld [vmem:[#allocation10 + $0x8] sm:$0xff]  ;;  %v5575_v0 = vld [vmem:[%s6605_s6] ss:$0 sm:$0xff]  ;;  %v877_v20 = vld [vmem:[#allocation10 + $0x60] sm:$0xff] }
  0xef   : > { %4381 = vmatpush1.bf16.msra.mxu0 %v4380_v42  ;;  %v5196_v42 = vmov 1966171168   ;;  %v868_v13 = vld [vmem:[#allocation10 + $0x18] sm:$0xff]  ;;  %v878_v28 = vld [vmem:[#allocation10 + $0x68] sm:$0xff]  ;;  %v879_v37 = vld [vmem:[#allocation10 + $0x70] sm:$0xff] }
  0xf0   : > { %4383 = vmatprep.subr.bf16.mxu0 %v4382_v43  ;;  %v996_v43 = vunpack.c.l.s4 %v5196_v42  ;;  %v874_v38 = vld [vmem:[#allocation10 + $0x48] sm:$0xff] }
  0xf2   : > { %v997_v46 = vunpack.c.0.s8 %v996_v43 }
  0xf3   : > { %4385 = vmatpush1.bf16.msra.mxu0 %v4384_v49 }
  0xf4   : > { %4387 = vmatprep.subr.bf16.mxu0 %v4386_v50  ;;  %v5552_v48 = vsub.s32 %v997_v46, %v5545_v41 }
  0xf7   : > { %4389 = vmatpush1.bf16.msra.mxu0 %v4388_v55  ;;  %v869_v55 = vld [vmem:[#allocation10 + $0x20] sm:$0xff] }
  0xf8   : > { %4423 = vmatprep.subr.bf16.mxu0 %v4422_v56  ;;  %v865_v56 = vld [vmem:[#allocation10] sm:$0xff] }
  0xfa   : > { %711 = vmatmul.mubr.f32.vlgmr.msra.gmra.mrb[0].mxu0 %v516_v61 }
  0xfb   : > { %4425 = vmatpush1.bf16.msra.mxu0 %v4424_v62  ;;  %852 = vmatprep.mubr.f32.mxu0 %v5194_v10  ;;  %v873_v62 = vld [vmem:[#allocation10 + $0x40] sm:$0xff] }
  0xfc   : > { %4427 = vmatprep.subr.bf16.mxu0 %v4426_v63  ;;  %v867_v63 = vld [vmem:[#allocation10 + $0x10] sm:$0xff] }
  0xff   : > { %4429 = vmatpush1.bf16.msra.mxu0 %v4428_v4 }
 0x100   : > { %4431 = vmatprep.subr.bf16.mxu0 %v4430_v5 }
 0x103   : > { %4433 = vmatpush1.bf16.msra.mxu0 %v4432_v11 }
 0x104   : > { %4435 = vmatprep.subr.bf16.mxu0 %v4434_v12  ;;  %v876_v12 = vld [vmem:[#allocation10 + $0x58] sm:$0xff] }
 0x107   : > { %4437 = vmatpush1.bf16.msra.mxu0 %v4436_v17 }
 0x108   : > { %4439 = vmatprep.subr.bf16.mxu0 %v4438_v18 }
 0x10b   : > { %4441 = vmatpush1.bf16.msra.mxu0 %v4440_v23 }
 0x10c   : > { %4443 = vmatprep.subr.bf16.mxu0 %v4442_v24 }
 0x10f   : > { %4445 = vmatpush1.bf16.msra.mxu0 %v4444_v29  ;;  %v872_v29 = vld [vmem:[#allocation10 + $0x38] sm:$0xff] }
 0x110   : > { %4447 = vmatprep.subr.bf16.mxu0 %v4446_v30 }
 0x113   : > { %4449 = vmatpush1.bf16.msra.mxu0 %v4448_v35 }
 0x114   : > { %4451 = vmatprep.subr.bf16.mxu0 %v4450_v36 }
 0x117   : > { %4453 = vmatpush1.bf16.msra.mxu0 %v4452_v39 }
 0x11a   : > { %853 = vmatmul.mubr.f32.vlgmr.msra.gmra.mrb[2].mxu0 %v516_v61 }
 0x1ed   : > { %v854_v49 = vpop.f32.mrb[2].mxu0 }
 0x1ee   : > { %v5554_v50 = vadd.f32 %v854_v49, %v635_v47  ;;  %v5556_v51 = vpop.f32.mrb[3].mxu0 }
 0x1f0   : > { %v1001_v52 = vrot.slane %v5554_v50, %v5552_v48 }
 0x1f2   : > { %v5564_v54 = vrot.slane %v1001_v52, %v5552_v48  ;;  %v1009_v30 = vcombine.high %v1001_v52, %v1001_v52  ;;  %v880_v52 = vld [vmem:[#allocation10 + $0x78] sm:$0xff] }
 0x1f4   : > { %v5568_v57 = vrot.slane %v5564_v54, %v5561_v53  ;;  %v5596_v39 = vrot.slane %v1009_v30, %v5552_v48  ;;  %v1039_v42 = vcombine.high %v5564_v54, %v5564_v54 }
 0x1f6   : > { %v1087_v60 = vadd.f32 %v5568_v57, %v869_v55  ;;  %v1083_v61 = vadd.f32 %v5568_v57, %v865_v56  ;;  %v1088_v3 = vadd.f32 %v5568_v57, %v870_v58  ;;  %v1084_v4 = vadd.f32 %v5568_v57, %v866_v59  ;;  %v875_v55 = vld [vmem:[#allocation10 + $0x50] sm:$0xff] }
 0x1f7   : > { %v1091_v5 = vadd.f32 %v5568_v57, %v873_v62  ;;  %v1085_v6 = vadd.f32 %v5568_v57, %v867_v63  ;;  %v1094_v15 = vadd.f32 %v5568_v57, %v876_v12  ;;  %v1086_v19 = vadd.f32 %v5568_v57, %v868_v13  ;;  %v882_v12 = vld [vmem:[#allocation10 + $0x88] sm:$0xff] }
 0x1f8   : > { %v1215_v1 = vmax.f32 %v1087_v60, 0.0  ;;  %v1211_v2 = vmax.f32 %v1083_v61, 0.0  ;;  %v1216_v9 = vmax.f32 %v1088_v3, 0.0  ;;  %v1212_v11 = vmax.f32 %v1084_v4, 0.0 }
 0x1f9   : > { %v1219_v14 = vmax.f32 %v1091_v5, 0.0  ;;  %v1213_v18 = vmax.f32 %v1085_v6, 0.0  ;;  %v1222_v22 = vmax.f32 %v1094_v15, 0.0  ;;  %v1095_v23 = vadd.f32 %v5568_v57, %v877_v20  ;;  %v883_v20 = vld [vmem:[#allocation10 + $0x90] sm:$0xff] }
 0x1fa   : > { %v1350_v7 = vmul.f32 %v5575_v0, %v1215_v1  ;;  %v1346_v8 = vmul.f32 %v5575_v0, %v1211_v2  ;;  %v1351_v16 = vmul.f32 %v5575_v0, %v1216_v9  ;;  %v1347_v17 = vmul.f32 %v5575_v0, %v1212_v11  ;;  %v881_v2 = vld [vmem:[#allocation10 + $0x80] sm:$0xff]  ;;  %v899_v11 = vld [vmem:[#allocation10 + $0x110] sm:$0xff] }
 0x1fb   : > { %v1354_v24 = vmul.f32 %v5575_v0, %v1219_v14  ;;  %v1348_v25 = vmul.f32 %v5575_v0, %v1213_v18  ;;  %v1214_v26 = vmax.f32 %v1086_v19, 0.0  ;;  %v1089_v27 = vadd.f32 %v5568_v57, %v871_v21  ;;  %v885_v19 = vld [vmem:[#allocation10 + $0xa0] sm:$0xff] }
 0x1fc   : > { %1482 = vadd.xlane.f32.xlu1 %v1350_v7  ;;  %1474 = vadd.xlane.f32.xlu0 %v1346_v8  ;;  %v1357_v31 = vmul.f32 %v5575_v0, %v1222_v22  ;;  %v1223_v32 = vmax.f32 %v1095_v23, 0.0  ;;  %v1096_v35 = vadd.f32 %v5568_v57, %v878_v28  ;;  %v1090_v36 = vadd.f32 %v5568_v57, %v872_v29  ;;  %v898_v28 = vld [vmem:[#allocation10 + $0x108] sm:$0xff] }
 0x1fd   : > { %v1349_v33 = vmul.f32 %v5575_v0, %v1214_v26  ;;  %v1217_v34 = vmax.f32 %v1089_v27, 0.0  ;;  %v1097_v43 = vadd.f32 %v5568_v57, %v879_v37  ;;  %v1092_v44 = vadd.f32 %v5568_v57, %v874_v38  ;;  %v930_v29 = vld [vmem:[#allocation10 + $0x208] sm:$0xff] }
 0x1fe   : > { %v1358_v45 = vmul.f32 %v5575_v0, %v1223_v32  ;;  %v1224_v47 = vmax.f32 %v1096_v35, 0.0  ;;  %v1218_v49 = vmax.f32 %v1090_v36, 0.0  ;;  %v994_v56 = vcombine.high %v5554_v50, %v5554_v50  ;;  %v897_v50 = vld [vmem:[#allocation10 + $0x100] sm:$0xff]  ;;  %v884_v36 = vld [vmem:[#allocation10 + $0x98] sm:$0xff]  ;;  %v886_v37 = vld [vmem:[#allocation10 + $0xa8] sm:$0xff] }
 0x1ff   : > { %v1352_v46 = vmul.f32 %v5575_v0, %v1217_v34  ;;  %v5608_v54 = vrot.slane %v5596_v39, %v5561_v53  ;;  %v5611_v58 = vrot.slane %v1039_v42, %v5561_v53  ;;  %v1225_v59 = vmax.f32 %v1097_v43, 0.0 }
 0x200   : > { %1484 = vadd.xlane.f32.xlu1 %v1351_v16  ;;  %1476 = vadd.xlane.f32.xlu0 %v1347_v17  ;;  %v1220_v60 = vmax.f32 %v1092_v44, 0.0  ;;  %v1359_v61 = vmul.f32 %v5575_v0, %v1224_v47  ;;  %v1353_v62 = vmul.f32 %v5575_v0, %v1218_v49  ;;  %v1098_v63 = vadd.f32 %v5568_v57, %v880_v52  ;;  %v900_v47 = vld [vmem:[#allocation10 + $0x118] sm:$0xff]  ;;  %v902_v49 = vld [vmem:[#allocation10 + $0x128] sm:$0xff] }
 0x201   : > { %v1093_v1 = vadd.f32 %v5568_v57, %v875_v55  ;;  %v5618_v3 = vrot.slane %v994_v56, %v5552_v48  ;;  %v1360_v4 = vmul.f32 %v5575_v0, %v1225_v59  ;;  %v1115_v5 = vadd.f32 %v5611_v58, %v897_v50 }
 0x202   : > { %v1355_v6 = vmul.f32 %v5575_v0, %v1220_v60  ;;  %v1226_v7 = vmax.f32 %v1098_v63, 0.0  ;;  %v1099_v9 = vadd.f32 %v5608_v54, %v881_v2  ;;  %v1117_v14 = vadd.f32 %v5611_v58, %v899_v11  ;;  %v929_v63 = vld [vmem:[#allocation10 + $0x200] sm:$0xff] }
 0x203   : > { %v1221_v8 = vmax.f32 %v1093_v1, 0.0  ;;  %v5626_v57 = vrot.slane %v5618_v3, %v5552_v48  ;;  %v1243_v13 = vmax.f32 %v1115_v5, 0.0  ;;  %v1100_v18 = vadd.f32 %v5608_v54, %v882_v12 }
 0x204   : > { %1490 = vadd.xlane.f32.xlu1 %v1354_v24  ;;  %1478 = vadd.xlane.f32.xlu0 %v1348_v25  ;;  %v1361_v15 = vmul.f32 %v5575_v0, %v1226_v7  ;;  %v1227_v17 = vmax.f32 %v1099_v9, 0.0  ;;  %v1103_v22 = vadd.f32 %v5608_v54, %v885_v19  ;;  %v1101_v23 = vadd.f32 %v5608_v54, %v883_v20  ;;  %v903_v7 = vld [vmem:[#allocation10 + $0x130] sm:$0xff] }
 0x205   : > { %v1356_v16 = vmul.f32 %v5575_v0, %v1221_v8  ;;  %v5634_v21 = vrot.slane %v5626_v57, %v5561_v53  ;;  %v1378_v24 = vmul.f32 %v5575_v0, %v1243_v13  ;;  %v1245_v26 = vmax.f32 %v1117_v14, 0.0  ;;  %v901_v8 = vld [vmem:[#allocation10 + $0x120] sm:$0xff] }
 0x206   : > { %v1362_v25 = vmul.f32 %v5575_v0, %v1227_v17  ;;  %v1228_v27 = vmax.f32 %v1100_v18, 0.0  ;;  %v1231_v30 = vmax.f32 %v1103_v22, 0.0  ;;  %v1229_v34 = vmax.f32 %v1101_v23, 0.0  ;;  %v931_v17 = vld [vmem:[#allocation10 + $0x210] sm:$0xff] }
 0x207   : > { %v1380_v32 = vmul.f32 %v5575_v0, %v1245_v26  ;;  %v1148_v35 = vadd.f32 %v5634_v21, %v930_v29  ;;  %v1118_v55 = vadd.f32 %v5611_v58, %v900_v47  ;;  %v1147_v50 = vadd.f32 %v5634_v21, %v929_v63  ;;  %v887_v26 = vld [vmem:[#allocation10 + $0xb0] sm:$0xff] }
 0x208   : > { %1496 = vadd.xlane.f32.xlu1 %v1357_v31  ;;  %1480 = vadd.xlane.f32.xlu0 %v1349_v33  ;;  %v1116_v31 = vadd.f32 %v5611_v58, %v898_v28  ;;  %v1363_v33 = vmul.f32 %v5575_v0, %v1228_v27  ;;  %v1366_v38 = vmul.f32 %v5575_v0, %v1231_v30 }
 0x209   : > { %v1364_v43 = vmul.f32 %v5575_v0, %v1229_v34  ;;  %v1276_v44 = vmax.f32 %v1148_v35, 0.0  ;;  %v1246_v5 = vmax.f32 %v1118_v55, 0.0  ;;  %v1121_v11 = vadd.f32 %v5611_v58, %v903_v7  ;;  %v888_v34 = vld [vmem:[#allocation10 + $0xb8] sm:$0xff] }
 0x20a   : > { %v1244_v42 = vmax.f32 %v1116_v31, 0.0  ;;  %v1275_v14 = vmax.f32 %v1147_v50, 0.0 }
 0x20b   : > { %v1411_v56 = vmul.f32 %v5575_v0, %v1276_v44  ;;  %v1381_v12 = vmul.f32 %v5575_v0, %v1246_v5  ;;  %v1249_v19 = vmax.f32 %v1121_v11, 0.0  ;;  %v905_v44 = vld [vmem:[#allocation10 + $0x140] sm:$0xff]  ;;  %v935_v5 = vld [vmem:[#allocation10 + $0x230] sm:$0xff] }
 0x20c   : > { %1498 = vadd.xlane.f32.xlu1 %v1358_v45  ;;  %1486 = vadd.xlane.f32.xlu0 %v1352_v46  ;;  %v1102_v45 = vadd.f32 %v5608_v54, %v884_v36  ;;  %v1104_v46 = vadd.f32 %v5608_v54, %v886_v37  ;;  %v1379_v52 = vmul.f32 %v5575_v0, %v1244_v42 }
 0x20d   : > { %v1410_v20 = vmul.f32 %v5575_v0, %v1275_v14  ;;  %v1384_v27 = vmul.f32 %v5575_v0, %v1249_v19  ;;  %v1106_v36 = vadd.f32 %v5608_v54, %v888_v34  ;;  %v1123_v47 = vadd.f32 %v5611_v58, %v905_v44  ;;  %v907_v14 = vld [vmem:[#allocation10 + $0x150] sm:$0xff] }
 0x20e   : > { %v1230_v59 = vmax.f32 %v1102_v45, 0.0  ;;  %v1232_v60 = vmax.f32 %v1104_v46, 0.0  ;;  %v904_v45 = vld [vmem:[#allocation10 + $0x138] sm:$0xff] }
 0x20f   : > { %v1234_v55 = vmax.f32 %v1106_v36, 0.0 }
 0x210   : > { %1500 = vadd.xlane.f32.xlu1 %v1359_v61  ;;  %1488 = vadd.xlane.f32.xlu0 %v1353_v62  ;;  %v1120_v61 = vadd.f32 %v5611_v58, %v902_v49  ;;  %v932_v62 = vld [vmem:[#allocation10 + $0x218] sm:$0xff]  ;;  %v1365_v2 = vmul.f32 %v5575_v0, %v1230_v59  ;;  %v891_v59 = vld [vmem:[#allocation10 + $0xd0] sm:$0xff] }
 0x211   : > { %v1150_v1 = vadd.f32 %v5634_v21, %v932_v62  ;;  %v1251_v62 = vmax.f32 %v1123_v47, 0.0  ;;  %v1369_v63 = vmul.f32 %v5575_v0, %v1234_v55  ;;  %v1109_v50 = vadd.f32 %v5608_v54, %v891_v59  ;;  %v909_v55 = vld [vmem:[#allocation10 + $0x160] sm:$0xff] }
 0x212   : > { %v1127_v59 = vadd.f32 %v5611_v58, %v909_v55 }
 0x213   : > { %v1278_v9 = vmax.f32 %v1150_v1, 0.0 }
 0x214   : > { %1502 = vadd.xlane.f32.xlu1 %v1360_v4  ;;  %1492 = vadd.xlane.f32.xlu0 %v1355_v6  ;;  %v1367_v4 = vmul.f32 %v5575_v0, %v1232_v60  ;;  %v1248_v6 = vmax.f32 %v1120_v61, 0.0  ;;  %v934_v60 = vld [vmem:[#allocation10 + $0x228] sm:$0xff] }
 0x215   : > { %v1413_v18 = vmul.f32 %v5575_v0, %v1278_v9  ;;  %v1237_v9 = vmax.f32 %v1109_v50, 0.0  ;;  %v939_v50 = vld [vmem:[#allocation10 + $0x250] sm:$0xff] }
 0x216   : > { %v1383_v13 = vmul.f32 %v5575_v0, %v1248_v6  ;;  %v1386_v6 = vmul.f32 %v5575_v0, %v1251_v62 }
 0x218   : > { %1504 = vadd.xlane.f32.xlu1 %v1361_v15  ;;  %1494 = vadd.xlane.f32.xlu0 %v1356_v16  ;;  %v1119_v15 = vadd.f32 %v5611_v58, %v901_v8  ;;  %v933_v16 = vld [vmem:[#allocation10 + $0x220] sm:$0xff] }
 0x219   : > { %v1151_v23 = vadd.f32 %v5634_v21, %v933_v16  ;;  %v1125_v16 = vadd.f32 %v5611_v58, %v907_v14 }
 0x21a   : > { %v1247_v22 = vmax.f32 %v1119_v15, 0.0 }
 0x21b   : > { %v1279_v30 = vmax.f32 %v1151_v23, 0.0  ;;  %v937_v23 = vld [vmem:[#allocation10 + $0x240] sm:$0xff] }
 0x21c   : > { %1538 = vadd.xlane.f32.xlu0 %v1378_v24  ;;  %1506 = vadd.xlane.f32.xlu1 %v1362_v25  ;;  %v1149_v24 = vadd.f32 %v5634_v21, %v931_v17  ;;  %v889_v25 = vld [vmem:[#allocation10 + $0xc0] sm:$0xff]  ;;  %v1382_v29 = vmul.f32 %v5575_v0, %v1247_v22  ;;  %v1372_v17 = vmul.f32 %v5575_v0, %v1237_v9  ;;  %v892_v22 = vld [vmem:[#allocation10 + $0xd8] sm:$0xff]  ;;  %v943_v9 = vld [vmem:[#allocation10 + $0x270] sm:$0xff] }
 0x21d   : > { %v1107_v28 = vadd.f32 %v5608_v54, %v889_v25  ;;  %v1414_v37 = vmul.f32 %v5575_v0, %v1279_v30  ;;  %v1110_v25 = vadd.f32 %v5608_v54, %v892_v22  ;;  %v893_v30 = vld [vmem:[#allocation10 + $0xe0] sm:$0xff] }
 0x21e   : > { %v1277_v31 = vmax.f32 %v1149_v24, 0.0  ;;  %v1111_v36 = vadd.f32 %v5608_v54, %v893_v30 }
 0x21f   : > { %v1235_v42 = vmax.f32 %v1107_v28, 0.0  ;;  %v1253_v28 = vmax.f32 %v1125_v16, 0.0  ;;  %v1161_v16 = vadd.f32 %v5634_v21, %v943_v9  ;;  %v913_v9 = vld [vmem:[#allocation10 + $0x180] sm:$0xff] }
 0x220   : > { %1542 = vadd.xlane.f32.xlu0 %v1380_v32  ;;  %1508 = vadd.xlane.f32.xlu1 %v1363_v33  ;;  %v1105_v32 = vadd.f32 %v5608_v54, %v887_v26  ;;  %v890_v33 = vld [vmem:[#allocation10 + $0xc8] sm:$0xff] }
 0x221   : > { %v1108_v35 = vadd.f32 %v5608_v54, %v890_v33  ;;  %v1370_v49 = vmul.f32 %v5575_v0, %v1235_v42  ;;  %v1238_v33 = vmax.f32 %v1110_v25, 0.0  ;;  %v1388_v34 = vmul.f32 %v5575_v0, %v1253_v28  ;;  %v938_v42 = vld [vmem:[#allocation10 + $0x248] sm:$0xff]  ;;  %v911_v28 = vld [vmem:[#allocation10 + $0x170] sm:$0xff] }
 0x223   : > { %v1236_v46 = vmax.f32 %v1108_v35, 0.0 }
 0x224   : > { %1514 = vadd.xlane.f32.xlu0 %v1366_v38  ;;  %1510 = vadd.xlane.f32.xlu1 %v1364_v43  ;;  %v1412_v38 = vmul.f32 %v5575_v0, %v1277_v31  ;;  %v1233_v43 = vmax.f32 %v1105_v32, 0.0  ;;  %v908_v31 = vld [vmem:[#allocation10 + $0x158] sm:$0xff] }
 0x225   : > { %v1371_v61 = vmul.f32 %v5575_v0, %v1236_v46  ;;  %v1239_v46 = vmax.f32 %v1111_v36, 0.0  ;;  %v915_v36 = vld [vmem:[#allocation10 + $0x190] sm:$0xff] }
 0x228   : > { %1540 = vadd.xlane.f32.xlu1 %v1379_v52  ;;  %1604 = vadd.xlane.f32.xlu0 %v1411_v56  ;;  %v1368_v52 = vmul.f32 %v5575_v0, %v1233_v43  ;;  %v1122_v56 = vadd.f32 %v5611_v58, %v904_v45  ;;  %v1373_v43 = vmul.f32 %v5575_v0, %v1238_v33 }
 0x22a   : > { %v1250_v1 = vmax.f32 %v1122_v56, 0.0 }
 0x22c   : > { %1512 = vadd.xlane.f32.xlu1 %v1365_v2  ;;  %1516 = vadd.xlane.f32.xlu0 %v1367_v4  ;;  %v1152_v2 = vadd.f32 %v5634_v21, %v934_v60  ;;  %v906_v4 = vld [vmem:[#allocation10 + $0x148] sm:$0xff]  ;;  %v1385_v8 = vmul.f32 %v5575_v0, %v1250_v1  ;;  %v1374_v60 = vmul.f32 %v5575_v0, %v1239_v46  ;;  %v896_v1 = vld [vmem:[#allocation10 + $0xf8] sm:$0xff] }
 0x22d   : > { %v1124_v7 = vadd.f32 %v5611_v58, %v906_v4  ;;  %v1114_v4 = vadd.f32 %v5608_v54, %v896_v1  ;;  %v942_v1 = vld [vmem:[#allocation10 + $0x268] sm:$0xff] }
 0x22e   : > { %v1280_v11 = vmax.f32 %v1152_v2, 0.0 }
 0x22f   : > { %v1252_v19 = vmax.f32 %v1124_v7, 0.0  ;;  %v1255_v7 = vmax.f32 %v1127_v59, 0.0  ;;  %v1242_v14 = vmax.f32 %v1114_v4, 0.0  ;;  %v1160_v4 = vadd.f32 %v5634_v21, %v942_v1 }
 0x230   : > { %1544 = vadd.xlane.f32.xlu1 %v1381_v12  ;;  %1548 = vadd.xlane.f32.xlu0 %v1383_v13  ;;  %v1153_v12 = vadd.f32 %v5634_v21, %v935_v5  ;;  %v936_v13 = vld [vmem:[#allocation10 + $0x238] sm:$0xff] }
 0x231   : > { %v1154_v15 = vadd.f32 %v5634_v21, %v936_v13  ;;  %v1387_v26 = vmul.f32 %v5575_v0, %v1252_v19  ;;  %v940_v19 = vld [vmem:[#allocation10 + $0x258] sm:$0xff]  ;;  %v1377_v22 = vmul.f32 %v5575_v0, %v1242_v14 }
 0x233   : > { %v1282_v24 = vmax.f32 %v1154_v15, 0.0  ;;  %v1390_v15 = vmul.f32 %v5575_v0, %v1255_v7 }
 0x234   : > { %1608 = vadd.xlane.f32.xlu0 %v1413_v18  ;;  %1602 = vadd.xlane.f32.xlu1 %v1410_v20  ;;  %v1415_v18 = vmul.f32 %v5575_v0, %v1280_v11  ;;  %v1281_v20 = vmax.f32 %v1153_v12, 0.0  ;;  %v910_v11 = vld [vmem:[#allocation10 + $0x168] sm:$0xff]  ;;  %v1041_v12 = vcombine.high %v5596_v39, %v5596_v39 }
 0x235   : > { %v1417_v32 = vmul.f32 %v5575_v0, %v1282_v24  ;;  %v1289_v24 = vmax.f32 %v1161_v16, 0.0  ;;  %v963_v16 = vld [vmem:[#allocation10 + $0x310] sm:$0xff] }
 0x238   : > { %1550 = vadd.xlane.f32.xlu0 %v1384_v27  ;;  %1546 = vadd.xlane.f32.xlu1 %v1382_v29  ;;  %v1416_v27 = vmul.f32 %v5575_v0, %v1281_v20  ;;  %v1155_v29 = vadd.f32 %v5634_v21, %v937_v23  ;;  %v5715_v20 = vrot.slane %v1041_v12, %v5561_v53 }
 0x23a   : > { %v1283_v35 = vmax.f32 %v1155_v29, 0.0  ;;  %v1010_v29 = vcombine.high %v5618_v3, %v5618_v3  ;;  %v1133_v3 = vadd.f32 %v5715_v20, %v915_v36 }
 0x23c   : > { %1610 = vadd.xlane.f32.xlu0 %v1414_v37  ;;  %1606 = vadd.xlane.f32.xlu1 %v1412_v38  ;;  %v1126_v37 = vadd.f32 %v5611_v58, %v908_v31  ;;  %v894_v38 = vld [vmem:[#allocation10 + $0xe8] sm:$0xff]  ;;  %v1418_v45 = vmul.f32 %v5575_v0, %v1283_v35  ;;  %v1129_v31 = vadd.f32 %v5611_v58, %v911_v28  ;;  %v1261_v59 = vmax.f32 %v1133_v3, 0.0 }
 0x23d   : > { %v1112_v44 = vadd.f32 %v5608_v54, %v894_v38  ;;  %v5728_v38 = vrot.slane %v1010_v29, %v5552_v48  ;;  %v5761_v28 = vand.u32 127, %v616_v40 }
 0x23e   : > { %v1254_v47 = vmax.f32 %v1126_v37, 0.0  ;;  %v941_v37 = vld [vmem:[#allocation10 + $0x260] sm:$0xff] }
 0x23f   : > { %v1240_v62 = vmax.f32 %v1112_v44, 0.0  ;;  %v1159_v46 = vadd.f32 %v5634_v21, %v941_v37  ;;  %v5738_v55 = vrot.slane %v5728_v38, %v5561_v53  ;;  %v2024_v37 = vadd.s32 4294967264, %v5761_v28 }
 0x240   : > { %1522 = vadd.xlane.f32.xlu0 %v1370_v49  ;;  %1518 = vadd.xlane.f32.xlu1 %v1368_v52  ;;  %v1156_v49 = vadd.f32 %v5634_v21, %v938_v42  ;;  %v895_v52 = vld [vmem:[#allocation10 + $0xf0] sm:$0xff] }
 0x241   : > { %v1113_v56 = vadd.f32 %v5608_v54, %v895_v52  ;;  %v1375_v5 = vmul.f32 %v5575_v0, %v1240_v62  ;;  %v1040_v52 = vcombine.high %v5626_v57, %v5626_v57 }
 0x243   : > { %v1241_v2 = vmax.f32 %v1113_v56, 0.0  ;;  %v5745_v57 = vrot.slane %v1040_v52, %v5561_v53  ;;  %v5776_v52 = vsub.s32 %v2024_v37, %v5545_v41 }
 0x244   : > { %1524 = vadd.xlane.f32.xlu0 %v1371_v61  ;;  %1520 = vadd.xlane.f32.xlu1 %v1369_v63  ;;  %v1389_v61 = vmul.f32 %v5575_v0, %v1254_v47  ;;  %v1284_v63 = vmax.f32 %v1156_v49, 0.0  ;;  %v916_v47 = vld [vmem:[#allocation10 + $0x198] sm:$0xff] }
 0x245   : > { %v1376_v13 = vmul.f32 %v5575_v0, %v1241_v2  ;;  %v912_v49 = vld [vmem:[#allocation10 + $0x178] sm:$0xff]  ;;  %v1134_v62 = vadd.f32 %v5715_v20, %v916_v47  ;;  %v1396_v2 = vmul.f32 %v5575_v0, %v1261_v59 }
 0x246   : > { %v920_v47 = vld [vmem:[#allocation10 + $0x1b8] sm:$0xff] }
 0x248   : > { %1554 = vadd.xlane.f32.xlu0 %v1386_v6  ;;  %1552 = vadd.xlane.f32.xlu1 %v1385_v8  ;;  %v1419_v6 = vmul.f32 %v5575_v0, %v1284_v63  ;;  %v1157_v8 = vadd.f32 %v5634_v21, %v939_v50  ;;  %v1130_v63 = vadd.f32 %v5611_v58, %v912_v49  ;;  %v945_v50 = vld [vmem:[#allocation10 + $0x280] sm:$0xff]  ;;  %v2003_v49 = vadd.s32 4294967288, %v5761_v28 }
 0x24a   : > { %v1285_v54 = vmax.f32 %v1157_v8, 0.0  ;;  %v1258_v7 = vmax.f32 %v1130_v63, 0.0  ;;  %v1163_v8 = vadd.f32 %v5738_v55, %v945_v50 }
 0x24c   : > { %1526 = vadd.xlane.f32.xlu0 %v1372_v17  ;;  %1612 = vadd.xlane.f32.xlu1 %v1415_v18  ;;  %v1128_v17 = vadd.f32 %v5611_v58, %v910_v11  ;;  %v944_v18 = vld [vmem:[#allocation10 + $0x278] sm:$0xff]  ;;  %v1420_v23 = vmul.f32 %v5575_v0, %v1285_v54  ;;  %v961_v11 = vld [vmem:[#allocation10 + $0x300] sm:$0xff]  ;;  %v1131_v58 = vadd.f32 %v5715_v20, %v913_v9  ;;  %v946_v54 = vld [vmem:[#allocation10 + $0x288] sm:$0xff] }
 0x24d   : > { %v1162_v39 = vadd.f32 %v5634_v21, %v944_v18  ;;  %v1179_v12 = vadd.f32 %v5745_v57, %v961_v11  ;;  %v1393_v14 = vmul.f32 %v5575_v0, %v1258_v7  ;;  %v1164_v18 = vadd.f32 %v5738_v55, %v946_v54  ;;  %v948_v54 = vld [vmem:[#allocation10 + $0x298] sm:$0xff] }
 0x24e   : > { %v1256_v25 = vmax.f32 %v1128_v17, 0.0  ;;  %v1259_v17 = vmax.f32 %v1131_v58, 0.0  ;;  %v2010_v7 = vadd.s32 4294967280, %v5761_v28  ;;  %v5795_v11 = vsub.s32 %v2003_v49, %v5545_v41 }
 0x250   : > { %1556 = vadd.xlane.f32.xlu0 %v1387_v26  ;;  %1614 = vadd.xlane.f32.xlu1 %v1416_v27  ;;  %v1158_v26 = vadd.f32 %v5634_v21, %v940_v19  ;;  %v914_v27 = vld [vmem:[#allocation10 + $0x188] sm:$0xff]  ;;  %v1391_v33 = vmul.f32 %v5575_v0, %v1256_v25  ;;  %v1291_v21 = vmax.f32 %v1163_v8, 0.0  ;;  %v919_v25 = vld [vmem:[#allocation10 + $0x1b0] sm:$0xff] }
 0x251   : > { %v1132_v30 = vadd.f32 %v5715_v20, %v914_v27  ;;  %v1292_v27 = vmax.f32 %v1164_v18, 0.0  ;;  %v950_v8 = vld [vmem:[#allocation10 + $0x2a8] sm:$0xff] }
 0x252   : > { %v1286_v35 = vmax.f32 %v1158_v26, 0.0  ;;  %v1394_v26 = vmul.f32 %v5575_v0, %v1259_v17 }
 0x253   : > { %v1260_v42 = vmax.f32 %v1132_v30, 0.0  ;;  %v1427_v36 = vmul.f32 %v5575_v0, %v1292_v27 }
 0x254   : > { %1616 = vadd.xlane.f32.xlu0 %v1417_v32  ;;  %1558 = vadd.xlane.f32.xlu1 %v1388_v34  ;;  %v1424_v32 = vmul.f32 %v5575_v0, %v1289_v24  ;;  %v1290_v34 = vmax.f32 %v1162_v39, 0.0  ;;  %v1421_v44 = vmul.f32 %v5575_v0, %v1286_v35  ;;  %v1307_v39 = vmax.f32 %v1179_v12, 0.0  ;;  %v917_v24 = vld [vmem:[#allocation10 + $0x1a0] sm:$0xff] }
 0x255   : > { %v1395_v56 = vmul.f32 %v5575_v0, %v1260_v42  ;;  %v949_v35 = vld [vmem:[#allocation10 + $0x2a0] sm:$0xff] }
 0x256   : > { %v1442_v29 = vmul.f32 %v5575_v0, %v1307_v39 }
 0x258   : > { %1528 = vadd.xlane.f32.xlu0 %v1373_v43  ;;  %1618 = vadd.xlane.f32.xlu1 %v1418_v45  ;;  %v1425_v43 = vmul.f32 %v5575_v0, %v1290_v34  ;;  %v1257_v45 = vmax.f32 %v1129_v31, 0.0  ;;  %v1135_v31 = vadd.f32 %v5715_v20, %v917_v24  ;;  %v5766_v34 = vpop.permute.xlu1 %1737  ;;  %v2017_v24 = vadd.s32 4294967272, %v5761_v28 }
 0x25a   : > { %v1263_v3 = vmax.f32 %v1135_v31, 0.0 }
 0x25c   : > { %1530 = vadd.xlane.f32.xlu0 %v1374_v60  ;;  %1560 = vadd.xlane.f32.xlu1 %v1389_v61  ;;  %v1392_v60 = vmul.f32 %v5575_v0, %v1257_v45  ;;  %v1287_v61 = vmax.f32 %v1159_v46, 0.0  ;;  %v962_v45 = vld [vmem:[#allocation10 + $0x308] sm:$0xff]  ;;  %v2031_v46 = vadd.s32 4294967256, %v5761_v28  ;;  %v1398_v63 = vmul.f32 %v5575_v0, %v1263_v3  ;;  %v964_v3 = vld [vmem:[#allocation10 + $0x318] sm:$0xff] }
 0x260   : > { %1532 = vadd.xlane.f32.xlu0 %v1375_v5  ;;  %1620 = vadd.xlane.f32.xlu1 %v1419_v6  ;;  %v1422_v5 = vmul.f32 %v5575_v0, %v1287_v61  ;;  %v1262_v6 = vmax.f32 %v1134_v62, 0.0  ;;  %v1180_v61 = vadd.f32 %v5745_v57, %v962_v45  ;;  %v918_v62 = vld [vmem:[#allocation10 + $0x1a8] sm:$0xff]  ;;  %v2080_v45 = vadd.s32 4294967200, %v5761_v28 }
 0x261   : > { %v1136_v58 = vadd.f32 %v5715_v20, %v918_v62 }
 0x263   : > { %v1264_v27 = vmax.f32 %v1136_v58, 0.0  ;;  %v5841_v58 = vsub.s32 %v2080_v45, %v5545_v41 }
 0x264   : > { %1534 = vadd.xlane.f32.xlu0 %v1376_v13  ;;  %1562 = vadd.xlane.f32.xlu1 %v1390_v15  ;;  %v1397_v13 = vmul.f32 %v5575_v0, %v1262_v6  ;;  %v1288_v15 = vmax.f32 %v1160_v4, 0.0  ;;  %v5786_v4 = vsub.s32 %v5761_v28, %v5545_v41  ;;  %v2052_v6 = vadd.s32 4294967232, %v5761_v28 }
 0x265   : > { %v1399_v49 = vmul.f32 %v5575_v0, %v1264_v27 }
 0x266   : > { %v1423_v19 = vmul.f32 %v5575_v0, %v1288_v15  ;;  %v1308_v15 = vmax.f32 %v1180_v61, 0.0  ;;  %v5804_v39 = vsub.s32 %v2052_v6, %v5545_v41 }
 0x268   : > { %1536 = vadd.xlane.f32.xlu0 %v1377_v22  ;;  %1622 = vadd.xlane.f32.xlu1 %v1420_v23  ;;  %v1426_v22 = vmul.f32 %v5575_v0, %v1291_v21  ;;  %v1181_v23 = vadd.f32 %v5745_v57, %v963_v16  ;;  %v2073_v21 = vadd.s32 4294967208, %v5761_v28 }
 0x26a   : > { %v1309_v30 = vmax.f32 %v1181_v23, 0.0  ;;  %v5807_v23 = vsub.s32 %v2010_v7, %v5545_v41 }
 0x26c   : > { %1630 = vadd.xlane.f32.xlu0 %v1424_v32  ;;  %1564 = vadd.xlane.f32.xlu1 %v1391_v33  ;;  %v1137_v32 = vadd.f32 %v5715_v20, %v919_v25  ;;  %v947_v33 = vld [vmem:[#allocation10 + $0x290] sm:$0xff]  ;;  %v1444_v42 = vmul.f32 %v5575_v0, %v1309_v30 }
 0x26d   : > { %v1165_v40 = vadd.f32 %v5738_v55, %v947_v33  ;;  %v5817_v33 = vsub.s32 %v2073_v21, %v5545_v41  ;;  %v2087_v21 = vadd.s32 4294967192, %v5761_v28 }
 0x270   : > { %1632 = vadd.xlane.f32.xlu0 %v1425_v43  ;;  %1624 = vadd.xlane.f32.xlu1 %v1421_v44  ;;  %v1265_v43 = vmax.f32 %v1137_v32, 0.0  ;;  %v1167_v44 = vadd.f32 %v5738_v55, %v949_v35  ;;  %v1443_v32 = vmul.f32 %v5575_v0, %v1308_v15 }
 0x272   : > { %v1400_v1 = vmul.f32 %v5575_v0, %v1265_v43  ;;  %v1295_v50 = vmax.f32 %v1167_v44, 0.0  ;;  %v921_v43 = vld [vmem:[#allocation10 + $0x1c0] sm:$0xff]  ;;  %v5824_v44 = vsub.s32 %v2017_v24, %v5545_v41 }
 0x274   : > { %1572 = vadd.xlane.f32.xlu0 %v1395_v56  ;;  %1566 = vadd.xlane.f32.xlu1 %v1392_v60  ;;  %v1293_v60 = vmax.f32 %v1165_v40, 0.0  ;;  %v1430_v17 = vmul.f32 %v5575_v0, %v1295_v50  ;;  %v1139_v50 = vadd.f32 %v5715_v20, %v921_v43 }
 0x276   : > { %v1267_v24 = vmax.f32 %v1139_v50, 0.0 }
 0x278   : > { %1574 = vadd.xlane.f32.xlu0 %v1396_v2  ;;  %1626 = vadd.xlane.f32.xlu1 %v1422_v5  ;;  %v1138_v2 = vadd.f32 %v5715_v20, %v920_v47  ;;  %v5789_v5 = vsub.s32 %v2031_v46, %v5545_v41  ;;  %v2038_v46 = vadd.s32 4294967248, %v5761_v28 }
 0x27a   : > { %v1266_v18 = vmax.f32 %v1138_v2, 0.0  ;;  %v966_v2 = vld [vmem:[#allocation10 + $0x328] sm:$0xff] }
 0x27c   : > { %1576 = vadd.xlane.f32.xlu0 %v1397_v13  ;;  %1568 = vadd.xlane.f32.xlu1 %v1393_v14  ;;  %v1428_v14 = vmul.f32 %v5575_v0, %v1293_v60  ;;  %v1401_v40 = vmul.f32 %v5575_v0, %v1266_v18 }
 0x280   : > { %1628 = vadd.xlane.f32.xlu1 %v1423_v19  ;;  %1634 = vadd.xlane.f32.xlu0 %v1426_v22  ;;  %v1168_v19 = vadd.f32 %v5738_v55, %v950_v8  ;;  %v965_v22 = vld [vmem:[#allocation10 + $0x320] sm:$0xff] }
 0x281   : > { %v1183_v35 = vadd.f32 %v5745_v57, %v965_v22 }
 0x284   : > { %1570 = vadd.xlane.f32.xlu1 %v1394_v26  ;;  %1666 = vadd.xlane.f32.xlu0 %v1442_v29  ;;  %v1166_v29 = vadd.f32 %v5738_v55, %v948_v54  ;;  %v1184_v54 = vadd.f32 %v5745_v57, %v966_v2  ;;  %v968_v2 = vld [vmem:[#allocation10 + $0x338] sm:$0xff] }
 0x286   : > { %v1312_v43 = vmax.f32 %v1184_v54, 0.0 }
 0x288   : > { %1636 = vadd.xlane.f32.xlu1 %v1427_v36  ;;  %1670 = vadd.xlane.f32.xlu0 %v1444_v42  ;;  %v1296_v42 = vmax.f32 %v1168_v19, 0.0 }
 0x289   : > { %v5778_v56 = vpop.xlane.xlu1 %1482  ;;  %v1475_v59 = vpop.xlane.xlu0 %1474 }
 0x28a   : > { %v1740_v9 = vadd.f32 %v5766_v34, %v1475_v59  ;;  %v1294_v59 = vmax.f32 %v1166_v29, 0.0  ;;  %v1744_v60 = vadd.f32 %v5766_v34, %v5778_v56  ;;  %v5844_v56 = vsub.s32 %v2038_v46, %v5545_v41 }
 0x28c   : > { %1578 = vadd.xlane.f32.xlu1 %v1398_v63  ;;  %1582 = vadd.xlane.f32.xlu0 %v1400_v1  ;;  %v2002_v25 = vrot.slane %v1740_v9, %v5786_v4  ;;  %v1311_v63 = vmax.f32 %v1183_v35, 0.0  ;;  %v1182_v1 = vadd.f32 %v5745_v57, %v964_v3  ;;  %v1431_v9 = vmul.f32 %v5575_v0, %v1296_v42 }
 0x28d   : > { %v1485_v12 = vpop.xlane.xlu1 %1484  ;;  %v1477_v13 = vpop.xlane.xlu0 %1476  ;;  %v2059_v3 = vadd.s32 4294967224, %v5761_v28 }
 0x28e   : > { %v1741_v16 = vadd.f32 %v5766_v34, %v1477_v13  ;;  %v1745_v6 = vadd.f32 %v5766_v34, %v1485_v12  ;;  %v2045_v13 = vadd.s32 4294967240, %v5761_v28  ;;  %v1429_v12 = vmul.f32 %v5575_v0, %v1294_v59 }
 0x28f   : > { %v1446_v19 = vmul.f32 %v5575_v0, %v1311_v63  ;;  %v1310_v22 = vmax.f32 %v1182_v1, 0.0  ;;  %v1402_v59 = vmul.f32 %v5575_v0, %v1267_v24  ;;  %v923_v24 = vld [vmem:[#allocation10 + $0x1d0] sm:$0xff] }
 0x290   : > { %v2007_v26 = vrot.slane %v1741_v16, %v5795_v11  ;;  %1638 = vadd.xlane.f32.xlu1 %v1428_v14  ;;  %1642 = vadd.xlane.f32.xlu0 %v1430_v17  ;;  %v951_v14 = vld [vmem:[#allocation10 + $0x2b0] sm:$0xff]  ;;  %v2028_v16 = vrot.slane %v1744_v60, %v5776_v52  ;;  %v5861_v35 = vsub.s32 %v2045_v13, %v5545_v41 }
 0x291   : > { %v5813_v30 = vpop.xlane.xlu1 %1490  ;;  %v1479_v31 = vpop.xlane.xlu0 %1478  ;;  %v1169_v29 = vadd.f32 %v5738_v55, %v951_v14  ;;  %v5885_v13 = vsub.s32 %v2059_v3, %v5545_v41  ;;  %v5890_v14 = vld [vmem:[%s6605_s6] ss:$0 sm:$0xff]  ;;  %v970_v3 = vld [vmem:[#allocation10 + $0x348] sm:$0xff] }
 0x292   : > { %v2009_v36 = vsel %vm2008_vm0, %v2007_v26, %v2002_v25  ;;  %v1742_v37 = vadd.f32 %v5766_v34, %v1479_v31  ;;  %v2035_v25 = vrot.slane %v1745_v6, %v5789_v5  ;;  %v967_v31 = vld [vmem:[#allocation10 + $0x330] sm:$0xff]  ;;  %v1748_v45 = vadd.f32 %v5766_v34, %v5813_v30  ;;  %v952_v6 = vld [vmem:[#allocation10 + $0x2b8] sm:$0xff] }
 0x293   : > { %v1185_v60 = vadd.f32 %v5745_v57, %v967_v31  ;;  %v1297_v1 = vmax.f32 %v1169_v29, 0.0 }
 0x294   : > { %v2014_v47 = vrot.slane %v1742_v37, %v5807_v23  ;;  %1668 = vadd.xlane.f32.xlu1 %v1443_v32  ;;  %1584 = vadd.xlane.f32.xlu0 %v1401_v40  ;;  %v922_v37 = vld [vmem:[#allocation10 + $0x1c8] sm:$0xff] }
 0x295   : > { %v5832_v61 = vpop.xlane.xlu1 %1496  ;;  %v1481_v62 = vpop.xlane.xlu0 %1480  ;;  %v1140_v50 = vadd.f32 %v5715_v20, %v922_v37 }
 0x296   : > { %v2016_v7 = vsel %vm2015_vm1, %v2014_v47, %v2009_v36  ;;  %v1743_v8 = vadd.f32 %v5766_v34, %v1481_v62  ;;  %v2094_v36 = vadd.s32 4294967184, %v5761_v28 }
 0x297   : > { %v1268_v29 = vmax.f32 %v1140_v50, 0.0 }
 0x298   : > { %v2021_v15 = vrot.slane %v1743_v8, %v5824_v44  ;;  %1580 = vadd.xlane.f32.xlu1 %v1399_v49  ;;  %1644 = vadd.xlane.f32.xlu0 %v1431_v9  ;;  %v1445_v49 = vmul.f32 %v5575_v0, %v1310_v22  ;;  %v5879_v30 = vsub.s32 %v2094_v36, %v5545_v41  ;;  %v2101_v8 = vadd.s32 4294967176, %v5761_v28  ;;  %v969_v22 = vld [vmem:[#allocation10 + $0x340] sm:$0xff] }
 0x299   : > { %v5852_v17 = vpop.xlane.xlu1 %1498  ;;  %v1487_v18 = vpop.xlane.xlu0 %1486  ;;  %v2066_v0 = vadd.s32 4294967216, %v5761_v28 }
 0x29a   : > { %v2023_v26 = vsel %vm2022_vm2, %v2021_v15, %v2016_v7  ;;  %v1746_v27 = vadd.f32 %v5766_v34, %v1487_v18  ;;  %v5876_v7 = vsub.s32 %v2087_v21, %v5545_v41  ;;  %v1447_v15 = vmul.f32 %v5890_v14, %v1312_v43 }
 0x29b   : > { %v2030_v32 = vsel %vm6619_vm3, %v2028_v16, %v2023_v26  ;;  %v1313_v16 = vmax.f32 %v1185_v60, 0.0  ;;  %v1186_v18 = vadd.f32 %v5745_v57, %v968_v2  ;;  %v5904_v36 = vsub.s32 %v2066_v0, %v5545_v41 }
 0x29c   : > { %v2037_v40 = vsel %vm2036_vm4, %v2035_v25, %v2030_v32  ;;  %v2042_v42 = vrot.slane %v1746_v27, %v5844_v56  ;;  %1640 = vadd.xlane.f32.xlu1 %v1429_v12  ;;  %1674 = vadd.xlane.f32.xlu0 %v1446_v19  ;;  %v2056_v12 = vrot.slane %v1748_v45, %v5804_v39 }
 0x29d   : > { %v1501_v46 = vpop.xlane.xlu1 %1500  ;;  %v1489_v47 = vpop.xlane.xlu0 %1488  ;;  %v1170_v19 = vadd.f32 %v5738_v55, %v952_v6  ;;  %v1432_v27 = vmul.f32 %v5890_v14, %v1297_v1  ;;  %v5901_v32 = vsub.s32 %v2101_v8, %v5545_v41  ;;  %v1751_v43 = vadd.f32 %v5766_v34, %v5832_v61 }
 0x29e   : > { %v2044_v62 = vsel %vm2043_vm5, %v2042_v42, %v2037_v40  ;;  %v1747_v63 = vadd.f32 %v5766_v34, %v1489_v47  ;;  %v1187_v40 = vadd.f32 %v5745_v57, %v969_v22  ;;  %v1141_v42 = vadd.f32 %v5715_v20, %v923_v24  ;;  %v971_v24 = vld [vmem:[#allocation10 + $0x350] sm:$0xff] }
 0x29f   : > { %v1298_v60 = vmax.f32 %v1170_v19, 0.0  ;;  %v1403_v2 = vmul.f32 %v5890_v14, %v1268_v29  ;;  %v1753_v6 = vadd.f32 %v5766_v34, %v1501_v46  ;;  %v1188_v61 = vadd.f32 %v5745_v57, %v970_v3  ;;  %v924_v29 = vld [vmem:[#allocation10 + $0x1d8] sm:$0xff] }
 0x2a0   : > { %v2049_v9 = vrot.slane %v1747_v63, %v5861_v35  ;;  %1672 = vadd.xlane.f32.xlu1 %v1445_v49  ;;  %1586 = vadd.xlane.f32.xlu0 %v1402_v59  ;;  %v1448_v49 = vmul.f32 %v5890_v14, %v1313_v16  ;;  %v1314_v59 = vmax.f32 %v1186_v18, 0.0  ;;  %v1752_v63 = vadd.f32 %v5766_v34, %v5852_v17 }
 0x2a1   : > { %v1503_v21 = vpop.xlane.xlu1 %1502  ;;  %v1493_v54 = vpop.xlane.xlu0 %1492  ;;  %v1315_v46 = vmax.f32 %v1187_v40, 0.0  ;;  %v1269_v16 = vmax.f32 %v1141_v42, 0.0  ;;  %v1433_v22 = vmul.f32 %v5890_v14, %v1298_v60 }
 0x2a2   : > { %v2051_v25 = vsel %vm2050_vm6, %v2049_v9, %v2044_v62  ;;  %v1749_v26 = vadd.f32 %v5766_v34, %v1493_v54  ;;  %v953_v62 = vld [vmem:[#allocation10 + $0x2c0] sm:$0xff]  ;;  %v1754_v8 = vadd.f32 %v5766_v34, %v1503_v21  ;;  %v2077_v9 = vrot.slane %v1751_v43, %v5817_v33 }
 0x2a3   : > { %v2058_v31 = vsel %vm2057_vm7, %v2056_v12, %v2051_v25  ;;  %v1171_v17 = vadd.f32 %v5738_v55, %v953_v62  ;;  %v2084_v18 = vrot.slane %v1752_v63, %v5841_v58  ;;  %v1449_v21 = vmul.f32 %v5890_v14, %v1314_v59  ;;  %v972_v63 = vld [vmem:[#allocation10 + $0x358] sm:$0xff] }
 0x2a4   : > { %v2063_v37 = vrot.slane %v1749_v26, %v5885_v13  ;;  %1676 = vadd.xlane.f32.xlu1 %v1447_v15  ;;  %1646 = vadd.xlane.f32.xlu0 %v1432_v27  ;;  %v2091_v25 = vrot.slane %v1753_v6, %v5876_v7  ;;  %v1316_v27 = vmax.f32 %v1188_v61, 0.0  ;;  %v1404_v60 = vmul.f32 %v5890_v14, %v1269_v16  ;;  %v928_v61 = vld [vmem:[#allocation10 + $0x1f8] sm:$0xff]  ;;  %v925_v16 = vld [vmem:[#allocation10 + $0x1e0] sm:$0xff] }
 0x2a5   : > { %v1505_v45 = vpop.xlane.xlu1 %1504  ;;  %v1495_v47 = vpop.xlane.xlu0 %1494  ;;  %v1299_v40 = vmax.f32 %v1171_v17, 0.0  ;;  %v1142_v62 = vadd.f32 %v5715_v20, %v924_v29  ;;  %v958_v29 = vld [vmem:[#allocation10 + $0x2e8] sm:$0xff] }
 0x2a6   : > { %v2065_v1 = vsel %vm2064_vm8, %v2063_v37, %v2058_v31  ;;  %v1750_v50 = vadd.f32 %v5766_v34, %v1495_v47  ;;  %v1755_v15 = vadd.f32 %v5766_v34, %v1505_v45  ;;  %v2098_v31 = vrot.slane %v1754_v8, %v5879_v30 }
 0x2a7   : > { %v1450_v47 = vmul.f32 %v5890_v14, %v1315_v46  ;;  %v1190_v46 = vadd.f32 %v5745_v57, %v972_v63 }
 0x2a8   : > { %v2070_v0 = vrot.slane %v1750_v50, %v5904_v36  ;;  %1678 = vadd.xlane.f32.xlu1 %v1448_v49  ;;  %1588 = vadd.xlane.f32.xlu0 %v1403_v2  ;;  %v2105_v42 = vrot.slane %v1755_v15, %v5901_v32  ;;  %v1189_v49 = vadd.f32 %v5745_v57, %v971_v24  ;;  %v954_v2 = vld [vmem:[#allocation10 + $0x2c8] sm:$0xff] }
 0x2a9   : > { %v1539_v12 = vpop.xlane.xlu0 %1538  ;;  %v1507_v54 = vpop.xlane.xlu1 %1506  ;;  %v1146_v24 = vadd.f32 %v5715_v20, %v928_v61 }
 0x2aa   : > { %v2072_v19 = vsel %vm2071_vm9, %v2070_v0, %v2065_v1  ;;  %v1756_v50 = vadd.f32 %v5766_v34, %v1507_v54  ;;  %v1317_v15 = vmax.f32 %v1189_v49, 0.0  ;;  %v1434_v54 = vmul.f32 %v5890_v14, %v1299_v40 }
 0x2ab   : > { %v2079_v26 = vsel %vm2078_vm10, %v2077_v9, %v2072_v19  ;;  %v1451_v9 = vmul.f32 %v5890_v14, %v1316_v27  ;;  %v1270_v19 = vmax.f32 %v1142_v62, 0.0  ;;  %v1143_v27 = vadd.f32 %v5715_v20, %v925_v16 }
 0x2ac   : > { %v2086_v37 = vsel %vm2085_vm11, %v2084_v18, %v2079_v26  ;;  %1680 = vadd.xlane.f32.xlu1 %v1449_v21  ;;  %1648 = vadd.xlane.f32.xlu0 %v1433_v22  ;;  %v1172_v21 = vadd.f32 %v5738_v55, %v954_v2  ;;  %v2111_v22 = vrot.slane %v1756_v50, %v5786_v4 }
 0x2ad   : > { %v2093_v3 = vsel %vm2092_vm12, %v2091_v25, %v2086_v37  ;;  %v1543_v43 = vpop.xlane.xlu0 %1542  ;;  %v1509_v45 = vpop.xlane.xlu1 %1508  ;;  %v1772_v25 = vadd.f32 %v5766_v34, %v1539_v12  ;;  %v1176_v62 = vadd.f32 %v5738_v55, %v958_v29 }
 0x2ae   : > { %v1757_v59 = vadd.f32 %v5766_v34, %v1509_v45  ;;  %v2100_v1 = vsel %vm2099_vm13, %v2098_v31, %v2093_v3  ;;  %v1774_v31 = vadd.f32 %v5766_v34, %v1543_v43  ;;  %v1452_v3 = vmul.f32 %v5890_v14, %v1317_v15 }
 0x2af   : > { %v5942_v6 = vsel %vm2106_vm14, %v2105_v42, %v2100_v1  ;;  %v1318_v45 = vmax.f32 %v1190_v46, 0.0  ;;  %v2190_v63 = vrot.slane %v1772_v25, %v5786_v4  ;;  %v1274_v1 = vmax.f32 %v1146_v24, 0.0 }
 0x2b0   : > { %1682 = vadd.xlane.f32.xlu1 %v1450_v47  ;;  %1590 = vadd.xlane.f32.xlu0 %v1404_v60  ;;  %v2115_v8 = vrot.slane %v1757_v59, %v5795_v11  ;;  %v955_v47 = vld [vmem:[#allocation10 + $0x2d0] sm:$0xff]  ;;  %v1405_v59 = vmul.f32 %v5890_v14, %v1270_v19  ;;  %v1300_v60 = vmax.f32 %v1172_v21, 0.0  ;;  %v2199_v2 = vrot.slane %v1774_v31, %v5807_v23 }
 0x2b1   : > { %v1515_v0 = vpop.xlane.xlu0 %1514  ;;  %v1511_v17 = vpop.xlane.xlu1 %1510  ;;  %v1173_v50 = vadd.f32 %v5738_v55, %v955_v47  ;;  %v1271_v15 = vmax.f32 %v1143_v27, 0.0  ;;  %v959_v19 = vld [vmem:[#allocation10 + $0x2f0] sm:$0xff]  ;;  %v1042_v21 = vcombine.high %v5728_v38, %v5728_v38  ;;  %v1304_v25 = vmax.f32 %v1176_v62, 0.0 }
 0x2b2   : > { %v1758_v18 = vadd.f32 %v5766_v34, %v1511_v17  ;;  %v2116_v37 = vsel %vm2008_vm0, %v2115_v8, %v2111_v22  ;;  %v1760_v61 = vadd.f32 %v5766_v34, %v1515_v0  ;;  %v926_v0 = vld [vmem:[#allocation10 + $0x1e8] sm:$0xff] }
 0x2b3   : > { %v5985_v62 = vrot.slane %v1042_v21, %v5561_v53 }
 0x2b4   : > { %v2120_v26 = vrot.slane %v1758_v18, %v5807_v23  ;;  %1684 = vadd.xlane.f32.xlu1 %v1451_v9  ;;  %1650 = vadd.xlane.f32.xlu0 %v1434_v54  ;;  %v1453_v9 = vmul.f32 %v5890_v14, %v1318_v45  ;;  %v1435_v54 = vmul.f32 %v5890_v14, %v1300_v60  ;;  %v956_v60 = vld [vmem:[#allocation10 + $0x2d8] sm:$0xff] }
 0x2b5   : > { %v1541_v40 = vpop.xlane.xlu1 %1540  ;;  %v1605_v42 = vpop.xlane.xlu0 %1604  ;;  %v2130_v27 = vrot.slane %v1760_v61, %v5776_v52 }
 0x2b6   : > { %v2121_v49 = vsel %vm2015_vm1, %v2120_v26, %v2116_v37  ;;  %v1773_v12 = vadd.f32 %v5766_v34, %v1541_v40  ;;  %v1301_v26 = vmax.f32 %v1173_v50, 0.0  ;;  %v1409_v37 = vmul.f32 %v5890_v14, %v1274_v1  ;;  %v927_v50 = vld [vmem:[#allocation10 + $0x1f0] sm:$0xff] }
 0x2b7   : > { %v1406_v40 = vmul.f32 %v5890_v14, %v1271_v15  ;;  %v1174_v15 = vadd.f32 %v5738_v55, %v956_v60 }
 0x2b8   : > { %v2194_v43 = vrot.slane %v1773_v12, %v5795_v11  ;;  %1686 = vadd.xlane.f32.xlu1 %v1452_v3  ;;  %1592 = vadd.xlane.f32.xlu0 %v1405_v59  ;;  %v1177_v3 = vadd.f32 %v5738_v55, %v959_v19  ;;  %v1144_v12 = vadd.f32 %v5715_v20, %v926_v0  ;;  %v975_v59 = vld [vmem:[#allocation10 + $0x370] sm:$0xff] }
 0x2b9   : > { %v1513_v8 = vpop.xlane.xlu1 %1512  ;;  %v1517_v17 = vpop.xlane.xlu0 %1516  ;;  %v1145_v19 = vadd.f32 %v5715_v20, %v927_v50 }
 0x2ba   : > { %v2195_v46 = vsel %vm2008_vm0, %v2194_v43, %v2190_v63  ;;  %v1759_v16 = vadd.f32 %v5766_v34, %v1513_v8  ;;  %v1761_v18 = vadd.f32 %v5766_v34, %v1517_v17  ;;  %v1805_v43 = vadd.f32 %v5766_v34, %v1605_v42 }
 0x2bb   : > { %v2200_v22 = vsel %vm2015_vm1, %v2199_v2, %v2195_v46  ;;  %v1439_v8 = vmul.f32 %v5890_v14, %v1304_v25  ;;  %v1305_v17 = vmax.f32 %v1177_v3, 0.0  ;;  %v977_v46 = vld [vmem:[#allocation10 + $0x380] sm:$0xff]  ;;  %v976_v3 = vld [vmem:[#allocation10 + $0x378] sm:$0xff] }
 0x2bc   : > { %v2125_v24 = vrot.slane %v1759_v16, %v5824_v44  ;;  %1688 = vadd.xlane.f32.xlu1 %v1453_v9  ;;  %1652 = vadd.xlane.f32.xlu0 %v1435_v54  ;;  %v2135_v45 = vrot.slane %v1761_v18, %v5789_v5  ;;  %v1193_v9 = vadd.f32 %v5745_v57, %v975_v59  ;;  %v1272_v54 = vmax.f32 %v1144_v12, 0.0  ;;  %v957_v25 = vld [vmem:[#allocation10 + $0x2e0] sm:$0xff] }
 0x2bd   : > { %v1545_v29 = vpop.xlane.xlu1 %1544  ;;  %v1549_v31 = vpop.xlane.xlu0 %1548  ;;  %v1436_v18 = vmul.f32 %v5890_v14, %v1301_v26  ;;  %v2352_v21 = vrot.slane %v1805_v43, %v5795_v11  ;;  %v1302_v26 = vmax.f32 %v1174_v15, 0.0  ;;  %v1175_v12 = vadd.f32 %v5738_v55, %v957_v25 }
 0x2be   : > { %v2126_v38 = vsel %vm2022_vm2, %v2125_v24, %v2121_v49  ;;  %v1775_v47 = vadd.f32 %v5766_v34, %v1545_v29  ;;  %v1195_v24 = vadd.f32 %v5985_v62, %v977_v46 }
 0x2bf   : > { %v2131_v63 = vsel %vm6619_vm3, %v2130_v27, %v2126_v38  ;;  %v1777_v27 = vadd.f32 %v5766_v34, %v1549_v31  ;;  %v1273_v31 = vmax.f32 %v1145_v19, 0.0 }
 0x2c0   : > { %v5990_v1 = vsel %vm2036_vm4, %v2135_v45, %v2131_v63  ;;  %v2204_v49 = vrot.slane %v1775_v47, %v5824_v44  ;;  %1600 = vadd.xlane.f32.xlu1 %v1409_v37  ;;  %1594 = vadd.xlane.f32.xlu0 %v1406_v40  ;;  %v1440_v37 = vmul.f32 %v5890_v14, %v1305_v17  ;;  %v1321_v40 = vmax.f32 %v1193_v9, 0.0  ;;  %v973_v9 = vld [vmem:[#allocation10 + $0x360] sm:$0xff] }
 0x2c1   : > { %v1609_v2 = vpop.xlane.xlu0 %1608  ;;  %v1603_v61 = vpop.xlane.xlu1 %1602  ;;  %v1407_v47 = vmul.f32 %v5890_v14, %v1272_v54  ;;  %v1323_v60 = vmax.f32 %v1195_v24, 0.0  ;;  %v1194_v63 = vadd.f32 %v5745_v57, %v976_v3  ;;  %v2214_v43 = vrot.slane %v1777_v27, %v5789_v5  ;;  %v988_v54 = vld [vmem:[#allocation10 + $0x3d8] sm:$0xff] }
 0x2c2   : > { %v2205_v42 = vsel %vm2022_vm2, %v2204_v49, %v2200_v22  ;;  %v1804_v16 = vadd.f32 %v5766_v34, %v1603_v61  ;;  %v1807_v49 = vadd.f32 %v5766_v34, %v1609_v2  ;;  %v1437_v17 = vmul.f32 %v5890_v14, %v1302_v26 }
 0x2c3   : > { %v1191_v24 = vadd.f32 %v5745_v57, %v973_v9  ;;  %v992_v9 = vld [vmem:[#allocation10 + $0x3f8] sm:$0xff] }
 0x2c4   : > { %v2348_v0 = vrot.slane %v1804_v16, %v5786_v4  ;;  %1660 = vadd.xlane.f32.xlu1 %v1439_v8  ;;  %1654 = vadd.xlane.f32.xlu0 %v1436_v18  ;;  %v1456_v8 = vmul.f32 %v5890_v14, %v1321_v40  ;;  %v2362_v25 = vrot.slane %v1807_v49, %v5824_v44  ;;  %v960_v49 = vld [vmem:[#allocation10 + $0x2f8] sm:$0xff] }
 0x2c5   : > { %v1551_v29 = vpop.xlane.xlu0 %1550  ;;  %v1547_v22 = vpop.xlane.xlu1 %1546 }
 0x2c6   : > { %v2353_v20 = vsel %vm2008_vm0, %v2352_v21, %v2348_v0  ;;  %v1778_v38 = vadd.f32 %v5766_v34, %v1551_v29  ;;  %v1776_v45 = vadd.f32 %v5766_v34, %v1547_v22  ;;  %v1303_v21 = vmax.f32 %v1175_v12, 0.0 }
 0x2c7   : > { %v1408_v29 = vmul.f32 %v5890_v14, %v1273_v31  ;;  %v1322_v22 = vmax.f32 %v1194_v63, 0.0  ;;  %v1319_v63 = vmax.f32 %v1191_v24, 0.0 }
 0x2c8   : > { %v2209_v59 = vrot.slane %v1776_v45, %v5776_v52  ;;  %1662 = vadd.xlane.f32.xlu1 %v1440_v37  ;;  %1596 = vadd.xlane.f32.xlu0 %v1407_v47  ;;  %v2219_v15 = vrot.slane %v1778_v38, %v5844_v56  ;;  %v1206_v37 = vadd.f32 %v5985_v62, %v988_v54  ;;  %v974_v45 = vld [vmem:[#allocation10 + $0x368] sm:$0xff]  ;;  %v989_v47 = vld [vmem:[#allocation10 + $0x3e0] sm:$0xff] }
 0x2c9   : > { %v1611_v50 = vpop.xlane.xlu0 %1610  ;;  %v1607_v61 = vpop.xlane.xlu1 %1606  ;;  %v1458_v38 = vmul.f32 %v5890_v14, %v1323_v60  ;;  %v1438_v31 = vmul.f32 %v5890_v14, %v1303_v21  ;;  %v1192_v60 = vadd.f32 %v5745_v57, %v974_v45  ;;  %v1178_v54 = vadd.f32 %v5738_v55, %v960_v49 }
 0x2ca   : > { %v2210_v46 = vsel %vm6619_vm3, %v2209_v59, %v2205_v42  ;;  %v1808_v16 = vadd.f32 %v5766_v34, %v1611_v50  ;;  %v1806_v18 = vadd.f32 %v5766_v34, %v1607_v61  ;;  %v1454_v57 = vmul.f32 %v5890_v14, %v1319_v63 }
 0x2cb   : > { %v2215_v19 = vsel %vm2036_vm4, %v2214_v43, %v2210_v46 }
 0x2cc   : > { %v2357_v2 = vrot.slane %v1806_v18, %v5807_v23  ;;  %1694 = vadd.xlane.f32.xlu1 %v1456_v8  ;;  %1656 = vadd.xlane.f32.xlu0 %v1437_v17  ;;  %v6023_v0 = vsel %vm2043_vm5, %v2219_v15, %v2215_v19  ;;  %v2367_v40 = vrot.slane %v1808_v16, %v5776_v52  ;;  %v1334_v8 = vmax.f32 %v1206_v37, 0.0 }
 0x2cd   : > { %v1523_v42 = vpop.xlane.xlu0 %1522  ;;  %v1519_v27 = vpop.xlane.xlu1 %1518  ;;  %v1207_v17 = vadd.f32 %v5985_v62, %v989_v47  ;;  %v1457_v18 = vmul.f32 %v5890_v14, %v1322_v22 }
 0x2ce   : > { %v2358_v26 = vsel %vm2015_vm1, %v2357_v2, %v2353_v20  ;;  %v1762_v3 = vadd.f32 %v5766_v34, %v1519_v27  ;;  %v1764_v20 = vadd.f32 %v5766_v34, %v1523_v42  ;;  %v1210_v2 = vadd.f32 %v5985_v62, %v992_v9 }
 0x2cf   : > { %v2363_v12 = vsel %vm2022_vm2, %v2362_v25, %v2358_v26  ;;  %v1469_v25 = vmul.f32 %v5890_v14, %v1334_v8  ;;  %v1320_v42 = vmax.f32 %v1192_v60, 0.0  ;;  %v1335_v27 = vmax.f32 %v1207_v17, 0.0  ;;  %v979_v60 = vld [vmem:[#allocation10 + $0x390] sm:$0xff] }
 0x2d0   : > { %v2140_v59 = vrot.slane %v1762_v3, %v5844_v56  ;;  %1598 = vadd.xlane.f32.xlu0 %v1408_v29  ;;  %1698 = vadd.xlane.f32.xlu1 %v1458_v38  ;;  %v2368_v43 = vsel %vm6619_vm3, %v2367_v40, %v2363_v12  ;;  %v2150_v21 = vrot.slane %v1764_v20, %v5804_v39  ;;  %v978_v40 = vld [vmem:[#allocation10 + $0x388] sm:$0xff]  ;;  %v1338_v63 = vmax.f32 %v1210_v2, 0.0 }
 0x2d1   : > { %v1525_v50 = vpop.xlane.xlu0 %1524  ;;  %v1521_v61 = vpop.xlane.xlu1 %1520  ;;  %v1196_v49 = vadd.f32 %v5985_v62, %v978_v40  ;;  %v1470_v8 = vmul.f32 %v5890_v14, %v1335_v27 }
 0x2d2   : > { %v2141_v15 = vsel %vm2043_vm5, %v2140_v59, %v5990_v1  ;;  %v1765_v46 = vadd.f32 %v5766_v34, %v1525_v50  ;;  %v1763_v16 = vadd.f32 %v5766_v34, %v1521_v61  ;;  %v1455_v59 = vmul.f32 %v5890_v14, %v1320_v42 }
 0x2d4   : > { %v2145_v19 = vrot.slane %v1763_v16, %v5861_v35  ;;  %1658 = vadd.xlane.f32.xlu0 %v1438_v31  ;;  %1696 = vadd.xlane.f32.xlu1 %v1457_v18  ;;  %v2155_v29 = vrot.slane %v1765_v46, %v5885_v13  ;;  %v1306_v31 = vmax.f32 %v1178_v54, 0.0  ;;  %v1324_v54 = vmax.f32 %v1196_v49, 0.0 }
 0x2d5   : > { %v1555_v24 = vpop.xlane.xlu0 %1554  ;;  %v1553_v1 = vpop.xlane.xlu1 %1552 }
 0x2d6   : > { %v2146_v55 = vsel %vm2050_vm6, %v2145_v19, %v2141_v15  ;;  %v1780_v22 = vadd.f32 %v5766_v34, %v1555_v24  ;;  %v1779_v37 = vadd.f32 %v5766_v34, %v1553_v1  ;;  %v1441_v18 = vmul.f32 %v5890_v14, %v1306_v31  ;;  %v980_v1 = vld [vmem:[#allocation10 + $0x398] sm:$0xff] }
 0x2d7   : > { %v2151_v26 = vsel %vm2057_vm7, %v2150_v21, %v2146_v55  ;;  %v1197_v19 = vadd.f32 %v5985_v62, %v979_v60  ;;  %v982_v60 = vld [vmem:[#allocation10 + $0x3a8] sm:$0xff] }
 0x2d8   : > { %v2229_v3 = vrot.slane %v1780_v22, %v5804_v39  ;;  %v2224_v38 = vrot.slane %v1779_v37, %v5861_v35  ;;  %1690 = vadd.xlane.f32.xlu0 %v1454_v57  ;;  %1720 = vadd.xlane.f32.xlu1 %v1469_v25  ;;  %v2156_v45 = vsel %vm2064_vm8, %v2155_v29, %v2151_v26 }
 0x2d9   : > { %v1527_v47 = vpop.xlane.xlu0 %1526  ;;  %v1613_v12 = vpop.xlane.xlu1 %1612  ;;  %v1325_v55 = vmax.f32 %v1197_v19, 0.0  ;;  %v1198_v22 = vadd.f32 %v5985_v62, %v980_v1  ;;  %v1459_v26 = vmul.f32 %v5890_v14, %v1324_v54 }
 0x2da   : > { %v2225_v20 = vsel %vm2050_vm6, %v2224_v38, %v6023_v0  ;;  %v1766_v50 = vadd.f32 %v5766_v34, %v1527_v47  ;;  %v1809_v61 = vadd.f32 %v5766_v34, %v1613_v12  ;;  %v1473_v0 = vmul.f32 %v5890_v14, %v1338_v63 }
 0x2db   : > { %v2230_v17 = vsel %vm2057_vm7, %v2229_v3, %v2225_v20  ;;  %v981_v3 = vld [vmem:[#allocation10 + $0x3a0] sm:$0xff]  ;;  %v1460_v31 = vmul.f32 %v5890_v14, %v1325_v55  ;;  %v1326_v63 = vmax.f32 %v1198_v22, 0.0 }
 0x2dc   : > { %v2160_v9 = vrot.slane %v1766_v50, %v5904_v36  ;;  %v2372_v15 = vrot.slane %v1809_v61, %v5789_v5  ;;  %1692 = vadd.xlane.f32.xlu0 %v1455_v59  ;;  %1722 = vadd.xlane.f32.xlu1 %v1470_v8  ;;  %v1199_v49 = vadd.f32 %v5985_v62, %v981_v3 }
 0x2dd   : > { %v1557_v46 = vpop.xlane.xlu0 %1556  ;;  %v1615_v16 = vpop.xlane.xlu1 %1614 }
 0x2de   : > { %v2161_v57 = vsel %vm2071_vm9, %v2160_v9, %v2156_v45  ;;  %v2373_v2 = vsel %vm2036_vm4, %v2372_v15, %v2368_v43  ;;  %v1781_v21 = vadd.f32 %v5766_v34, %v1557_v46  ;;  %v1810_v24 = vadd.f32 %v5766_v34, %v1615_v16 }
 0x2df   : > { %v1461_v16 = vmul.f32 %v5890_v14, %v1326_v63 }
 0x2e0   : > { %v2377_v25 = vrot.slane %v1810_v24, %v5844_v56  ;;  %1664 = vadd.xlane.f32.xlu0 %v1441_v18  ;;  %1728 = vadd.xlane.f32.xlu1 %v1473_v0  ;;  %v2234_v42 = vrot.slane %v1781_v21, %v5885_v13  ;;  %v1327_v18 = vmax.f32 %v1199_v49, 0.0  ;;  %v1200_v0 = vadd.f32 %v5985_v62, %v982_v60  ;;  %v983_v24 = vld [vmem:[#allocation10 + $0x3b0] sm:$0xff] }
 0x2e1   : > { %v1617_v27 = vpop.xlane.xlu0 %1616  ;;  %v1559_v29 = vpop.xlane.xlu1 %1558  ;;  %v1201_v22 = vadd.f32 %v5985_v62, %v983_v24 }
 0x2e2   : > { %v2378_v37 = vsel %vm2043_vm5, %v2377_v25, %v2373_v2  ;;  %v1811_v43 = vadd.f32 %v5766_v34, %v1617_v27  ;;  %v1782_v40 = vadd.f32 %v5766_v34, %v1559_v29  ;;  %v2235_v47 = vsel %vm2064_vm8, %v2234_v42, %v2230_v17 }
 0x2e3   : > { %v1462_v29 = vmul.f32 %v5890_v14, %v1327_v18  ;;  %v1328_v55 = vmax.f32 %v1200_v0, 0.0 }
 0x2e4   : > { %v2382_v38 = vrot.slane %v1811_v43, %v5861_v35  ;;  %v2239_v45 = vrot.slane %v1782_v40, %v5904_v36  ;;  %1700 = vadd.xlane.f32.xlu0 %v1459_v26  ;;  %v984_v26 = vld [vmem:[#allocation10 + $0x3b8] sm:$0xff] }
 0x2e5   : > { %v1529_v12 = vpop.xlane.xlu0 %1528  ;;  %v1619_v59 = vpop.xlane.xlu1 %1618 }
 0x2e6   : > { %v2383_v20 = vsel %vm2050_vm6, %v2382_v38, %v2378_v37  ;;  %v2240_v50 = vsel %vm2071_vm9, %v2239_v45, %v2235_v47  ;;  %v1767_v61 = vadd.f32 %v5766_v34, %v1529_v12  ;;  %v1812_v8 = vadd.f32 %v5766_v34, %v1619_v59 }
 0x2e7   : > { %v1463_v12 = vmul.f32 %v5890_v14, %v1328_v55  ;;  %v1329_v59 = vmax.f32 %v1201_v22, 0.0 }
 0x2e8   : > { %v2165_v9 = vrot.slane %v1767_v61, %v5817_v33  ;;  %v2387_v17 = vrot.slane %v1812_v8, %v5804_v39  ;;  %1702 = vadd.xlane.f32.xlu0 %v1460_v31  ;;  %v1202_v31 = vadd.f32 %v5985_v62, %v984_v26  ;;  %v985_v61 = vld [vmem:[#allocation10 + $0x3c0] sm:$0xff] }
 0x2e9   : > { %v1531_v15 = vpop.xlane.xlu0 %1530  ;;  %v1561_v46 = vpop.xlane.xlu1 %1560 }
 0x2ea   : > { %v2166_v54 = vsel %vm2078_vm10, %v2165_v9, %v2161_v57  ;;  %v2388_v19 = vsel %vm2057_vm7, %v2387_v17, %v2383_v20  ;;  %v1768_v2 = vadd.f32 %v5766_v34, %v1531_v15  ;;  %v1783_v21 = vadd.f32 %v5766_v34, %v1561_v46 }
 0x2eb   : > { %v1464_v15 = vmul.f32 %v5890_v14, %v1329_v59  ;;  %v1330_v46 = vmax.f32 %v1202_v31, 0.0  ;;  %v990_v31 = vld [vmem:[#allocation10 + $0x3e8] sm:$0xff] }
 0x2ec   : > { %v2170_v1 = vrot.slane %v1768_v2, %v5841_v58  ;;  %v2244_v25 = vrot.slane %v1783_v21, %v5817_v33  ;;  %1704 = vadd.xlane.f32.xlu0 %v1461_v16  ;;  %v1203_v16 = vadd.f32 %v5985_v62, %v985_v61  ;;  %v986_v2 = vld [vmem:[#allocation10 + $0x3c8] sm:$0xff] }
 0x2ed   : > { %v1533_v42 = vpop.xlane.xlu0 %1532  ;;  %v1621_v27 = vpop.xlane.xlu1 %1620 }
 0x2ee   : > { %v2171_v57 = vsel %vm2085_vm11, %v2170_v1, %v2166_v54  ;;  %v2245_v37 = vsel %vm2078_vm10, %v2244_v25, %v2240_v50  ;;  %v1769_v43 = vadd.f32 %v5766_v34, %v1533_v42  ;;  %v1813_v40 = vadd.f32 %v5766_v34, %v1621_v27 }
 0x2ef   : > { %v1331_v42 = vmax.f32 %v1203_v16, 0.0  ;;  %v1204_v27 = vadd.f32 %v5985_v62, %v986_v2 }
 0x2f0   : > { %v2175_v3 = vrot.slane %v1769_v43, %v5876_v7  ;;  %v2392_v38 = vrot.slane %v1813_v40, %v5885_v13  ;;  %1706 = vadd.xlane.f32.xlu0 %v1462_v29  ;;  %v987_v43 = vld [vmem:[#allocation10 + $0x3d0] sm:$0xff] }
 0x2f1   : > { %v1535_v45 = vpop.xlane.xlu0 %1534  ;;  %v1563_v47 = vpop.xlane.xlu1 %1562  ;;  %v1205_v59 = vadd.f32 %v5985_v62, %v987_v43 }
 0x2f2   : > { %v2176_v63 = vsel %vm2092_vm12, %v2175_v3, %v2171_v57  ;;  %v2393_v49 = vsel %vm2064_vm8, %v2392_v38, %v2388_v19  ;;  %v1770_v20 = vadd.f32 %v5766_v34, %v1535_v45  ;;  %v1784_v50 = vadd.f32 %v5766_v34, %v1563_v47 }
 0x2f3   : > { %v1465_v57 = vmul.f32 %v5890_v14, %v1330_v46  ;;  %v1332_v38 = vmax.f32 %v1204_v27, 0.0 }
 0x2f4   : > { %v2180_v8 = vrot.slane %v1770_v20, %v5879_v30  ;;  %v2249_v60 = vrot.slane %v1784_v50, %v5841_v58  ;;  %1708 = vadd.xlane.f32.xlu0 %v1463_v12  ;;  %v1466_v12 = vmul.f32 %v5890_v14, %v1331_v42  ;;  %v1208_v20 = vadd.f32 %v5985_v62, %v990_v31 }
 0x2f5   : > { %v1537_v9 = vpop.xlane.xlu0 %1536  ;;  %v1623_v17 = vpop.xlane.xlu1 %1622 }
 0x2f6   : > { %v2181_v18 = vsel %vm2099_vm13, %v2180_v8, %v2176_v63  ;;  %v2250_v0 = vsel %vm2085_vm11, %v2249_v60, %v2245_v37  ;;  %v1771_v54 = vadd.f32 %v5766_v34, %v1537_v9  ;;  %v1814_v19 = vadd.f32 %v5766_v34, %v1623_v17  ;;  %v991_v9 = vld [vmem:[#allocation10 + $0x3f0] sm:$0xff] }
 0x2f7   : > { %v1467_v8 = vmul.f32 %v5890_v14, %v1332_v38  ;;  %v1333_v60 = vmax.f32 %v1205_v59, 0.0  ;;  %v1336_v16 = vmax.f32 %v1208_v20, 0.0 }
 0x2f8   : > { %v2185_v21 = vrot.slane %v1771_v54, %v5901_v32  ;;  %v2397_v24 = vrot.slane %v1814_v19, %v5904_v36  ;;  %1710 = vadd.xlane.f32.xlu0 %v1464_v15  ;;  %v1209_v19 = vadd.f32 %v5985_v62, %v991_v9 }
 0x2f9   : > { %v1631_v1 = vpop.xlane.xlu0 %1630  ;;  %v1565_v25 = vpop.xlane.xlu1 %1564  ;;  %v1468_v54 = vmul.f32 %v5890_v14, %v1333_v60  ;;  %v1471_v27 = vmul.f32 %v5890_v14, %v1336_v16 }
 0x2fa   : > { %v2186_v29 = vsel %vm2106_vm14, %v2185_v21, %v2181_v18  ;;  %v2398_v55 = vsel %vm2071_vm9, %v2397_v24, %v2393_v49  ;;  %v1785_v22 = vadd.f32 %v5766_v34, %v1565_v25 }
 0x2fb   : > { %v2662_v37 = vsel %vm6617_vm15, %v2186_v29, %v5942_v6  ;;  %v1337_v29 = vmax.f32 %v1209_v19, 0.0  ;;  %vm6618_vm15 = vcmask 1042434  }
 0x2fc   : > { %v2254_v40 = vrot.slane %v1785_v22, %v5876_v7  ;;  %1712 = vadd.xlane.f32.xlu0 %v1465_v57  ;;  %v1818_v22 = vadd.f32 %v5766_v34, %v1631_v1 }
 0x2fd   : > { %v1633_v26 = vpop.xlane.xlu0 %1632  ;;  %v1625_v3 = vpop.xlane.xlu1 %1624  ;;  %v1472_v38 = vmul.f32 %v5890_v14, %v1337_v29 }
 0x2fe   : > { %v2255_v45 = vsel %vm2092_vm12, %v2254_v40, %v2250_v0  ;;  %v1815_v47 = vadd.f32 %v5766_v34, %v1625_v3  ;;  %v1819_v43 = vadd.f32 %v5766_v34, %v1633_v26  ;;  %v2417_v1 = vrot.slane %v1818_v22, %v5879_v30 }
 0x300   : > { %v2402_v63 = vrot.slane %v1815_v47, %v5817_v33  ;;  %1714 = vadd.xlane.f32.xlu0 %v1466_v12 }
 0x301   : > { %v1573_v6 = vpop.xlane.xlu0 %1572  ;;  %v1567_v49 = vpop.xlane.xlu1 %1566 }
 0x302   : > { %v2403_v50 = vsel %vm2078_vm10, %v2402_v63, %v2398_v55  ;;  %v1786_v61 = vadd.f32 %v5766_v34, %v1567_v49  ;;  %v1789_v47 = vadd.f32 %v5766_v34, %v1573_v6  ;;  %v2422_v63 = vrot.slane %v1819_v43, %v5901_v32 }
 0x304   : > { %v2259_v17 = vrot.slane %v1786_v61, %v5879_v30  ;;  %1716 = vadd.xlane.f32.xlu0 %v1467_v8  ;;  %v2273_v6 = vrot.slane %v1789_v47, %v5795_v11 }
 0x305   : > { %v1575_v15 = vpop.xlane.xlu0 %1574  ;;  %v1627_v46 = vpop.xlane.xlu1 %1626 }
 0x306   : > { %v2260_v18 = vsel %vm2099_vm13, %v2259_v17, %v2255_v45  ;;  %v1816_v0 = vadd.f32 %v5766_v34, %v1627_v46  ;;  %v1790_v59 = vadd.f32 %v5766_v34, %v1575_v15 }
 0x308   : > { %v2407_v2 = vrot.slane %v1816_v0, %v5841_v58  ;;  %1718 = vadd.xlane.f32.xlu0 %v1468_v54  ;;  %v2278_v60 = vrot.slane %v1790_v59, %v5807_v23 }
 0x309   : > { %v1577_v21 = vpop.xlane.xlu0 %1576  ;;  %v1569_v24 = vpop.xlane.xlu1 %1568 }
 0x30a   : > { %v2408_v25 = vsel %vm2085_vm11, %v2407_v2, %v2403_v50  ;;  %v1787_v42 = vadd.f32 %v5766_v34, %v1569_v24  ;;  %v1791_v49 = vadd.f32 %v5766_v34, %v1577_v21 }
 0x30c   : > { %v2264_v55 = vrot.slane %v1787_v42, %v5901_v32  ;;  %1724 = vadd.xlane.f32.xlu0 %v1471_v27  ;;  %v2283_v15 = vrot.slane %v1791_v49, %v5824_v44 }
 0x30d   : > { %v1629_v57 = vpop.xlane.xlu1 %1628  ;;  %v1635_v62 = vpop.xlane.xlu0 %1634 }
 0x30e   : > { %v2265_v40 = vsel %vm2106_vm14, %v2264_v55, %v2260_v18  ;;  %v1817_v3 = vadd.f32 %v5766_v34, %v1629_v57  ;;  %v1820_v61 = vadd.f32 %v5766_v34, %v1635_v62 }
 0x30f   : > { %v6159_v45 = vsel %vm6618_vm15, %v2265_v40, %v2662_v37  ;;  %vm6621_vm15 = vcmask 1043459  }
 0x310   : > { %v2412_v12 = vrot.slane %v1817_v3, %v5876_v7  ;;  %1726 = vadd.xlane.f32.xlu0 %v1472_v38  ;;  %v2427_v0 = vrot.slane %v1820_v61, %v5786_v4 }
 0x311   : > { %v1571_v31 = vpop.xlane.xlu1 %1570  ;;  %v1667_v26 = vpop.xlane.xlu0 %1666 }
 0x312   : > { %v2413_v14 = vsel %vm2092_vm12, %v2412_v12, %v2408_v25  ;;  %v1788_v37 = vadd.f32 %v5766_v34, %v1571_v31  ;;  %v1836_v57 = vadd.f32 %v5766_v34, %v1667_v26 }
 0x313   : > { %v2418_v20 = vsel %vm2099_vm13, %v2417_v1, %v2413_v14 }
 0x314   : > { %v6172_v50 = vsel %vm2106_vm14, %v2422_v63, %v2418_v20  ;;  %v2269_v8 = vrot.slane %v1788_v37, %v5786_v4  ;;  %v2506_v12 = vrot.slane %v1836_v57, %v5786_v4 }
 0x315   : > { %v1637_v9 = vpop.xlane.xlu1 %1636  ;;  %v1671_v17 = vpop.xlane.xlu0 %1670 }
 0x316   : > { %v2274_v46 = vsel %vm2008_vm0, %v2273_v6, %v2269_v8  ;;  %v1821_v16 = vadd.f32 %v5766_v34, %v1637_v9  ;;  %v1838_v43 = vadd.f32 %v5766_v34, %v1671_v17 }
 0x317   : > { %v2279_v18 = vsel %vm2015_vm1, %v2278_v60, %v2274_v46 }
 0x318   : > { %v2431_v54 = vrot.slane %v1821_v16, %v5795_v11  ;;  %v2284_v19 = vsel %vm2022_vm2, %v2283_v15, %v2279_v18  ;;  %v2515_v59 = vrot.slane %v1838_v43, %v5807_v23 }
 0x319   : > { %v1579_v2 = vpop.xlane.xlu1 %1578  ;;  %v1583_v21 = vpop.xlane.xlu0 %1582 }
 0x31a   : > { %v2432_v24 = vsel %vm2008_vm0, %v2431_v54, %v2427_v0  ;;  %v1792_v25 = vadd.f32 %v5766_v34, %v1579_v2  ;;  %v1794_v31 = vadd.f32 %v5766_v34, %v1583_v21 }
 0x31c   : > { %v2288_v42 = vrot.slane %v1792_v25, %v5776_v52  ;;  %v2298_v61 = vrot.slane %v1794_v31, %v5844_v56 }
 0x31d   : > { %v1639_v27 = vpop.xlane.xlu1 %1638  ;;  %v1643_v29 = vpop.xlane.xlu0 %1642 }
 0x31e   : > { %v2289_v55 = vsel %vm6619_vm3, %v2288_v42, %v2284_v19  ;;  %v1822_v22 = vadd.f32 %v5766_v34, %v1639_v27  ;;  %v1824_v8 = vadd.f32 %v5766_v34, %v1643_v29 }
 0x320   : > { %v2436_v62 = vrot.slane %v1822_v22, %v5807_v23  ;;  %v2446_v19 = vrot.slane %v1824_v8, %v5776_v52 }
 0x321   : > { %v1669_v40 = vpop.xlane.xlu1 %1668  ;;  %v1585_v3 = vpop.xlane.xlu0 %1584 }
 0x322   : > { %v2437_v38 = vsel %vm2015_vm1, %v2436_v62, %v2432_v24  ;;  %v1837_v47 = vadd.f32 %v5766_v34, %v1669_v40  ;;  %v1795_v14 = vadd.f32 %v5766_v34, %v1585_v3 }
 0x324   : > { %v2510_v1 = vrot.slane %v1837_v47, %v5795_v11  ;;  %v2303_v17 = vrot.slane %v1795_v14, %v5861_v35 }
 0x325   : > { %v1581_v63 = vpop.xlane.xlu1 %1580  ;;  %v1645_v26 = vpop.xlane.xlu0 %1644 }
 0x326   : > { %v2511_v49 = vsel %vm2008_vm0, %v2510_v1, %v2506_v12  ;;  %v1793_v37 = vadd.f32 %v5766_v34, %v1581_v63  ;;  %v1825_v46 = vadd.f32 %v5766_v34, %v1645_v26 }
 0x327   : > { %v2516_v20 = vsel %vm2015_vm1, %v2515_v59, %v2511_v49 }
 0x328   : > { %v2293_v6 = vrot.slane %v1793_v37, %v5789_v5  ;;  %v2451_v25 = vrot.slane %v1825_v46, %v5789_v5 }
 0x329   : > { %v1641_v60 = vpop.xlane.xlu1 %1640  ;;  %v1675_v9 = vpop.xlane.xlu0 %1674 }
 0x32a   : > { %v2294_v15 = vsel %vm2036_vm4, %v2293_v6, %v2289_v55  ;;  %v1823_v16 = vadd.f32 %v5766_v34, %v1641_v60  ;;  %v1840_v2 = vadd.f32 %v5766_v34, %v1675_v9 }
 0x32b   : > { %v2299_v18 = vsel %vm2043_vm5, %v2298_v61, %v2294_v15 }
 0x32c   : > { %v2441_v0 = vrot.slane %v1823_v16, %v5824_v44  ;;  %v2304_v54 = vsel %vm2050_vm6, %v2303_v17, %v2299_v18  ;;  %v2525_v43 = vrot.slane %v1840_v2, %v5776_v52 }
 0x32d   : > { %v1673_v21 = vpop.xlane.xlu1 %1672  ;;  %v1587_v24 = vpop.xlane.xlu0 %1586 }
 0x32e   : > { %v2442_v42 = vsel %vm2022_vm2, %v2441_v0, %v2437_v38  ;;  %v1839_v27 = vadd.f32 %v5766_v34, %v1673_v21  ;;  %v1796_v29 = vadd.f32 %v5766_v34, %v1587_v24 }
 0x32f   : > { %v2447_v55 = vsel %vm6619_vm3, %v2446_v19, %v2442_v42 }
 0x330   : > { %v2520_v22 = vrot.slane %v1839_v27, %v5824_v44  ;;  %v2308_v57 = vrot.slane %v1796_v29, %v5804_v39  ;;  %v2452_v62 = vsel %vm2036_vm4, %v2451_v25, %v2447_v55 }
 0x331   : > { %v1677_v40 = vpop.xlane.xlu1 %1676  ;;  %v1647_v3 = vpop.xlane.xlu0 %1646 }
 0x332   : > { %v2521_v47 = vsel %vm2022_vm2, %v2520_v22, %v2516_v20  ;;  %v2309_v38 = vsel %vm2057_vm7, %v2308_v57, %v2304_v54  ;;  %v1826_v12 = vadd.f32 %v5766_v34, %v1647_v3 }
 0x333   : > { %v6227_v1 = vsel %vm6619_vm3, %v2525_v43, %v2521_v47  ;;  %vm6620_vm3 = vcmask 1044484  }
 0x334   : > { %v2456_v59 = vrot.slane %v1826_v12, %v5844_v56 }
 0x335   : > { %v1679_v31 = vpop.xlane.xlu1 %1678  ;;  %v1589_v63 = vpop.xlane.xlu0 %1588 }
 0x336   : > { %v2457_v26 = vsel %vm2043_vm5, %v2456_v59, %v2452_v62  ;;  %v1797_v49 = vadd.f32 %v5766_v34, %v1589_v63 }
 0x338   : > { %v2313_v14 = vrot.slane %v1797_v49, %v5885_v13 }
 0x339   : > { %v1681_v37 = vpop.xlane.xlu1 %1680  ;;  %v1649_v6 = vpop.xlane.xlu0 %1648 }
 0x33a   : > { %v2314_v20 = vsel %vm2064_vm8, %v2313_v14, %v2309_v38  ;;  %v1827_v61 = vadd.f32 %v5766_v34, %v1649_v6 }
 0x33c   : > { %v2461_v8 = vrot.slane %v1827_v61, %v5861_v35 }
 0x33d   : > { %v1683_v60 = vpop.xlane.xlu1 %1682  ;;  %v1591_v9 = vpop.xlane.xlu0 %1590 }
 0x33e   : > { %v2462_v17 = vsel %vm2050_vm6, %v2461_v8, %v2457_v26  ;;  %v1798_v15 = vadd.f32 %v5766_v34, %v1591_v9 }
 0x340   : > { %v2318_v46 = vrot.slane %v1798_v15, %v5904_v36 }
 0x341   : > { %v1685_v16 = vpop.xlane.xlu1 %1684  ;;  %v1651_v18 = vpop.xlane.xlu0 %1650 }
 0x342   : > { %v2319_v0 = vsel %vm2071_vm9, %v2318_v46, %v2314_v20  ;;  %v1828_v54 = vadd.f32 %v5766_v34, %v1651_v18  ;;  %v1841_v18 = vadd.f32 %v5766_v34, %v1677_v40  ;;  %v1845_v40 = vadd.f32 %v5766_v34, %v1685_v16 }
 0x344   : > { %v2466_v19 = vrot.slane %v1828_v54, %v5804_v39 }
 0x345   : > { %v1687_v2 = vpop.xlane.xlu1 %1686  ;;  %v1593_v21 = vpop.xlane.xlu0 %1592 }
 0x346   : > { %v2467_v24 = vsel %vm2057_vm7, %v2466_v19, %v2462_v17  ;;  %v1799_v25 = vadd.f32 %v5766_v34, %v1593_v21  ;;  %v1842_v19 = vadd.f32 %v5766_v34, %v1679_v31  ;;  %v1843_v21 = vadd.f32 %v5766_v34, %v1681_v37 }
 0x347   : > { %v1846_v37 = vadd.f32 %v5766_v34, %v1687_v2 }
 0x348   : > { %v2323_v42 = vrot.slane %v1799_v25, %v5817_v33  ;;  %v1844_v25 = vadd.f32 %v5766_v34, %v1683_v60  ;;  %v2535_v31 = vrot.slane %v1842_v19, %v5844_v56 }
 0x349   : > { %v1689_v27 = vpop.xlane.xlu1 %1688  ;;  %v1653_v29 = vpop.xlane.xlu0 %1652 }
 0x34a   : > { %v2324_v55 = vsel %vm2078_vm10, %v2323_v42, %v2319_v0  ;;  %v1829_v22 = vadd.f32 %v5766_v34, %v1653_v29 }
 0x34c   : > { %v2471_v57 = vrot.slane %v1829_v22, %v5885_v13 }
 0x34d   : > { %v1601_v62 = vpop.xlane.xlu1 %1600  ;;  %v1595_v43 = vpop.xlane.xlu0 %1594 }
 0x34e   : > { %v2472_v3 = vsel %vm2064_vm8, %v2471_v57, %v2467_v24  ;;  %v1800_v47 = vadd.f32 %v5766_v34, %v1595_v43  ;;  %v1803_v15 = vadd.f32 %v5766_v34, %v1601_v62  ;;  %v2540_v43 = vrot.slane %v1843_v21, %v5861_v35 }
 0x350   : > { %v2328_v38 = vrot.slane %v1800_v47, %v5841_v58  ;;  %v2343_v42 = vrot.slane %v1803_v15, %v5901_v32 }
 0x351   : > { %v1655_v12 = vpop.xlane.xlu0 %1654  ;;  %v1661_v63 = vpop.xlane.xlu1 %1660 }
 0x352   : > { %v2329_v59 = vsel %vm2085_vm11, %v2328_v38, %v2324_v55  ;;  %v1830_v26 = vadd.f32 %v5766_v34, %v1655_v12  ;;  %v2530_v55 = vrot.slane %v1841_v18, %v5789_v5  ;;  %v2545_v38 = vrot.slane %v1844_v25, %v5804_v39 }
 0x354   : > { %v2476_v49 = vrot.slane %v1830_v26, %v5904_v36  ;;  %v2531_v2 = vsel %vm2036_vm4, %v2530_v55, %v6227_v1  ;;  %v2550_v26 = vrot.slane %v1845_v40, %v5885_v13 }
 0x355   : > { %v1597_v14 = vpop.xlane.xlu0 %1596  ;;  %v1663_v61 = vpop.xlane.xlu1 %1662 }
 0x356   : > { %v2477_v6 = vsel %vm2071_vm9, %v2476_v49, %v2472_v3  ;;  %v1801_v20 = vadd.f32 %v5766_v34, %v1597_v14  ;;  %v1847_v3 = vadd.f32 %v5766_v34, %v1689_v27  ;;  %v2536_v27 = vsel %vm2043_vm5, %v2535_v31, %v2531_v2 }
 0x357   : > { %v1834_v25 = vadd.f32 %v5766_v34, %v1663_v61 }
 0x358   : > { %v2333_v8 = vrot.slane %v1801_v20, %v5876_v7 }
 0x359   : > { %v1657_v9 = vpop.xlane.xlu0 %1656  ;;  %v1695_v0 = vpop.xlane.xlu1 %1694 }
 0x35a   : > { %v2334_v17 = vsel %vm2092_vm12, %v2333_v8, %v2329_v59  ;;  %v1831_v22 = vadd.f32 %v5766_v34, %v1657_v9  ;;  %v2541_v8 = vsel %vm2050_vm6, %v2540_v43, %v2536_v27  ;;  %v2560_v9 = vrot.slane %v1847_v3, %v5817_v33 }
 0x35b   : > { %v2546_v1 = vsel %vm2057_vm7, %v2545_v38, %v2541_v8  ;;  %v1850_v18 = vadd.f32 %v5766_v34, %v1695_v0 }
 0x35c   : > { %v2481_v49 = vrot.slane %v1831_v22, %v5817_v33 }
 0x35d   : > { %v1599_v46 = vpop.xlane.xlu0 %1598  ;;  %v1699_v16 = vpop.xlane.xlu1 %1698  ;;  %v2575_v22 = vrot.slane %v1850_v18, %v5879_v30 }
 0x35e   : > { %v1802_v54 = vadd.f32 %v5766_v34, %v1599_v46  ;;  %v2551_v46 = vsel %vm2064_vm8, %v2550_v26, %v2546_v1  ;;  %v1852_v1 = vadd.f32 %v5766_v34, %v1699_v16 }
 0x360   : > { %v2338_v24 = vrot.slane %v1802_v54, %v5879_v30  ;;  %v2482_v54 = vsel %vm2078_vm10, %v2481_v49, %v2477_v6 }
 0x361   : > { %v1659_v29 = vpop.xlane.xlu0 %1658  ;;  %v1697_v19 = vpop.xlane.xlu1 %1696 }
 0x362   : > { %v2339_v57 = vsel %vm2099_vm13, %v2338_v24, %v2334_v17  ;;  %v1832_v60 = vadd.f32 %v5766_v34, %v1659_v29  ;;  %v1851_v40 = vadd.f32 %v5766_v34, %v1697_v19 }
 0x363   : > { %v2344_v62 = vsel %vm2106_vm14, %v2343_v42, %v2339_v57 }
 0x364   : > { %v2666_v47 = vsel %vm6621_vm15, %v2344_v62, %v6159_v45  ;;  %v2555_v45 = vrot.slane %v1846_v37, %v5904_v36  ;;  %v2486_v20 = vrot.slane %v1832_v60, %v5841_v58  ;;  %v2496_v37 = vrot.slane %v1834_v25, %v5879_v30 }
 0x365   : > { %v1691_v12 = vpop.xlane.xlu0 %1690  ;;  %v2668_v59 = vsel %vm6620_vm3, %v6172_v50, %v2666_v47  ;;  %v1833_v50 = vadd.f32 %v5766_v34, %v1661_v63  ;;  %vm2669_vm3 = vcmask 1045509   ;;  %v2580_v43 = vrot.slane %v1851_v40, %v5901_v32 }
 0x366   : > { %v1848_v14 = vadd.f32 %v5766_v34, %v1691_v12  ;;  %v2556_v24 = vsel %vm2071_vm9, %v2555_v45, %v2551_v46  ;;  %v2487_v63 = vsel %vm2085_vm11, %v2486_v20, %v2482_v54  ;;  %vm6622_vm15 = vcmask 1046534   ;;  %v1721_v54 = vpop.xlane.xlu1 %1720 }
 0x367   : > { %v2561_v42 = vsel %vm2078_vm10, %v2560_v9, %v2556_v24  ;;  %v2491_v29 = vrot.slane %v1833_v50, %v5876_v7  ;;  %v2585_v24 = vrot.slane %v1852_v1, %v5786_v4 }
 0x368   : > { %v2565_v17 = vrot.slane %v1848_v14, %v5841_v58 }
 0x369   : > { %v1693_v15 = vpop.xlane.xlu0 %1692  ;;  %v2492_v57 = vsel %vm2092_vm12, %v2491_v29, %v2487_v63 }
 0x36a   : > { %v1849_v21 = vadd.f32 %v5766_v34, %v1693_v15  ;;  %v2566_v0 = vsel %vm2085_vm11, %v2565_v17, %v2561_v42  ;;  %v2497_v3 = vsel %vm2099_vm13, %v2496_v37, %v2492_v57  ;;  %v1863_v57 = vadd.f32 %v5766_v34, %v1721_v54 }
 0x36c   : > { %v2570_v55 = vrot.slane %v1849_v21, %v5876_v7 }
 0x36d   : > { %v1665_v6 = vpop.xlane.xlu0 %1664 }
 0x36e   : > { %v2571_v31 = vsel %vm2092_vm12, %v2570_v55, %v2566_v0  ;;  %v1835_v61 = vadd.f32 %v5766_v34, %v1665_v6  ;;  %v1723_v6 = vpop.xlane.xlu1 %1722 }
 0x36f   : > { %v2576_v62 = vsel %vm2099_vm13, %v2575_v22, %v2571_v31 }
 0x370   : > { %v2501_v60 = vrot.slane %v1835_v61, %v5901_v32  ;;  %v2581_v12 = vsel %vm2106_vm14, %v2580_v43, %v2576_v62 }
 0x371   : > { %v1701_v47 = vpop.xlane.xlu0 %1700 }
 0x372   : > { %v2502_v38 = vsel %vm2106_vm14, %v2501_v60, %v2497_v3  ;;  %v1853_v8 = vadd.f32 %v5766_v34, %v1701_v47 }
 0x373   : > { %v2670_v2 = vsel %vm2669_vm3, %v2502_v38, %v2668_v59  ;;  %v1729_v38 = vpop.xlane.xlu1 %1728 }
 0x374   : > { %v6319_v26 = vsel %vm6622_vm15, %v2581_v12, %v2670_v2  ;;  %v2589_v59 = vrot.slane %v1853_v8, %v5795_v11  ;;  %vm6650_vm15 = vcmask 326912  }
 0x375   : > { %v1703_v49 = vpop.xlane.xlu0 %1702 }
 0x376   : > { %v1854_v50 = vadd.f32 %v5766_v34, %v1703_v49  ;;  %v2590_v11 = vsel %vm2008_vm0, %v2589_v59, %v2585_v24  ;;  %vm2673_vm0 = vcmask 1047559   ;;  %v533_v59 = vld [vmem:[#allocation13 + $0x78] sm:$0xff] }
 0x377   : > { %v545_v24 = vld [vmem:[#allocation13 + $0xd8] sm:$0xff] }
 0x378   : > { %v2594_v19 = vrot.slane %v1854_v50, %v5807_v23 }
 0x379   : > { %v1705_v14 = vpop.xlane.xlu0 %1704 }
 0x37a   : > { %v1855_v17 = vadd.f32 %v5766_v34, %v1705_v14  ;;  %v2595_v40 = vsel %vm2015_vm1, %v2594_v19, %v2590_v11  ;;  %v1867_v14 = vadd.f32 %v5766_v34, %v1729_v38  ;;  %vm1870_vm1 = vcmp.lt.s32.totalorder %v5761_v28, 16  ;;  %v532_v19 = vld [vmem:[#allocation13 + $0x70] sm:$0xff]  ;;  %v557_v11 = vld [vmem:[#allocation13 + $0x138] sm:$0xff] }
 0x37b   : > { %v580_v38 = vld [vmem:[#allocation13 + $0x1f0] sm:$0xff] }
 0x37c   : > { %v2599_v25 = vrot.slane %v1855_v17, %v5824_v44  ;;  %v2659_v8 = vrot.slane %v1867_v14, %v5901_v32  ;;  %v520_v17 = vld [vmem:[#allocation13 + $0x10] sm:$0xff] }
 0x37d   : > { %v1707_v27 = vpop.xlane.xlu0 %1706  ;;  %v2708_v14 = vld [vmem:[#allocation8 + $0xb0] sm:$0xff] }
 0x37e   : > { %v1856_v15 = vadd.f32 %v5766_v34, %v1707_v27  ;;  %v2600_v4 = vsel %vm2022_vm2, %v2599_v25, %v2595_v40  ;;  %vm5198_vm2 = vmmov 0  }
 0x37f   : > { %4145 = vmatprep.mubr.msk.f32.mxu0 %vm5198_vm2, %v5194_v10 }
 0x380   : > { %v2604_v63 = vrot.slane %v1856_v15, %v5776_v52  ;;  %v526_v15 = vld [vmem:[#allocation13 + $0x40] sm:$0xff] }
 0x381   : > { %v1709_v45 = vpop.xlane.xlu0 %1708  ;;  %v4392_v28 = vpack.c.bf16 %v526_v15, %v520_v17  ;;  %v2687_v15 = vld [vmem:[#allocation8 + $0x8] sm:$0xff] }
 0x382   : > { %v1857_v46 = vadd.f32 %v5766_v34, %v1709_v45  ;;  %v2605_v52 = vsel %vm6650_vm15, %v2604_v63, %v2600_v4  ;;  %v544_v63 = vld [vmem:[#allocation13 + $0xd0] sm:$0xff]  ;;  %v569_v4 = vld [vmem:[#allocation13 + $0x198] sm:$0xff] }
 0x384   : > { %v2609_v29 = vrot.slane %v1857_v46, %v5789_v5  ;;  %v539_v46 = vld [vmem:[#allocation13 + $0xa8] sm:$0xff] }
 0x385   : > { %v1711_v20 = vpop.xlane.xlu0 %1710  ;;  %v4394_v54 = vpack.c.bf16 %v539_v46, %v533_v59  ;;  %v2688_v46 = vld [vmem:[#allocation8 + $0x10] sm:$0xff] }
 0x386   : > { %v1858_v21 = vadd.f32 %v5766_v34, %v1711_v20  ;;  %v2610_v5 = vsel %vm2036_vm4, %v2609_v29, %v2605_v52  ;;  %v563_v29 = vld [vmem:[#allocation13 + $0x168] sm:$0xff]  ;;  %vm6651_vm4 = vcmask 1041409  }
 0x387   : > { %v4402_v40 = vpack.c.bf16 %v563_v29, %v557_v11  ;;  %v2703_v52 = vld [vmem:[#allocation8 + $0x88] sm:$0xff] }
 0x388   : > { %v2614_v23 = vrot.slane %v1858_v21, %v5844_v56  ;;  %v538_v21 = vld [vmem:[#allocation13 + $0xa0] sm:$0xff] }
 0x389   : > { %v1713_v9 = vpop.xlane.xlu0 %1712  ;;  %v4396_v25 = vpack.c.bf16 %v538_v21, %v532_v19  ;;  %v2690_v21 = vld [vmem:[#allocation8 + $0x20] sm:$0xff] }
 0x38a   : > { %v1859_v16 = vadd.f32 %v5766_v34, %v1713_v9  ;;  %v2615_v56 = vsel %vm2043_vm5, %v2614_v23, %v2610_v5  ;;  %v556_v23 = vld [vmem:[#allocation13 + $0x130] sm:$0xff]  ;;  %vm6652_vm5 = vcmask 1042434  }
 0x38b   : > { %v2704_v5 = vld [vmem:[#allocation8 + $0x90] sm:$0xff] }
 0x38c   : > { %v2619_v44 = vrot.slane %v1859_v16, %v5861_v35  ;;  %v1864_v35 = vadd.f32 %v5766_v34, %v1723_v6  ;;  %v2702_v6 = vld [vmem:[#allocation8 + $0x80] sm:$0xff] }
 0x38d   : > { %v1715_v18 = vpop.xlane.xlu0 %1714 }
 0x38e   : > { %v1860_v42 = vadd.f32 %v5766_v34, %v1715_v18  ;;  %v2620_v62 = vsel %vm2050_vm6, %v2619_v44, %v2615_v56  ;;  %v2644_v49 = vrot.slane %v1864_v35, %v5841_v58  ;;  %v5197_v18 = vmov 0.0|0.0   ;;  %v575_v44 = vld [vmem:[#allocation13 + $0x1c8] sm:$0xff]  ;;  %v574_v56 = vld [vmem:[#allocation13 + $0x1c0] sm:$0xff] }
 0x38f   : > { %4478 = vmatprep.subr.bf16.mxu0 %v5197_v18  ;;  %v587_v35 = vld [vmem:[#allocation13 + $0x228] sm:$0xff]  ;;  %vm6653_vm6 = vcmask 1043459  }
 0x390   : > { %v2624_v22 = vrot.slane %v1860_v42, %v5804_v39  ;;  %v2639_v39 = vrot.slane %v1863_v57, %v5817_v33  ;;  %v550_v42 = vld [vmem:[#allocation13 + $0x100] sm:$0xff]  ;;  %v4479_v57 = vpack.c.bf16 %v2703_v52, %v2702_v6  ;;  %v2696_v6 = vld [vmem:[#allocation8 + $0x50] sm:$0xff]  ;;  %v2697_v52 = vld [vmem:[#allocation8 + $0x58] sm:$0xff] }
 0x391   : > { %v1717_v55 = vpop.xlane.xlu0 %1716 }
 0x392   : > { %v1861_v0 = vadd.f32 %v5766_v34, %v1717_v55  ;;  %v2625_v60 = vsel %vm2057_vm7, %v2624_v22, %v2620_v62  ;;  %v4400_v55 = vpack.c.bf16 %v550_v42, %v544_v63  ;;  %v581_v62 = vld [vmem:[#allocation13 + $0x1f8] sm:$0xff]  ;;  %4480 = vmatpush3.bf16.msra.mxu0 %v4479_v57  ;;  %vm6654_vm7 = vcmask 1044484  }
 0x393   : > { %4481 = vmatprep.subr.bf16.mxu0 %v5197_v18  ;;  %v2713_v57 = vld [vmem:[#allocation8 + $0xd8] sm:$0xff] }
 0x394   : > { %v2629_v31 = vrot.slane %v1861_v0, %v5885_v13  ;;  %v562_v0 = vld [vmem:[#allocation13 + $0x160] sm:$0xff] }
 0x395   : > { %v1719_v61 = vpop.xlane.xlu0 %1718  ;;  %v4404_v22 = vpack.c.bf16 %v562_v0, %v556_v23  ;;  %v2695_v23 = vld [vmem:[#allocation8 + $0x48] sm:$0xff]  ;;  %v2710_v0 = vld [vmem:[#allocation8 + $0xc0] sm:$0xff] }
 0x396   : > { %v1862_v37 = vadd.f32 %v5766_v34, %v1719_v61  ;;  %v2630_v3 = vsel %vm2064_vm8, %v2629_v31, %v2625_v60  ;;  %v4406_v31 = vpack.c.bf16 %v575_v44, %v569_v4  ;;  %v568_v61 = vld [vmem:[#allocation13 + $0x190] sm:$0xff]  ;;  %v2711_v44 = vld [vmem:[#allocation8 + $0xc8] sm:$0xff]  ;;  %vm6655_vm8 = vcmask 1046534  }
 0x398   : > { %v2634_v43 = vrot.slane %v1862_v37, %v5904_v36  ;;  %v2705_v37 = vld [vmem:[#allocation8 + $0x98] sm:$0xff] }
 0x399   : > { %v1725_v47 = vpop.xlane.xlu0 %1724  ;;  %v4482_v60 = vpack.c.bf16 %v2705_v37, %v2704_v5  ;;  %v4470_v5 = vpack.c.bf16 %v2697_v52, %v2696_v6  ;;  %v2714_v37 = vld [vmem:[#allocation8 + $0xe0] sm:$0xff]  ;;  %v2744_v6 = vld [vmem:[#allocation8 + $0x1d0] sm:$0xff]  ;;  %v2745_v52 = vld [vmem:[#allocation8 + $0x1d8] sm:$0xff] }
 0x39a   : > { %v2635_v13 = vsel %vm2071_vm9, %v2634_v43, %v2630_v3  ;;  %v1865_v12 = vadd.f32 %v5766_v34, %v1725_v47  ;;  %v2706_v43 = vld [vmem:[#allocation8 + $0xa0] sm:$0xff]  ;;  %v4408_v3 = vpack.c.bf16 %v574_v56, %v568_v61  ;;  %v4410_v47 = vpack.c.bf16 %v587_v35, %v581_v62  ;;  %v2699_v56 = vld [vmem:[#allocation8 + $0x68] sm:$0xff] }
 0x39b   : > { %v2640_v2 = vsel %vm2078_vm10, %v2639_v39, %v2635_v13  ;;  %v2707_v39 = vld [vmem:[#allocation8 + $0xa8] sm:$0xff]  ;;  %v586_v13 = vld [vmem:[#allocation13 + $0x220] sm:$0xff]  ;;  %4483 = vmatpush3.bf16.msra.mxu0 %v4482_v60 }
 0x39c   : > { %v2649_v27 = vrot.slane %v1865_v12, %v5876_v7  ;;  %v2645_v36 = vsel %vm2085_vm11, %v2644_v49, %v2640_v2  ;;  %v593_v12 = vld [vmem:[#allocation13 + $0x258] sm:$0xff]  ;;  %v599_v2 = vld [vmem:[#allocation13 + $0x288] sm:$0xff]  ;;  %v4485_v49 = vpack.c.bf16 %v2707_v39, %v2706_v43  ;;  %4484 = vmatprep.subr.bf16.mxu0 %v5197_v18  ;;  %v2698_v61 = vld [vmem:[#allocation8 + $0x60] sm:$0xff] }
 0x39d   : > { %v1727_v45 = vpop.xlane.xlu0 %1726  ;;  %v2715_v62 = vld [vmem:[#allocation8 + $0xe8] sm:$0xff]  ;;  %v4473_v35 = vpack.c.bf16 %v2699_v56, %v2698_v61  ;;  %v2700_v43 = vld [vmem:[#allocation8 + $0x70] sm:$0xff]  ;;  %v2701_v39 = vld [vmem:[#allocation8 + $0x78] sm:$0xff] }
 0x39e   : > { %v1866_v33 = vadd.f32 %v5766_v34, %v1727_v45  ;;  %v2650_v9 = vsel %vm2092_vm12, %v2649_v27, %v2645_v36  ;;  %v521_v34 = vld [vmem:[#allocation13 + $0x18] sm:$0xff]  ;;  %v4412_v45 = vpack.c.bf16 %v586_v13, %v580_v38  ;;  %v4414_v36 = vpack.c.bf16 %v599_v2, %v593_v12  ;;  %v2747_v61 = vld [vmem:[#allocation8 + $0x1e8] sm:$0xff] }
 0x39f   : > { %v2709_v27 = vld [vmem:[#allocation8 + $0xb8] sm:$0xff]  ;;  %4486 = vmatpush3.bf16.msra.mxu0 %v4485_v49  ;;  %v4497_v60 = vpack.c.bf16 %v2715_v62, %v2714_v37  ;;  %v4476_v38 = vpack.c.bf16 %v2701_v39, %v2700_v43  ;;  %v2732_v37 = vld [vmem:[#allocation8 + $0x170] sm:$0xff] }
 0x3a0   : > { %v2654_v20 = vrot.slane %v1866_v33, %v5879_v30  ;;  %v527_v30 = vld [vmem:[#allocation13 + $0x48] sm:$0xff]  ;;  %v592_v33 = vld [vmem:[#allocation13 + $0x250] sm:$0xff]  ;;  %4487 = vmatprep.subr.bf16.mxu0 %v5197_v18  ;;  %v2733_v62 = vld [vmem:[#allocation8 + $0x178] sm:$0xff] }
 0x3a1   : > { %v4390_v32 = vpack.c.bf16 %v527_v30, %v521_v34  ;;  %v604_v34 = vld [vmem:[#allocation13 + $0x2b0] sm:$0xff]  ;;  %v610_v30 = vld [vmem:[#allocation13 + $0x2e0] sm:$0xff]  ;;  %v2749_v43 = vld [vmem:[#allocation8 + $0x1f8] sm:$0xff]  ;;  %v4524_v39 = vpack.c.bf16 %v2733_v62, %v2732_v37 }
 0x3a2   : > { %v2655_v50 = vsel %vm2099_vm13, %v2654_v20, %v2650_v9  ;;  %v598_v20 = vld [vmem:[#allocation13 + $0x280] sm:$0xff]  ;;  %v611_v9 = vld [vmem:[#allocation13 + $0x2e8] sm:$0xff]  ;;  %v4420_v17 = vpack.c.bf16 %v610_v30, %v604_v34  ;;  %v2736_v30 = vld [vmem:[#allocation8 + $0x190] sm:$0xff] }
 0x3a3   : > { %v2660_v58 = vsel %vm2106_vm14, %v2659_v8, %v2655_v50  ;;  %4391 = vmatprep.subr.bf16.mxu1 %v4390_v32  ;;  %v605_v8 = vld [vmem:[#allocation13 + $0x2b8] sm:$0xff]  ;;  %v4488_v50 = vpack.c.bf16 %v2709_v27, %v2708_v14  ;;  %v2686_v32 = vld [vmem:[#allocation8] sm:$0xff]  ;;  %v2719_v27 = vld [vmem:[#allocation8 + $0x108] sm:$0xff] }
 0x3a4   : > { %v2674_v7 = vsel %vm2673_vm0, %v2660_v58, %v6319_v26  ;;  %v551_v26 = vld [vmem:[#allocation13 + $0x108] sm:$0xff]  ;;  %4393 = vmatpush1.bf16.msra.mxu1 %v4392_v28  ;;  %v4416_v58 = vpack.c.bf16 %v598_v20, %v592_v33  ;;  %v4455_v59 = vpack.c.bf16 %v2687_v15, %v2686_v32  ;;  %v2689_v28 = vld [vmem:[#allocation8 + $0x18] sm:$0xff]  ;;  %v2718_v14 = vld [vmem:[#allocation8 + $0x100] sm:$0xff] }
 0x3a5   : > { %v6371_v1 = vsel %vm1870_vm1, %v2674_v7, -1e+30  ;;  %4395 = vmatprep.subr.bf16.mxu1 %v4394_v54  ;;  %v4398_v16 = vpack.c.bf16 %v551_v26, %v545_v24  ;;  %v4418_v7 = vpack.c.bf16 %v611_v9, %v605_v8  ;;  %4489 = vmatpush3.bf16.msra.mxu0 %v4488_v50  ;;  %v4878_v54 = vld [vmem:[#allocation2] sm:$0xff]  ;;  %v4458_v19 = vpack.c.bf16 %v2689_v28, %v2688_v46  ;;  %v2691_v24 = vld [vmem:[#allocation8 + $0x28] sm:$0xff]  ;;  %v2720_v50 = vld [vmem:[#allocation8 + $0x110] sm:$0xff] }
 0x3a6   : > { %2677 = vmax.xlane.f32.xlu0 %v6371_v1  ;;  %4490 = vmatprep.subr.bf16.mxu0 %v5197_v18  ;;  %v4461_v26 = vpack.c.bf16 %v2691_v24, %v2690_v21  ;;  %v2735_v33 = vld [vmem:[#allocation8 + $0x188] sm:$0xff]  ;;  %v4503_v20 = vpack.c.bf16 %v2719_v27, %v2718_v14  ;;  %v2722_v15 = vld [vmem:[#allocation8 + $0x120] sm:$0xff]  ;;  %v2724_v21 = vld [vmem:[#allocation8 + $0x130] sm:$0xff] }
 0x3a7   : > { %v2738_v28 = vld [vmem:[#allocation8 + $0x1a0] sm:$0xff]  ;;  %v2725_v24 = vld [vmem:[#allocation8 + $0x138] sm:$0xff]  ;;  %v2752_v27 = vld [vmem:[#allocation8 + $0x210] sm:$0xff] }
 0x3a8   : > { %4397 = vmatpush1.bf16.msra.mxu1 %v4396_v25  ;;  %v2692_v25 = vld [vmem:[#allocation8 + $0x30] sm:$0xff]  ;;  %v2782_v62 = vld [vmem:[#allocation8 + $0x300] sm:$0xff] }
 0x3a9   : > { %4399 = vmatprep.subr.bf16.mxu1 %v4398_v16  ;;  %v2693_v16 = vld [vmem:[#allocation8 + $0x38] sm:$0xff] }
 0x3aa   : > { %v4464_v63 = vpack.c.bf16 %v2693_v16, %v2692_v25  ;;  %v2740_v25 = vld [vmem:[#allocation8 + $0x1b0] sm:$0xff]  ;;  %v2741_v16 = vld [vmem:[#allocation8 + $0x1b8] sm:$0xff] }
 0x3ac   : > { %4401 = vmatpush1.bf16.msra.mxu1 %v4400_v55 }
 0x3ad   : > { %4403 = vmatprep.subr.bf16.mxu1 %v4402_v40  ;;  %v2694_v40 = vld [vmem:[#allocation8 + $0x40] sm:$0xff] }
 0x3ae   : > { %v4467_v4 = vpack.c.bf16 %v2695_v23, %v2694_v40  ;;  %v2743_v40 = vld [vmem:[#allocation8 + $0x1c8] sm:$0xff] }
 0x3b0   : > { %4405 = vmatpush1.bf16.msra.mxu1 %v4404_v22  ;;  %v4491_v22 = vpack.c.bf16 %v2711_v44, %v2710_v0  ;;  %v2728_v0 = vld [vmem:[#allocation8 + $0x150] sm:$0xff] }
 0x3b1   : > { %4407 = vmatprep.subr.bf16.mxu1 %v4406_v31 }
 0x3b2   : > { %4492 = vmatpush3.bf16.msra.mxu0 %v4491_v22 }
 0x3b3   : > { %4493 = vmatprep.subr.bf16.mxu0 %v5197_v18 }
 0x3b4   : > { %4409 = vmatpush1.bf16.msra.mxu1 %v4408_v3  ;;  %v2716_v3 = vld [vmem:[#allocation8 + $0xf0] sm:$0xff] }
 0x3b5   : > { %4411 = vmatprep.subr.bf16.mxu1 %v4410_v47  ;;  %v2717_v47 = vld [vmem:[#allocation8 + $0xf8] sm:$0xff] }
 0x3b6   : > { %v4500_v13 = vpack.c.bf16 %v2717_v47, %v2716_v3  ;;  %v2750_v3 = vld [vmem:[#allocation8 + $0x200] sm:$0xff]  ;;  %v2751_v47 = vld [vmem:[#allocation8 + $0x208] sm:$0xff] }
 0x3b8   : > { %4413 = vmatpush1.bf16.msra.mxu1 %v4412_v45 }
 0x3b9   : > { %4415 = vmatprep.subr.bf16.mxu1 %v4414_v36  ;;  %v2734_v36 = vld [vmem:[#allocation8 + $0x180] sm:$0xff] }
 0x3bc   : > { %4417 = vmatpush1.bf16.msra.mxu1 %v4416_v58  ;;  %v2721_v58 = vld [vmem:[#allocation8 + $0x118] sm:$0xff] }
 0x3bd   : > { %4419 = vmatprep.subr.bf16.mxu1 %v4418_v7  ;;  %v4527_v7 = vpack.c.bf16 %v2735_v33, %v2734_v36  ;;  %v4506_v32 = vpack.c.bf16 %v2721_v58, %v2720_v50  ;;  %v2755_v58 = vld [vmem:[#allocation8 + $0x228] sm:$0xff] }
 0x3c0   : > { %4421 = vmatpush1.bf16.msra.mxu1 %v4420_v17  ;;  %v2737_v17 = vld [vmem:[#allocation8 + $0x198] sm:$0xff] }
 0x3c1   : > { %4454 = vmatprep.subr.bf16.mxu1 %v5197_v18  ;;  %v4530_v46 = vpack.c.bf16 %v2737_v17, %v2736_v30  ;;  %v2771_v30 = vld [vmem:[#allocation8 + $0x2a8] sm:$0xff] }
 0x3c3   : > { %782 = vmatmul.mubr.f32.vlgmr.msra.gmra.mrb[0].mxu1 %v4878_v54  ;;  %v2739_v54 = vld [vmem:[#allocation8 + $0x1a8] sm:$0xff] }
 0x3c4   : > { %4456 = vmatpush3.bf16.msra.mxu1 %v4455_v59  ;;  %4110 = vmatprep.mubr.msk.f32.mxu1 %vm5198_vm2, %v5194_v10  ;;  %v2723_v59 = vld [vmem:[#allocation8 + $0x128] sm:$0xff] }
 0x3c5   : > { %4457 = vmatprep.subr.bf16.mxu1 %v5197_v18 }
 0x3c8   : > { %4459 = vmatpush3.bf16.msra.mxu1 %v4458_v19  ;;  %v4509_v19 = vpack.c.bf16 %v2723_v59, %v2722_v15  ;;  %v2757_v15 = vld [vmem:[#allocation8 + $0x238] sm:$0xff] }
 0x3c9   : > { %4460 = vmatprep.subr.bf16.mxu1 %v5197_v18 }
 0x3cc   : > { %4462 = vmatpush3.bf16.msra.mxu1 %v4461_v26  ;;  %v4533_v26 = vpack.c.bf16 %v2739_v54, %v2738_v28  ;;  %v2773_v28 = vld [vmem:[#allocation8 + $0x2b8] sm:$0xff] }
 0x3cd   : > { %4463 = vmatprep.subr.bf16.mxu1 %v5197_v18 }
 0x3d0   : > { %4465 = vmatpush3.bf16.msra.mxu1 %v4464_v63  ;;  %v4512_v63 = vpack.c.bf16 %v2725_v24, %v2724_v21  ;;  %v2759_v21 = vld [vmem:[#allocation8 + $0x248] sm:$0xff] }
 0x3d1   : > { %4466 = vmatprep.subr.bf16.mxu1 %v5197_v18 }
 0x3d4   : > { %4468 = vmatpush3.bf16.msra.mxu1 %v4467_v4  ;;  %v2729_v4 = vld [vmem:[#allocation8 + $0x158] sm:$0xff] }
 0x3d5   : > { %4469 = vmatprep.subr.bf16.mxu1 %v5197_v18  ;;  %v4518_v22 = vpack.c.bf16 %v2729_v4, %v2728_v0  ;;  %v2763_v0 = vld [vmem:[#allocation8 + $0x268] sm:$0xff] }
 0x3d8   : > { %4471 = vmatpush3.bf16.msra.mxu1 %v4470_v5  ;;  %v4542_v5 = vpack.c.bf16 %v2745_v52, %v2744_v6  ;;  %v2779_v6 = vld [vmem:[#allocation8 + $0x2e8] sm:$0xff] }
 0x3d9   : > { %4472 = vmatprep.subr.bf16.mxu1 %v5197_v18 }
 0x3dc   : > { %4474 = vmatpush3.bf16.msra.mxu1 %v4473_v35 }
 0x3dd   : > { %4475 = vmatprep.subr.bf16.mxu1 %v5197_v18 }
 0x3e0   : > { %4477 = vmatpush3.bf16.msra.mxu1 %v4476_v38 }
 0x3e1   : > { %4502 = vmatprep.subr.bf16.mxu1 %v5197_v18 }
 0x433   : > { %v2678_v42 = vpop.xlane.xlu0 %2677 }
 0x434   : > { %v2679_v11 = vsub.f32 %v6371_v1, %v2678_v42  ;;  %v2712_v1 = vld [vmem:[#allocation8 + $0xd0] sm:$0xff]  ;;  %v2726_v42 = vld [vmem:[#allocation8 + $0x140] sm:$0xff] }
 0x435   : > { %v4494_v31 = vpack.c.bf16 %v2713_v57, %v2712_v1  ;;  %v2730_v1 = vld [vmem:[#allocation8 + $0x160] sm:$0xff]  ;;  %v2731_v57 = vld [vmem:[#allocation8 + $0x168] sm:$0xff] }
 0x436   : > { %v2680_v29 = vmul.f32 1.442695, %v2679_v11  ;;  %v2727_v11 = vld [vmem:[#allocation8 + $0x148] sm:$0xff]  ;;  %v4521_v56 = vpack.c.bf16 %v2731_v57, %v2730_v1  ;;  %v2764_v1 = vld [vmem:[#allocation8 + $0x270] sm:$0xff]  ;;  %v2765_v57 = vld [vmem:[#allocation8 + $0x278] sm:$0xff] }
 0x437   : > { %4495 = vmatpush3.bf16.msra.mxu0 %v4494_v31  ;;  %v4515_v23 = vpack.c.bf16 %v2727_v11, %v2726_v42  ;;  %v2746_v31 = vld [vmem:[#allocation8 + $0x1e0] sm:$0xff]  ;;  %v2761_v42 = vld [vmem:[#allocation8 + $0x258] sm:$0xff]  ;;  %v4572_v37 = vpack.c.bf16 %v2765_v57, %v2764_v1 }
 0x438   : > { %4853 = vpow2.f32 %v2680_v29  ;;  %4496 = vmatprep.subr.bf16.mxu0 %v5197_v18  ;;  %v4536_v29 = vpack.c.bf16 %v2741_v16, %v2740_v25  ;;  %v4545_v35 = vpack.c.bf16 %v2747_v61, %v2746_v31  ;;  %v2775_v25 = vld [vmem:[#allocation8 + $0x2c8] sm:$0xff]  ;;  %v2780_v31 = vld [vmem:[#allocation8 + $0x2f0] sm:$0xff]  ;;  %v2781_v61 = vld [vmem:[#allocation8 + $0x2f8] sm:$0xff] }
 0x43b   : > { %4498 = vmatpush3.bf16.msra.mxu0 %v4497_v60  ;;  %v2748_v60 = vld [vmem:[#allocation8 + $0x1f0] sm:$0xff] }
 0x43c   : > { %4499 = vmatprep.subr.bf16.mxu0 %v5197_v18  ;;  %v4548_v38 = vpack.c.bf16 %v2749_v43, %v2748_v60  ;;  %v2798_v43 = vld [vmem:[#allocation8 + $0x380] sm:$0xff] }
 0x43f   : > { %4501 = vmatpush3.bf16.msra.mxu0 %v4500_v13  ;;  %v2766_v13 = vld [vmem:[#allocation8 + $0x280] sm:$0xff] }
 0x440   : > { %4526 = vmatprep.subr.bf16.mxu0 %v5197_v18 }
 0x442   : > { %v4854_v55 = vpop.eup %4853 }
 0x443   : > { %2682 = vadd.xlane.f32.xlu1 %v4854_v55 }
 0x4d0   : > { %v2683_v12 = vpop.xlane.xlu1 %2682 }
 0x4d1   : > { %4855 = vrcp.f32 %v2683_v12  ;;  %v2767_v12 = vld [vmem:[#allocation8 + $0x288] sm:$0xff] }
 0x4d2   : > { %v4575_v36 = vpack.c.bf16 %v2767_v12, %v2766_v13  ;;  %v2785_v13 = vld [vmem:[#allocation8 + $0x318] sm:$0xff] }
 0x4db   : > { %v4856_v2 = vpop.eup %4855 }
 0x4dc   : > { %v6397_v49 = vmul.f32 %v4856_v2, %v4854_v55  ;;  %v2742_v55 = vld [vmem:[#allocation8 + $0x1c0] sm:$0xff]  ;;  %v4551_v2 = vpack.c.bf16 %v2751_v47, %v2750_v3 }
 0x4dd   : > { %v4539_v44 = vpack.c.bf16 %v2743_v40, %v2742_v55  ;;  %v2777_v55 = vld [vmem:[#allocation8 + $0x2d8] sm:$0xff] }
 0x4de   : > { %3701 = vst [vmem:[%s5538_s12] sm:$0xff] %v6397_v49  ;;  %v2822_v45 = vrot.slane %v6397_v49, %v5552_v48  ;;  %v2815_v52 = vcombine.high %v6397_v49, %v6397_v49  ;;  %v2783_v49 = vld [vmem:[#allocation8 + $0x308] sm:$0xff] }
 0x4df   : > { %v4599_v3 = vpack.c.bf16 %v2783_v49, %v2782_v62  ;;  %v3464_v62 = vld [vmem:[#allocation14 + $0x20] sm:$0xff] }
 0x4e0   : > { %v6404_v8 = vrot.slane %v2822_v45, %v5552_v48  ;;  %v2830_v9 = vcombine.high %v2822_v45, %v2822_v45  ;;  %v2753_v45 = vld [vmem:[#allocation8 + $0x218] sm:$0xff] }
 0x4e1   : > { %v4554_v50 = vpack.c.bf16 %v2753_v45, %v2752_v27  ;;  %v2801_v27 = vld [vmem:[#allocation8 + $0x398] sm:$0xff] }
 0x4e2   : > { %4111 = vmatmul.mubr.f32.vlgmr.msra.gmra.mrb[2].mxu1 %v6404_v8  ;;  %v6408_v34 = vrot.slane %v2830_v9, %v5552_v48  ;;  %v2860_v14 = vcombine.high %v6404_v8, %v6404_v8  ;;  %v2769_v9 = vld [vmem:[#allocation8 + $0x298] sm:$0xff]  ;;  %v2754_v8 = vld [vmem:[#allocation8 + $0x220] sm:$0xff] }
 0x4e3   : > { %4504 = vmatpush3.bf16.msra.mxu1 %v4503_v20  ;;  %4180 = vmatprep.mubr.msk.f32.mxu1 %vm5198_vm2, %v5194_v10  ;;  %v2768_v20 = vld [vmem:[#allocation8 + $0x290] sm:$0xff]  ;;  %v4557_v17 = vpack.c.bf16 %v2755_v58, %v2754_v8  ;;  %v2789_v58 = vld [vmem:[#allocation8 + $0x338] sm:$0xff] }
 0x4e4   : > { %4146 = vmatmul.mubr.f32.vlgmr.msra.gmra.mrb[4].mxu0 %v6408_v34  ;;  %4505 = vmatprep.subr.bf16.mxu1 %v5197_v18  ;;  %v2862_v33 = vcombine.high %v6408_v34, %v6408_v34  ;;  %v2770_v34 = vld [vmem:[#allocation8 + $0x2a0] sm:$0xff]  ;;  %v2788_v8 = vld [vmem:[#allocation8 + $0x330] sm:$0xff] }
 0x4e5   : > { %4528 = vmatpush3.bf16.msra.mxu0 %v4527_v7  ;;  %4215 = vmatprep.mubr.msk.f32.mxu0 %vm5198_vm2, %v5194_v10  ;;  %v4578_v7 = vpack.c.bf16 %v2769_v9, %v2768_v20  ;;  %v4581_v59 = vpack.c.bf16 %v2771_v30, %v2770_v34  ;;  %v2803_v9 = vld [vmem:[#allocation8 + $0x3a8] sm:$0xff]  ;;  %v2804_v34 = vld [vmem:[#allocation8 + $0x3b0] sm:$0xff]  ;;  %v2805_v30 = vld [vmem:[#allocation8 + $0x3b8] sm:$0xff] }
 0x4e6   : > { %4529 = vmatprep.subr.bf16.mxu0 %v5197_v18 }
 0x4e7   : > { %4507 = vmatpush3.bf16.msra.mxu1 %v4506_v32  ;;  %v2756_v32 = vld [vmem:[#allocation8 + $0x230] sm:$0xff] }
 0x4e8   : > { %4508 = vmatprep.subr.bf16.mxu1 %v5197_v18  ;;  %v4560_v54 = vpack.c.bf16 %v2757_v15, %v2756_v32  ;;  %v2790_v32 = vld [vmem:[#allocation8 + $0x340] sm:$0xff]  ;;  %v2791_v15 = vld [vmem:[#allocation8 + $0x348] sm:$0xff] }
 0x4e9   : > { %4531 = vmatpush3.bf16.msra.mxu0 %v4530_v46  ;;  %v2772_v46 = vld [vmem:[#allocation8 + $0x2b0] sm:$0xff] }
 0x4ea   : > { %4532 = vmatprep.subr.bf16.mxu0 %v5197_v18  ;;  %v4584_v24 = vpack.c.bf16 %v2773_v28, %v2772_v46  ;;  %v2806_v46 = vld [vmem:[#allocation8 + $0x3c0] sm:$0xff]  ;;  %v2807_v28 = vld [vmem:[#allocation8 + $0x3c8] sm:$0xff] }
 0x4eb   : > { %4510 = vmatpush3.bf16.msra.mxu1 %v4509_v19  ;;  %v2758_v19 = vld [vmem:[#allocation8 + $0x240] sm:$0xff] }
 0x4ec   : > { %4511 = vmatprep.subr.bf16.mxu1 %v5197_v18  ;;  %v4563_v16 = vpack.c.bf16 %v2759_v21, %v2758_v19  ;;  %v2792_v19 = vld [vmem:[#allocation8 + $0x350] sm:$0xff]  ;;  %v2793_v21 = vld [vmem:[#allocation8 + $0x358] sm:$0xff] }
 0x4ed   : > { %4534 = vmatpush3.bf16.msra.mxu0 %v4533_v26  ;;  %v2774_v26 = vld [vmem:[#allocation8 + $0x2c0] sm:$0xff] }
 0x4ee   : > { %4535 = vmatprep.subr.bf16.mxu0 %v5197_v18  ;;  %v4587_v11 = vpack.c.bf16 %v2775_v25, %v2774_v26  ;;  %v2808_v26 = vld [vmem:[#allocation8 + $0x3d0] sm:$0xff]  ;;  %v2809_v25 = vld [vmem:[#allocation8 + $0x3d8] sm:$0xff] }
 0x4ef   : > { %4513 = vmatpush3.bf16.msra.mxu1 %v4512_v63  ;;  %v2760_v63 = vld [vmem:[#allocation8 + $0x250] sm:$0xff] }
 0x4f0   : > { %4514 = vmatprep.subr.bf16.mxu1 %v5197_v18  ;;  %v4566_v40 = vpack.c.bf16 %v2761_v42, %v2760_v63  ;;  %v2794_v63 = vld [vmem:[#allocation8 + $0x360] sm:$0xff]  ;;  %v2795_v42 = vld [vmem:[#allocation8 + $0x368] sm:$0xff] }
 0x4f1   : > { %4537 = vmatpush3.bf16.msra.mxu0 %v4536_v29  ;;  %v2776_v29 = vld [vmem:[#allocation8 + $0x2d0] sm:$0xff] }
 0x4f2   : > { %4538 = vmatprep.subr.bf16.mxu0 %v5197_v18  ;;  %v4590_v4 = vpack.c.bf16 %v2777_v55, %v2776_v29  ;;  %v2810_v29 = vld [vmem:[#allocation8 + $0x3e0] sm:$0xff]  ;;  %v2811_v55 = vld [vmem:[#allocation8 + $0x3e8] sm:$0xff] }
 0x4f3   : > { %4516 = vmatpush3.bf16.msra.mxu1 %v4515_v23  ;;  %v2762_v23 = vld [vmem:[#allocation8 + $0x260] sm:$0xff] }
 0x4f4   : > { %4517 = vmatprep.subr.bf16.mxu1 %v5197_v18 }
 0x4f5   : > { %4540 = vmatpush3.bf16.msra.mxu0 %v4539_v44  ;;  %v2778_v44 = vld [vmem:[#allocation8 + $0x2e0] sm:$0xff] }
 0x4f6   : > { %4541 = vmatprep.subr.bf16.mxu0 %v5197_v18 }
 0x4f7   : > { %4519 = vmatpush3.bf16.msra.mxu1 %v4518_v22  ;;  %v4569_v22 = vpack.c.bf16 %v2763_v0, %v2762_v23  ;;  %v2796_v23 = vld [vmem:[#allocation8 + $0x370] sm:$0xff]  ;;  %v2797_v0 = vld [vmem:[#allocation8 + $0x378] sm:$0xff] }
 0x4f8   : > { %4520 = vmatprep.subr.bf16.mxu1 %v5197_v18 }
 0x4f9   : > { %4543 = vmatpush3.bf16.msra.mxu0 %v4542_v5  ;;  %v4593_v5 = vpack.c.bf16 %v2779_v6, %v2778_v44  ;;  %v2812_v44 = vld [vmem:[#allocation8 + $0x3f0] sm:$0xff]  ;;  %v2813_v6 = vld [vmem:[#allocation8 + $0x3f8] sm:$0xff] }
 0x4fa   : > { %4544 = vmatprep.subr.bf16.mxu0 %v5197_v18 }
 0x4fb   : > { %4522 = vmatpush3.bf16.msra.mxu1 %v4521_v56  ;;  %v2829_v56 = vrot.slane %v2815_v52, %v5552_v48  ;;  %v4620_v52 = vpack.c.bf16 %v2797_v0, %v2796_v23  ;;  %v3492_v0 = vld [vmem:[#allocation14 + $0x100] sm:$0xff] }
 0x4fc   : > { %4523 = vmatprep.subr.bf16.mxu1 %v5197_v18 }
 0x4fd   : > { %4546 = vmatpush3.bf16.msra.mxu0 %v4545_v35  ;;  %v4596_v35 = vpack.c.bf16 %v2781_v61, %v2780_v31  ;;  %v2831_v60 = vcombine.high %v2829_v56, %v2829_v56  ;;  %v6457_v47 = vrot.slane %v2829_v56, %v5552_v48  ;;  %v3465_v31 = vld [vmem:[#allocation14 + $0x28] sm:$0xff]  ;;  %v3463_v61 = vld [vmem:[#allocation14 + $0x18] sm:$0xff] }
 0x4fe   : > { %4547 = vmatprep.subr.bf16.mxu0 %v5197_v18 }
 0x4ff   : > { %4525 = vmatpush3.bf16.msra.mxu1 %v4524_v39  ;;  %v2799_v39 = vld [vmem:[#allocation8 + $0x388] sm:$0xff]  ;;  %v2861_v1 = vcombine.high %v6457_v47, %v6457_v47 }
 0x500   : > { %4550 = vmatprep.subr.bf16.mxu1 %v5197_v18  ;;  %v4623_v12 = vpack.c.bf16 %v2799_v39, %v2798_v43  ;;  %v3466_v43 = vld [vmem:[#allocation14 + $0x30] sm:$0xff]  ;;  %v3469_v39 = vld [vmem:[#allocation14 + $0x48] sm:$0xff] }
 0x501   : > { %4549 = vmatpush3.bf16.msra.mxu0 %v4548_v38  ;;  %v2784_v38 = vld [vmem:[#allocation8 + $0x310] sm:$0xff] }
 0x502   : > { %4181 = vmatmul.mubr.f32.vlgmr.msra.gmra.mrb[4].mxu1 %v2860_v14  ;;  %4574 = vmatprep.subr.bf16.mxu0 %v5197_v18  ;;  %v2800_v14 = vld [vmem:[#allocation8 + $0x390] sm:$0xff]  ;;  %v4602_v45 = vpack.c.bf16 %v2785_v13, %v2784_v38  ;;  %v3471_v38 = vld [vmem:[#allocation14 + $0x58] sm:$0xff] }
 0x503   : > { %4552 = vmatpush3.bf16.msra.mxu1 %v4551_v2  ;;  %4250 = vmatprep.mubr.msk.f32.mxu1 %vm5198_vm2, %v5194_v10  ;;  %v6462_v2 = vrot.slane %v2831_v60, %v5552_v48  ;;  %v4626_v20 = vpack.c.bf16 %v2801_v27, %v2800_v14  ;;  %v2802_v48 = vld [vmem:[#allocation8 + $0x3a0] sm:$0xff]  ;;  %v3462_v60 = vld [vmem:[#allocation14 + $0x10] sm:$0xff]  ;;  %v3475_v13 = vld [vmem:[#allocation14 + $0x78] sm:$0xff] }
 0x504   : > { %4216 = vmatmul.mubr.f32.vlgmr.msra.gmra.mrb[6].mxu0 %v2862_v33  ;;  %4553 = vmatprep.subr.bf16.mxu1 %v5197_v18  ;;  %v2787_v33 = vld [vmem:[#allocation8 + $0x328] sm:$0xff]  ;;  %v3472_v14 = vld [vmem:[#allocation14 + $0x60] sm:$0xff]  ;;  %v3470_v27 = vld [vmem:[#allocation14 + $0x50] sm:$0xff] }
 0x505   : > { %4576 = vmatpush3.bf16.msra.mxu0 %v4575_v36  ;;  %4285 = vmatprep.mubr.msk.f32.mxu0 %vm5198_vm2, %v5194_v10  ;;  %v2786_v36 = vld [vmem:[#allocation8 + $0x320] sm:$0xff]  ;;  %v2863_v57 = vcombine.high %v6462_v2, %v6462_v2 }
 0x506   : > { %4577 = vmatprep.subr.bf16.mxu0 %v5197_v18 }
 0x507   : > { %4555 = vmatpush3.bf16.msra.mxu1 %v4554_v50  ;;  %v4605_v50 = vpack.c.bf16 %v2787_v33, %v2786_v36  ;;  %v3474_v36 = vld [vmem:[#allocation14 + $0x70] sm:$0xff]  ;;  %v3477_v33 = vld [vmem:[#allocation14 + $0x88] sm:$0xff] }
 0x508   : > { %4556 = vmatprep.subr.bf16.mxu1 %v5197_v18 }
 0x509   : > { %4579 = vmatpush3.bf16.msra.mxu0 %v4578_v7  ;;  %v4629_v7 = vpack.c.bf16 %v2803_v9, %v2802_v48  ;;  %v4684_v48 = vpack.c.bf16 %v3474_v36, %v3470_v27  ;;  %v3510_v27 = vld [vmem:[#allocation14 + $0x190] sm:$0xff] }
 0x50a   : > { %4580 = vmatprep.subr.bf16.mxu0 %v5197_v18 }
 0x50b   : > { %4558 = vmatpush3.bf16.msra.mxu1 %v4557_v17  ;;  %v4608_v17 = vpack.c.bf16 %v2789_v58, %v2788_v8  ;;  %v3483_v8 = vld [vmem:[#allocation14 + $0xb8] sm:$0xff]  ;;  %v3476_v58 = vld [vmem:[#allocation14 + $0x80] sm:$0xff] }
 0x50c   : > { %4559 = vmatprep.subr.bf16.mxu1 %v5197_v18 }
 0x50d   : > { %4582 = vmatpush3.bf16.msra.mxu0 %v4581_v59  ;;  %v4632_v59 = vpack.c.bf16 %v2805_v30, %v2804_v34  ;;  %v3480_v34 = vld [vmem:[#allocation14 + $0xa0] sm:$0xff]  ;;  %v3478_v30 = vld [vmem:[#allocation14 + $0x90] sm:$0xff] }
 0x50e   : > { %4583 = vmatprep.subr.bf16.mxu0 %v5197_v18 }
 0x50f   : > { %4561 = vmatpush3.bf16.msra.mxu1 %v4560_v54  ;;  %v4611_v54 = vpack.c.bf16 %v2791_v15, %v2790_v32  ;;  %v4656_v32 = vpack.c.bf16 %v3480_v34, %v3476_v58  ;;  %v3485_v15 = vld [vmem:[#allocation14 + $0xc8] sm:$0xff]  ;;  %v3520_v58 = vld [vmem:[#allocation14 + $0x1e0] sm:$0xff] }
 0x510   : > { %4562 = vmatprep.subr.bf16.mxu1 %v5197_v18 }
 0x511   : > { %4585 = vmatpush3.bf16.msra.mxu0 %v4584_v24  ;;  %v4635_v24 = vpack.c.bf16 %v2807_v28, %v2806_v46  ;;  %v3487_v46 = vld [vmem:[#allocation14 + $0xd8] sm:$0xff] }
 0x512   : > { %4586 = vmatprep.subr.bf16.mxu0 %v5197_v18 }
 0x513   : > { %4564 = vmatpush3.bf16.msra.mxu1 %v4563_v16  ;;  %v4614_v16 = vpack.c.bf16 %v2793_v21, %v2792_v19  ;;  %v3491_v19 = vld [vmem:[#allocation14 + $0xf8] sm:$0xff]  ;;  %v3484_v21 = vld [vmem:[#allocation14 + $0xc0] sm:$0xff] }
 0x514   : > { %4565 = vmatprep.subr.bf16.mxu1 %v5197_v18 }
 0x515   : > { %4588 = vmatpush3.bf16.msra.mxu0 %v4587_v11  ;;  %v4638_v11 = vpack.c.bf16 %v2809_v25, %v2808_v26  ;;  %v4690_v26 = vpack.c.bf16 %v3491_v19, %v3487_v46  ;;  %v3486_v25 = vld [vmem:[#allocation14 + $0xd0] sm:$0xff] }
 0x516   : > { %4589 = vmatprep.subr.bf16.mxu0 %v5197_v18 }
 0x517   : > { %4567 = vmatpush3.bf16.msra.mxu1 %v4566_v40  ;;  %v4617_v40 = vpack.c.bf16 %v2795_v42, %v2794_v63  ;;  %v3493_v63 = vld [vmem:[#allocation14 + $0x108] sm:$0xff] }
 0x518   : > { %4568 = vmatprep.subr.bf16.mxu1 %v5197_v18  ;;  %v3497_v42 = vld [vmem:[#allocation14 + $0x128] sm:$0xff] }
 0x519   : > { %4591 = vmatpush3.bf16.msra.mxu0 %v4590_v4  ;;  %v4641_v4 = vpack.c.bf16 %v2811_v55, %v2810_v29  ;;  %v3499_v29 = vld [vmem:[#allocation14 + $0x138] sm:$0xff]  ;;  %v4662_v23 = vpack.c.bf16 %v3497_v42, %v3493_v63 }
 0x51a   : > { %4592 = vmatprep.subr.bf16.mxu0 %v5197_v18 }
 0x51b   : > { %4570 = vmatpush3.bf16.msra.mxu1 %v4569_v22  ;;  %v4644_v22 = vpack.c.bf16 %v2813_v6, %v2812_v44  ;;  %v3494_v44 = vld [vmem:[#allocation14 + $0x110] sm:$0xff] }
 0x51c   : > { %4571 = vmatprep.subr.bf16.mxu1 %v5197_v18 }
 0x51d   : > { %4594 = vmatpush3.bf16.msra.mxu0 %v4593_v5  ;;  %v3461_v5 = vld [vmem:[#allocation14 + $0x8] sm:$0xff] }
 0x51e   : > { %4595 = vmatprep.subr.bf16.mxu0 %v5197_v18  ;;  %v4646_v56 = vpack.c.bf16 %v3465_v31, %v3461_v5  ;;  %v3507_v5 = vld [vmem:[#allocation14 + $0x178] sm:$0xff] }
 0x51f   : > { %4573 = vmatpush3.bf16.msra.mxu1 %v4572_v37  ;;  %v3467_v37 = vld [vmem:[#allocation14 + $0x38] sm:$0xff] }
 0x520   : > { %4598 = vmatprep.subr.bf16.mxu1 %v5197_v18  ;;  %v4678_v49 = vpack.c.bf16 %v3467_v37, %v3463_v61  ;;  %v3500_v37 = vld [vmem:[#allocation14 + $0x140] sm:$0xff] }
 0x521   : > { %4597 = vmatpush3.bf16.msra.mxu0 %v4596_v35 }
 0x522   : > { %4251 = vmatmul.mubr.f32.vlgmr.msra.gmra.mrb[6].mxu1 %v6457_v47  ;;  %4622 = vmatprep.subr.bf16.mxu0 %v5197_v18  ;;  %v3473_v47 = vld [vmem:[#allocation14 + $0x68] sm:$0xff] }
 0x523   : > { %4600 = vmatpush3.bf16.msra.mxu1 %v4599_v3  ;;  %4320 = vmatprep.mubr.msk.f32.mxu1 %vm5198_vm2, %v5194_v10  ;;  %v4680_v3 = vpack.c.bf16 %v3466_v43, %v3462_v60 }
 0x524   : > { %4286 = vmatmul.mubr.f32.vlgmr.msra.gmra.mrb[8].mxu0 %v6462_v2  ;;  %4601 = vmatprep.subr.bf16.mxu1 %v5197_v18  ;;  %v3468_v2 = vld [vmem:[#allocation14 + $0x40] sm:$0xff] }
 0x525   : > { %4624 = vmatpush3.bf16.msra.mxu0 %v4623_v12  ;;  %4355 = vmatprep.mubr.msk.f32.mxu0 %vm5198_vm2, %v5194_v10  ;;  %v4682_v12 = vpack.c.bf16 %v3475_v13, %v3471_v38  ;;  %v3515_v13 = vld [vmem:[#allocation14 + $0x1b8] sm:$0xff] }
 0x526   : > { %4625 = vmatprep.subr.bf16.mxu0 %v5197_v18 }
 0x527   : > { %4603 = vmatpush3.bf16.msra.mxu1 %v4602_v45  ;;  %v4652_v45 = vpack.c.bf16 %v3472_v14, %v3468_v2 }
 0x528   : > { %4604 = vmatprep.subr.bf16.mxu1 %v5197_v18 }
 0x529   : > { %4627 = vmatpush3.bf16.msra.mxu0 %v4626_v20  ;;  %v3481_v20 = vld [vmem:[#allocation14 + $0xa8] sm:$0xff] }
 0x52a   : > { %4628 = vmatprep.subr.bf16.mxu0 %v5197_v18  ;;  %v4654_v9 = vpack.c.bf16 %v3481_v20, %v3477_v33  ;;  %v3517_v33 = vld [vmem:[#allocation14 + $0x1c8] sm:$0xff] }
 0x52b   : > { %4606 = vmatpush3.bf16.msra.mxu1 %v4605_v50  ;;  %v3479_v50 = vld [vmem:[#allocation14 + $0x98] sm:$0xff]  ;;  %v3521_v20 = vld [vmem:[#allocation14 + $0x1e8] sm:$0xff] }
 0x52c   : > { %4607 = vmatprep.subr.bf16.mxu1 %v5197_v18 }
 0x52d   : > { %4630 = vmatpush3.bf16.msra.mxu0 %v4629_v7  ;;  %v4686_v7 = vpack.c.bf16 %v3483_v8, %v3479_v50  ;;  %v3523_v50 = vld [vmem:[#allocation14 + $0x1f8] sm:$0xff]  ;;  %v3516_v8 = vld [vmem:[#allocation14 + $0x1c0] sm:$0xff] }
 0x52e   : > { %4631 = vmatprep.subr.bf16.mxu0 %v5197_v18  ;;  %v4676_v34 = vpack.c.bf16 %v3520_v58, %v3516_v8 }
 0x52f   : > { %4609 = vmatpush3.bf16.msra.mxu1 %v4608_v17  ;;  %v3482_v17 = vld [vmem:[#allocation14 + $0xb0] sm:$0xff] }
 0x530   : > { %4610 = vmatprep.subr.bf16.mxu1 %v5197_v18  ;;  %v4688_v28 = vpack.c.bf16 %v3482_v17, %v3478_v30  ;;  %v3518_v30 = vld [vmem:[#allocation14 + $0x1d0] sm:$0xff] }
 0x531   : > { %4633 = vmatpush3.bf16.msra.mxu0 %v4632_v59  ;;  %v3489_v59 = vld [vmem:[#allocation14 + $0xe8] sm:$0xff]  ;;  %v3522_v17 = vld [vmem:[#allocation14 + $0x1f0] sm:$0xff] }
 0x532   : > { %4634 = vmatprep.subr.bf16.mxu0 %v5197_v18 }
 0x533   : > { %4612 = vmatpush3.bf16.msra.mxu1 %v4611_v54  ;;  %v4658_v54 = vpack.c.bf16 %v3489_v59, %v3485_v15 }
 0x534   : > { %4613 = vmatprep.subr.bf16.mxu1 %v5197_v18 }
 0x535   : > { %4636 = vmatpush3.bf16.msra.mxu0 %v4635_v24  ;;  %v3488_v24 = vld [vmem:[#allocation14 + $0xe0] sm:$0xff] }
 0x536   : > { %4637 = vmatprep.subr.bf16.mxu0 %v5197_v18  ;;  %v4660_v55 = vpack.c.bf16 %v3488_v24, %v3484_v21 }
 0x537   : > { %4615 = vmatpush3.bf16.msra.mxu1 %v4614_v16  ;;  %v3490_v16 = vld [vmem:[#allocation14 + $0xf0] sm:$0xff] }
 0x538   : > { %4616 = vmatprep.subr.bf16.mxu1 %v5197_v18 }
 0x539   : > { %4639 = vmatpush3.bf16.msra.mxu0 %v4638_v11  ;;  %v3495_v11 = vld [vmem:[#allocation14 + $0x118] sm:$0xff] }
 0x53a   : > { %4640 = vmatprep.subr.bf16.mxu0 %v5197_v18  ;;  %v4694_v6 = vpack.c.bf16 %v3499_v29, %v3495_v11  ;;  %v638_v29 = vsub.s32 5, %v5545_v41 }
 0x53b   : > { %4618 = vmatpush3.bf16.msra.mxu1 %v4617_v40  ;;  %v4692_v40 = vpack.c.bf16 %v3490_v16, %v3486_v25 }
 0x53c   : > { %4619 = vmatprep.subr.bf16.mxu1 %v5197_v18 }
 0x53d   : > { %4642 = vmatpush3.bf16.msra.mxu0 %v4641_v4  ;;  %v3496_v4 = vld [vmem:[#allocation14 + $0x120] sm:$0xff] }
 0x53e   : > { %4643 = vmatprep.subr.bf16.mxu0 %v5197_v18  ;;  %v3460_v18 = vld [vmem:[#allocation14] sm:$0xff]  ;;  %v4664_v31 = vpack.c.bf16 %v3496_v4, %v3492_v0 }
 0x53f   : > { %4621 = vmatpush3.bf16.msra.mxu1 %v4620_v52  ;;  %v4648_v35 = vpack.c.bf16 %v3464_v62, %v3460_v18  ;;  %v3498_v52 = vld [vmem:[#allocation14 + $0x130] sm:$0xff]  ;;  %v3504_v18 = vld [vmem:[#allocation14 + $0x160] sm:$0xff] }
 0x540   : > { %4679 = vmatprep.subr.bf16.mxu1 %v4678_v49  ;;  %v4696_v61 = vpack.c.bf16 %v3498_v52, %v3494_v44  ;;  %v3502_v49 = vld [vmem:[#allocation14 + $0x150] sm:$0xff]  ;;  %v4668_v60 = vpack.c.bf16 %v3504_v18, %v3500_v37 }
 0x541   : > { %4645 = vmatpush3.bf16.msra.mxu0 %v4644_v22  ;;  %v3501_v22 = vld [vmem:[#allocation14 + $0x148] sm:$0xff] }
 0x542   : > { %4321 = vmatmul.mubr.f32.vlgmr.msra.gmra.mrb[8].mxu1 %v2861_v1  ;;  %4647 = vmatprep.subr.bf16.mxu0 %v4646_v56  ;;  %v3505_v1 = vld [vmem:[#allocation14 + $0x168] sm:$0xff] }
 0x543   : > { %3659 = vmatprep.mubr.f32.mxu1 %v5194_v10  ;;  %4681 = vmatpush1.bf16.msra.mxu1 %v4680_v3  ;;  %v4666_v56 = vpack.c.bf16 %v3505_v1, %v3501_v22  ;;  %v3513_v3 = vld [vmem:[#allocation14 + $0x1a8] sm:$0xff] }
 0x544   : > { %4356 = vmatmul.mubr.f32.vlgmr.msra.gmra.mrb[10].mxu0 %v2863_v57  ;;  %4683 = vmatprep.subr.bf16.mxu1 %v4682_v12  ;;  %v3503_v57 = vld [vmem:[#allocation14 + $0x158] sm:$0xff]  ;;  %v3512_v12 = vld [vmem:[#allocation14 + $0x1a0] sm:$0xff] }
 0x545   : > { %3588 = vmatprep.mubr.f32.mxu0 %v5194_v10  ;;  %4649 = vmatpush1.bf16.msra.mxu0 %v4648_v35  ;;  %v4650_v10 = vpack.c.bf16 %v3473_v47, %v3469_v39  ;;  %v4698_v62 = vpack.c.bf16 %v3507_v5, %v3503_v57  ;;  %v3506_v35 = vld [vmem:[#allocation14 + $0x170] sm:$0xff]  ;;  %v3509_v39 = vld [vmem:[#allocation14 + $0x188] sm:$0xff]  ;;  %v3511_v47 = vld [vmem:[#allocation14 + $0x198] sm:$0xff] }
 0x546   : > { %v4700_v43 = vpack.c.bf16 %v3506_v35, %v3502_v49  ;;  %v4670_v38 = vpack.c.bf16 %v3513_v3, %v3509_v39  ;;  %v4702_v2 = vpack.c.bf16 %v3515_v13, %v3511_v47 }
 0x547   : > { %4651 = vmatprep.subr.bf16.mxu0 %v4650_v10  ;;  %4685 = vmatpush1.bf16.msra.mxu1 %v4684_v48  ;;  %v3508_v10 = vld [vmem:[#allocation14 + $0x180] sm:$0xff]  ;;  %v3519_v48 = vld [vmem:[#allocation14 + $0x1d8] sm:$0xff] }
 0x548   : > { %4687 = vmatprep.subr.bf16.mxu1 %v4686_v7  ;;  %v4672_v14 = vpack.c.bf16 %v3512_v12, %v3508_v10  ;;  %v4706_v7 = vpack.c.bf16 %v3523_v50, %v3519_v48 }
 0x549   : > { %4653 = vmatpush1.bf16.msra.mxu0 %v4652_v45  ;;  %v3514_v45 = vld [vmem:[#allocation14 + $0x1b0] sm:$0xff] }
 0x54a   : > { %4655 = vmatprep.subr.bf16.mxu0 %v4654_v9  ;;  %v4704_v36 = vpack.c.bf16 %v3514_v45, %v3510_v27  ;;  %v4674_v9 = vpack.c.bf16 %v3521_v20, %v3517_v33 }
 0x54b   : > { %4689 = vmatpush1.bf16.msra.mxu1 %v4688_v28 }
 0x54c   : > { %4691 = vmatprep.subr.bf16.mxu1 %v4690_v26 }
 0x54d   : > { %4657 = vmatpush1.bf16.msra.mxu0 %v4656_v32  ;;  %v4708_v32 = vpack.c.bf16 %v3522_v17, %v3518_v30 }
 0x54e   : > { %4659 = vmatprep.subr.bf16.mxu0 %v4658_v54 }
 0x54f   : > { %4693 = vmatpush1.bf16.msra.mxu1 %v4692_v40 }
 0x550   : > { %4695 = vmatprep.subr.bf16.mxu1 %v4694_v6 }
 0x551   : > { %4661 = vmatpush1.bf16.msra.mxu0 %v4660_v55  ;;  %v6497_v55 = vld [vmem:[%s6604_s5] sm:$0x3f] }
 0x552   : > { %4663 = vmatprep.subr.bf16.mxu0 %v4662_v23  ;;  %v639_v40 = vrot.slane %v6497_v55, %v638_v29 }
 0x553   : > { %4697 = vmatpush1.bf16.msra.mxu1 %v4696_v61 }
 0x554   : > { %4699 = vmatprep.subr.bf16.mxu1 %v4698_v62  ;;  %v857_v44 = vadd.f32 %v5556_v51, %v639_v40 }
 0x555   : > { %4665 = vmatpush1.bf16.msra.mxu0 %v4664_v31 }
 0x556   : > { %4667 = vmatprep.subr.bf16.mxu0 %v4666_v56  ;;  %v3929_v5 = vmul.f32 -1.442695, %v857_v44 }
 0x557   : > { %4701 = vmatpush1.bf16.msra.mxu1 %v4700_v43 }
 0x558   : > { %4703 = vmatprep.subr.bf16.mxu1 %v4702_v2  ;;  %4857 = vpow2.f32 %v3929_v5 }
 0x559   : > { %4669 = vmatpush1.bf16.msra.mxu0 %v4668_v60 }
 0x55a   : > { %4671 = vmatprep.subr.bf16.mxu0 %v4670_v38 }
 0x55b   : > { %4705 = vmatpush1.bf16.msra.mxu1 %v4704_v36 }
 0x55c   : > { %4707 = vmatprep.subr.bf16.mxu1 %v4706_v7 }
 0x55d   : > { %4673 = vmatpush1.bf16.msra.mxu0 %v4672_v14 }
 0x55e   : > { %4675 = vmatprep.subr.bf16.mxu0 %v4674_v9 }
 0x55f   : > { %4709 = vmatpush1.bf16.msra.mxu1 %v4708_v32 }
 0x561   : > { %4677 = vmatpush1.bf16.msra.mxu0 %v4676_v34 }
 0x562   : > { %v4858_v31 = vpop.eup %4857 }
 0x563   : > { %v862_v61 = vadd.f32 1.0, %v4858_v31 }
 0x565   : > { %4859 = vrcp.f32 %v862_v61 }
 0x56f   : > { %v4860_v60 = vpop.eup %4859 }
 0x5b5   : > { %v2938_v15 = vpop.f32.mrb[2].mxu1 }
 0x5b6   : > { %v4112_v59 = vpop.f32.mrb[3].mxu1 }
 0x5b7   : > { %v3008_v46 = vpop.f32.mrb[4].mxu0 }
 0x5b8   : > { %v3440_v28 = vrot.slane %v3008_v46, 7  ;;  %v4147_v54 = vpop.f32.mrb[5].mxu0 }
 0x5ba   : > { %v3441_v19 = vsel %vm6651_vm4, %v3440_v28, %v2938_v15 }
 0x5d5   : > { %v3078_v21 = vpop.f32.mrb[4].mxu1 }
 0x5d6   : > { %v3442_v24 = vrot.slane %v3078_v21, 6  ;;  %v4182_v26 = vpop.f32.mrb[5].mxu1 }
 0x5d7   : > { %v3148_v25 = vpop.f32.mrb[6].mxu0 }
 0x5d8   : > { %v3443_v16 = vsel %vm6652_vm5, %v3442_v24, %v3441_v19  ;;  %v3444_v63 = vrot.slane %v3148_v25, 5  ;;  %v4217_v42 = vpop.f32.mrb[7].mxu0 }
 0x5da   : > { %v3445_v11 = vsel %vm6653_vm6, %v3444_v63, %v3443_v16 }
 0x5f5   : > { %v3218_v23 = vpop.f32.mrb[6].mxu1 }
 0x5f6   : > { %v3446_v0 = vrot.slane %v3218_v23, 4  ;;  %v4252_v4 = vpop.f32.mrb[7].mxu1 }
 0x5f7   : > { %v3288_v6 = vpop.f32.mrb[8].mxu0 }
 0x5f8   : > { %v3447_v52 = vsel %vm6654_vm7, %v3446_v0, %v3445_v11  ;;  %v3448_v22 = vrot.slane %v3288_v6, 3  ;;  %v4287_v1 = vpop.f32.mrb[9].mxu0 }
 0x5fa   : > { %v3449_v57 = vsel %vm2669_vm3, %v3448_v22, %v3447_v52 }
 0x615   : > { %v3358_v56 = vpop.f32.mrb[8].mxu1 }
 0x616   : > { %v3450_v37 = vrot.slane %v3358_v56, 2  ;;  %v4322_v18 = vpop.f32.mrb[9].mxu1 }
 0x617   : > { %v3428_v51 = vpop.f32.mrb[10].mxu0 }
 0x618   : > { %v3451_v62 = vsel %vm6655_vm8, %v3450_v37, %v3449_v57  ;;  %v3452_v49 = vrot.slane %v3428_v51, 1  ;;  %v4357_v35 = vpop.f32.mrb[11].mxu0 }
 0x61a   : > { %v3453_v43 = vsel %vm2673_vm0, %v3452_v49, %v3451_v62 }
 0x61b   : > { %v3455_v39 = vmul.f32 %v4860_v60, %v3453_v43 }
 0x61d   : > { %3589 = vmatmul.mubr.f32.vlgmr.msra.gmra.mrb[0].mxu0 %v3455_v39  ;;  %3660 = vmatmul.mubr.f32.vlgmr.msra.gmra.mrb[0].mxu1 %v3455_v39 }
 0x61e   : > { %5063 = shalt.err (!%p5060_p4)
}
 0x61f   : > { %s5064_s12 = scalar_lea.hbm %s6511_s24, 128  ;;  %s5068_s14 = scalar_lea.hbm %s6656_s22, 1024 }
 0x620   : > { %p5065_p6 = scmp.ne.s32.totalorder %s6511_s24, %s5064_s12  ;;  %p5069_p8 = scmp.lt.u32.totalorder %s6511_s24, %s6656_s22 }
 0x621   : > { %p5070_p7 = scmp.lt.u32.totalorder %s5068_s14, %s5064_s12  ;;  %p5072_p12 = scmp.lt.u32.totalorder %s5064_s12, %s6511_s24 }
 0x622   : > { %p5066_p9 = pnand %p5065_p6, %p6657_p1 }
 0x623   : > { %p5071_p3 = por %p5070_p7, %p5069_p8 }
 0x624   : > { %p5067_p10 = pneg %p5066_p9 }
 0x625   : > { %p5073_p5 = por %p5072_p12, %p5071_p3 }
 0x627   : > { %p5074_p0 = pnand %p5073_p5, %p5067_p10 }
 0x629   : > { %5077 = shalt.err (!%p5074_p0)
}
 0x62a   : > { %4745 = dma.vmem_to_hbm [thread:$0]  (%p6657_p1), %s3737_s25, 128, %s6511_s24, %s3708_s21   ;;  %v622_v3 = vsub.s32 1, %v5545_v41  ;;  %v619_v47 = vrot.slane %v6497_v55, %v5561_v53  ;;  %v3456_v38 = vld [vmem:[%s5521_s29] sm:$0xff]  ;;  %v3457_v10 = vld [vmem:[%s5521_s29 + $0x8] sm:$0xff]  ;;  %v630_v12 = vsub.s32 3, %v5545_v41  ;;  %v626_v20 = vsub.s32 2, %v5545_v41 }
 0x62b   : > { %v3459_v9 = vld [vmem:[%s5521_s29 + $0x18] sm:$0xff]  ;;  %v3458_v30 = vld [vmem:[%s5521_s29 + $0x10] sm:$0xff]  ;;  %v517_v24 = vld [vmem:[#allocation3] sm:$0xff]  ;;  %s3722_s29 = sshll.u32 %s5536_s26, 4  ;;  %s6658_s23 = sshll.u32 %s5172_s18, 7  ;;  %s6552_s29 = int_to_ptr.vmem [resolvable:$true] %s3722_s29 }
 0x62c   : > { %v623_v13 = vrot.slane %v6497_v55, %v622_v3  ;;  %v4710_v2 = vadd.f32 %v3456_v38, %v619_v47  ;;  %v631_v36 = vrot.slane %v6497_v55, %v630_v12  ;;  %v627_v34 = vrot.slane %v6497_v55, %v626_v20  ;;  %s6659_s21 = sld [smem:[#allocation28_spill]]  ;;  %s3703_s0 = scalar_lea.sflag [#allocation7], %s5518_s28 }
 0x62d   : > { %s5078_s12 = scalar_lea.vmem %s6552_s29, 128  ;;  %s5200_s9 = smov [#allocation16]  }
 0x62e   : > { %v4712_v14 = vadd.f32 %v3457_v10, %v623_v13  ;;  %v4716_v7 = vadd.f32 %v3459_v9, %v631_v36  ;;  %v4714_v32 = vadd.f32 %v3458_v30, %v627_v34  ;;  %p5079_p13 = scmp.ne.s32.totalorder %s6552_s29, %s5078_s12  ;;  %s5082_s18 = sshll.u32 %s5200_s9, 4  ;;  %s5083_s18 = int_to_ptr.vmem [resolvable:$false] %s5082_s18 }
 0x62f   : > { %s5084_s11 = scalar_lea.vmem %s5083_s18, 256  ;;  %p5085_p4 = scmp.lt.s32.totalorder %s6552_s29, %s5083_s18 }
 0x630   : > { %p5080_p11 = pnand %p5079_p13, %p6657_p1  ;;  %p5086_p6 = scmp.lt.s32.totalorder %s5084_s11, %s5078_s12 }
 0x632   : > { %s6550_s1 = scalar_lea.hbm %s6659_s21, %s6658_s23  ;;  %p5081_p2 = pneg %p5080_p11 }
 0x633   : > { %p5087_p9 = por %p5086_p6, %p5085_p4 }
 0x635   : > { %p5088_p10 = pnand %p5087_p9, %p5081_p2 }
 0x6f0   : > { %v3590_v27 = vpop.f32.mrb[0].mxu0  ;;  %v3661_v45 = vpop.f32.mrb[0].mxu1 }
 0x6f1   : > { %v4711_v33 = vadd.f32 %v4710_v2, %v3590_v27  ;;  %v3592_v48 = vpop.f32.mrb[1].mxu0  ;;  %v3663_v50 = vpop.f32.mrb[1].mxu1  ;;  %v4715_v59 = vadd.f32 %v4714_v32, %v3661_v45 }
 0x6f2   : > { %v4713_v53 = vadd.f32 %v4712_v14, %v3592_v48  ;;  %v4717_v17 = vadd.f32 %v4716_v7, %v3663_v50 }
 0x6f3   : > { %v3932_v8 = vmul.f32 -1.442695, %v4711_v33 }
 0x6f4   : > { %v3933_v58 = vmul.f32 -1.442695, %v4713_v53  ;;  %v3934_v15 = vmul.f32 -1.442695, %v4717_v17 }
 0x6f5   : > { %4861 = vpow2.f32 %v3932_v8 }
 0x6f6   : > { %4863 = vpow2.f32 %v3933_v58 }
 0x6f7   : > { %4865 = vpow2.f32 %v3934_v15 }
 0x6f8   : > { %4867 = vtanh.f32 %v4715_v59 }
 0x6ff   : > { %v4862_v46 = vpop.eup %4861 }
 0x700   : > { %v4864_v28 = vpop.eup %4863  ;;  %v3677_v54 = vadd.f32 1.0, %v4862_v46 }
 0x701   : > { %v3683_v41 = vadd.f32 1.0, %v4864_v28  ;;  %v4866_v19 = vpop.eup %4865 }
 0x702   : > { %4869 = vrcp.f32 %v3677_v54  ;;  %v4868_v21 = vpop.eup %4867  ;;  %v3690_v63 = vadd.f32 1.0, %v4866_v19 }
 0x703   : > { %4871 = vrcp.f32 %v3683_v41 }
 0x704   : > { %4873 = vrcp.f32 %v3690_v63 }
 0x70c   : > { %v4870_v26 = vpop.eup %4869 }
 0x70d   : > { %v4872_v25 = vpop.eup %4871  ;;  %v3694_v16 = vmul.f32 %v4870_v26, %v4868_v21 }
 0x70e   : > { %v3693_v42 = vmul.f32 %v4872_v25, %v517_v24  ;;  %v4874_v29 = vpop.eup %4873 }
 0x710   : > { %v3695_v11 = vadd.f32 %v3694_v16, %v3693_v42 }
 0x712   : > { %3699 = vst [vmem:[#allocation3] sm:$0xff] %v3695_v11  ;;  %4875 = vtanh.f32 %v3695_v11 }
 0x71c   : > { %v4876_v55 = vpop.eup %4875 }
 0x71d   : > { %v3697_v40 = vmul.f32 %v4876_v55, %v4874_v29 }
 0x71f   : > { %3698 = vst [vmem:[#allocation2] sm:$0xff] %v3697_v40  ;;  %3700 = vst [vmem:[%s5536_s26] sm:$0xff] %v3697_v40 }
 0x720   : > { %5091 = shalt.err (!%p5088_p10)
}
 0x721   : > { %s5092_s28 = scalar_lea.hbm %s6550_s1, 128  ;;  %s5096_s10 = scalar_lea.hbm %s6659_s21, 1024 }
 0x722   : > { %p5093_p8 = scmp.ne.s32.totalorder %s6550_s1, %s5092_s28  ;;  %p5097_p12 = scmp.lt.u32.totalorder %s6550_s1, %s6659_s21 }
 0x723   : > { %p5098_p5 = scmp.lt.u32.totalorder %s5096_s10, %s5092_s28  ;;  %p5100_p13 = scmp.lt.u32.totalorder %s5092_s28, %s6550_s1 }
 0x724   : > { %p5094_p7 = pnand %p5093_p8, %p6657_p1 }
 0x725   : > { %p5099_p0 = por %p5098_p5, %p5097_p12 }
 0x726   : > { %p5095_p3 = pneg %p5094_p7 }
 0x727   : > { %p5101_p11 = por %p5100_p13, %p5099_p0 }
 0x729   : > { %p5102_p2 = pnand %p5101_p11, %p5095_p3 }
 0x72b   : > { %5105 = shalt.err (!%p5102_p2)
}
 0x72c   : > { %4744 = dma.vmem_to_hbm [thread:$0]  (%p6657_p1), %s6552_s29, 128, %s6550_s1, %s3703_s0  }
 0x72d PF: > { %p4786_p4 = scmp.ge.s32.totalorder %s5180_s7, 2  ;;  %s3748_s25 = sand.u32 1, %s5160_s15  }
 0x72e   : > { %p6660_p6 = scmp.ne.s32.totalorder %s6639_s20, 0  ;;  %s3749_s12 = scalar_lea.sflag [#allocation7], %s3748_s25 }
 0x730   : > { %p4769_p9 = pnand %p4786_p4, %p6660_p6 }
 0x732   : > { %5151 = dma.done.wait (!%p4769_p9), %s3749_s12, 128  }
 0x733   : > { %5153 = vsyncadd (!%p4769_p9), %s3749_s12, 4294967168  ;;  %s3758_s9 = scalar_lea.sflag [#allocation18], %s3748_s25 }
 0x734   : > { %5155 = dma.done.wait (!%p4769_p9), %s3758_s9, 128  }
 0x735   : > { %5157 = vsyncadd (!%p4769_p9), %s3758_s9, 4294967168  ;;  %s35_s7 = sadd.s32 1, %s5180_s7   ;;  %s6661_s15 = smov %s5164_s16 }
 0x736   : > { %p32_p10 = scmp.ge.s32.totalorder %s35_s7, 10   ;;  %s6662_s16 = smov %s5168_s17 }
 0x737   : > { %s6663_s17 = smov %s5459_s13  ;;  %s6664_s18 = smov %s5176_s19 }
 0x738   : > { %s6665_s19 = smov %s6667_s27  ;;  %34 = sbr.rel (!%p32_p10) target bundleno = 16 (0x10), region = 146 }
 0x73f   :  { %3763 = vsyncpa [#allocation6], 1 }
 0x740   :  { %3765 = vsyncpa [#allocation6 + $0x1], 1 }
 0x741   :  { %3766 = vsyncpa [#allocation9], 1 }
 0x742   :  { %3767 = vsyncpa [#allocation12], 1 }
 0x743   :  { %3769 = vsyncpa [#allocation12 + $0x1], 1 }
 0x744   :  { %3770 = vsyncpa [#allocation15], 1 }
 0x745   :  { %3771 = vsyncpa [#allocation7], 1 }
 0x746   :  { %3773 = vsyncpa [#allocation7 + $0x1], 1 }
 0x747   :  { %3774 = vsyncpa [#allocation18], 1 }
 0x748   :  { %3776 = vsyncpa [#allocation18 + $0x1], 1 }

</bundles_post_ra>
